<compile_context>
chip_gen: v5e
topology: v5e:2x2
jax: 0.10.0
libtpu: 0.0.40
codegen_flags: <defaults>
</compile_context>

<pallas_src>
import functools

import jax
import jax.numpy as jnp
from jax.experimental import pallas as pl
from jax.experimental.pallas import tpu as pltpu

D_IN = 13
D_OUT = 1
H = 100

HP = 128   # hidden padded to one lane tile -> gate blocks at 0/128/256/384
DP = 128   # input features padded to one lane tile (clean MXU K)
SUB = 8    # sublane replication of the single live batch row


def fused_jstocks_kernel(x_ref, wih_ref, whh_ref, b_ref, wlin_ref, blin_ref,
                         out_ref, xproj_ref, hsel_ref, *, seq_len):
    """Refs:
       x_ref:     (seq_len, DP)    selected batch row, zero lane-padded
       wih_ref:   (DP, 4*HP)       padded W_ih^T (g-gate block pre-scaled by 2)
       whh_ref:   (HP, 4*HP)       padded W_hh^T (g-gate block pre-scaled by 2)
       b_ref:     (1, 4*HP)        padded b_ih + b_hh (g block pre-scaled by 2)
       wlin_ref:  (1, HP)          padded head weight row
       blin_ref:  (1, 1)           head bias
       out_ref:   (seq_len, 1)
       xproj_ref: (seq_len, 4*HP)  VMEM scratch: hoisted input projection
       hsel_ref:  (seq_len, HP)    VMEM scratch: selected hidden row per step
    """
    # Hoisted out of the recurrence: input projection for ALL timesteps, bias
    # folded in once.  Streamed to VMEM scratch so nothing large stays live in
    # vregs across the serial loop.
    xproj_ref[...] = jnp.dot(x_ref[...], wih_ref[...],
                             preferred_element_type=jnp.float32) + b_ref[...]

    h0 = jnp.zeros((SUB, HP), jnp.float32)
    c0 = jnp.zeros((SUB, HP), jnp.float32)

    def step(t, carry):
        h, c = carry
        # Serial critical path: one (8,128)x(128,512) MXU matmul per step.
        # W_hh and the xproj row are read from VMEM refs inside the loop body
        # (bounded live ranges, no spill pressure from a 64-vreg weight value).
        gates = xproj_ref[pl.ds(t, 1), :] + jnp.dot(
            h, whh_ref[...], preferred_element_type=jnp.float32)   # (8, 4*HP)
        # One fused sigmoid over all four gate blocks (single EUP stream).
        # g columns were pre-scaled by 2, so tanh(g) == 2*sigmoid(2g) - 1.
        s = jax.nn.sigmoid(gates)
        i_g = s[:, 0 * HP:1 * HP]
        f_g = s[:, 1 * HP:2 * HP]
        g_g = 2.0 * s[:, 2 * HP:3 * HP] - 1.0
        o_g = s[:, 3 * HP:4 * HP]
        c = f_g * c + i_g * g_g
        # tanh(c) == 2*sigmoid(2c) - 1: keeps the step on one EUP op type.
        h = o_g * (2.0 * jax.nn.sigmoid(2.0 * c) - 1.0)
        # lstm_out[:, -1, :] -> the selected (replicated) batch row, each step.
        hsel_ref[pl.ds(t, 1), :] = h[0:1, :]
        return (h, c)

    # Static trip count; fully unrolled only for small seq_len so the LLO
    # scheduler can interleave the next step's matmul with this step's tail
    # without unbounded code-size / vreg-pressure growth for long sequences.
    jax.lax.fori_loop(0, seq_len, step, (h0, c0), unroll=(seq_len <= 64))

    # Head: Linear(H, 1) as broadcast-multiply + lane reduction + sigmoid.
    logits = jnp.sum(hsel_ref[...] * wlin_ref[...], axis=-1,
                     keepdims=True) + blin_ref[...]                 # (S, 1)
    out_ref[...] = jax.nn.sigmoid(logits).astype(out_ref.dtype)


def jstocks_forward(x, params):
    seq_len, batch, _ = x.shape
    # The LSTM has no cross-batch mixing and the head only ever reads
    # lstm_out[:, -1, :] (last BATCH element at every timestep, faithful to the
    # PyTorch source), so only that single batch row goes through the
    # recurrence -- all other batch rows are dead work.
    x_sel = x[:, batch - 1, :].astype(jnp.float32)                  # (S, D_in)
    x_p = jnp.zeros((seq_len, DP), jnp.float32).at[:, :D_IN].set(x_sel)

    kernel = functools.partial(fused_jstocks_kernel, seq_len=seq_len)
    return pl.pallas_call(
        kernel,
        out_shape=jax.ShapeDtypeStruct((seq_len, D_OUT), jnp.float32),
        scratch_shapes=[pltpu.VMEM((seq_len, 4 * HP), jnp.float32),
                        pltpu.VMEM((seq_len, HP), jnp.float32)],
    )(x_p, params["w_ih_p"], params["w_hh_p"], params["b_p"],
      params["w_lin_p"], params["b_lin_p"])


# -----------------------------------------------------------------------------
# Parameter preparation.  Padding keeps gate blocks lane-aligned; zeros in the
# padded rows/columns guarantee padded hidden/cell lanes stay exactly 0.  The
# g-gate block (index 2) is pre-scaled by 2 so the kernel can use a single
# fused sigmoid and recover tanh via 2*sigmoid(2x)-1.
# -----------------------------------------------------------------------------
def _pad_gate_matrix(w, in_dim, in_pad):
    # w: (4*H, in_dim) PyTorch layout (gate order i, f, g, o)
    #   -> (in_pad, 4*HP): transposed, each gate block zero-padded H -> HP.
    w4 = w.reshape(4, H, in_dim)
    w4 = jnp.pad(w4, ((0, 0), (0, HP - H), (0, in_pad - in_dim)))
    w4 = w4.at[2].multiply(2.0)                 # pre-scale g gate by 2
    return jnp.transpose(w4, (2, 0, 1)).reshape(in_pad, 4 * HP)


def _pad_gate_bias(b):
    b4 = b.reshape(4, H)
    b4 = jnp.pad(b4, ((0, 0), (0, HP - H)))
    b4 = b4.at[2].multiply(2.0)                 # pre-scale g gate by 2
    return b4.reshape(1, 4 * HP)


def init_params(key):
    # PyTorch-default init: U(-1/sqrt(H), 1/sqrt(H)).
    ks = jax.random.split(key, 6)
    bound = 1.0 / jnp.sqrt(jnp.float32(H))
    w_ih = jax.random.uniform(ks[0], (4 * H, D_IN), jnp.float32, -bound, bound)
    w_hh = jax.random.uniform(ks[1], (4 * H, H), jnp.float32, -bound, bound)
    b_ih = jax.random.uniform(ks[2], (4 * H,), jnp.float32, -bound, bound)
    b_hh = jax.random.uniform(ks[3], (4 * H,), jnp.float32, -bound, bound)
    w_lin = jax.random.uniform(ks[4], (D_OUT, H), jnp.float32, -bound, bound)
    b_lin = jax.random.uniform(ks[5], (D_OUT,), jnp.float32, -bound, bound)

    raw = dict(w_ih=w_ih, w_hh=w_hh, b_ih=b_ih, b_hh=b_hh,
               w_lin=w_lin, b_lin=b_lin)
    padded = {
        "w_ih_p": _pad_gate_matrix(w_ih, D_IN, DP),        # (DP, 4*HP)
        "w_hh_p": _pad_gate_matrix(w_hh, H, HP),           # (HP, 4*HP)
        "b_p": _pad_gate_bias(b_ih + b_hh),                # (1, 4*HP)
        "w_lin_p": jnp.pad(w_lin, ((0, 0), (0, HP - H))),  # (1, HP)
        "b_lin_p": b_lin.reshape(1, D_OUT),                # (1, 1)
    }
    return padded, raw


# -----------------------------------------------------------------------------
# Pure-JAX reference (same intentional lstm_out[:, -1, :] semantics).
# -----------------------------------------------------------------------------
def jstocks_reference(x, raw):
    batch = x.shape[1]
    w_ih, w_hh = raw["w_ih"], raw["w_hh"]
    b = raw["b_ih"] + raw["b_hh"]
    hi = jax.lax.Precision.HIGHEST

    def step(carry, x_t):
        h, c = carry
        gates = (jnp.dot(x_t, w_ih.T, precision=hi)
                 + jnp.dot(h, w_hh.T, precision=hi) + b)
        i_g, f_g, g_g, o_g = jnp.split(gates, 4, axis=-1)
        i_g, f_g, o_g = (jax.nn.sigmoid(i_g), jax.nn.sigmoid(f_g),
                         jax.nn.sigmoid(o_g))
        g_g = jnp.tanh(g_g)
        c = f_g * c + i_g * g_g
        h = o_g * jnp.tanh(c)
        return (h, c), h

    init = (jnp.zeros((batch, H), jnp.float32),
            jnp.zeros((batch, H), jnp.float32))
    _, hs = jax.lax.scan(step, init, x)        # (S, B, H)
    h_sel = hs[:, -1, :]                       # (S, H) last batch element
    return jax.nn.sigmoid(
        jnp.dot(h_sel, raw["w_lin"].T, precision=hi) + raw["b_lin"])


if __name__ == "__main__":
    key = jax.random.PRNGKey(0)
    k_x, k_p = jax.random.split(key)

    SEQ, BATCH = 8, 2
    x = jax.random.normal(k_x, (SEQ, BATCH, D_IN), jnp.float32)
    params, raw = init_params(k_p)

    out = jax.jit(jstocks_forward)(x, params)
    out = jax.block_until_ready(out)

    ref = jstocks_reference(x, raw)

    assert out.shape == (SEQ, D_OUT)
    assert bool(jnp.all(jnp.isfinite(out)))
    assert bool(jnp.all((out >= 0.0) & (out <= 1.0)))
    assert bool(jnp.allclose(out, ref, atol=2e-3, rtol=0.0)), (
        f"max abs diff vs reference: {float(jnp.max(jnp.abs(out - ref)))}")
    print("KERNEL_OK")
</pallas_src>

<mosaic_0001>
module attributes {stable_mosaic.version = 11 : i64} {
  func.func @fused_jstocks_kernel(%arg0: memref<8x128xf32, #tpu.memory_space<vmem>>, %arg1: memref<128x512xf32, #tpu.memory_space<vmem>>, %arg2: memref<128x512xf32, #tpu.memory_space<vmem>>, %arg3: memref<1x512xf32, #tpu.memory_space<vmem>>, %arg4: memref<1x128xf32, #tpu.memory_space<vmem>>, %arg5: memref<1x1xf32, #tpu.memory_space<vmem>>, %arg6: memref<8x1xf32, #tpu.memory_space<vmem>>, %arg7: memref<8x512xf32, #tpu.memory_space<vmem>>, %arg8: memref<8x128xf32, #tpu.memory_space<vmem>>) attributes {dimension_semantics = [], scalar_prefetch = 0 : i64, scratch_operands = 2 : i64, tpu.core_type = #tpu.core_type<tc>} {
    %c0 = arith.constant 0 : index
    %c0_0 = arith.constant 0 : index
    %0 = vector.load %arg0[%c0, %c0_0] : memref<8x128xf32, #tpu.memory_space<vmem>>, vector<8x128xf32>
    %c0_1 = arith.constant 0 : index
    %c0_2 = arith.constant 0 : index
    %1 = vector.load %arg1[%c0_1, %c0_2] : memref<128x512xf32, #tpu.memory_space<vmem>>, vector<128x512xf32>
    %cst = arith.constant dense<0.000000e+00> : vector<8x512xf32>
    %2 = tpu.matmul %0, %1, %cst {dimension_numbers = #tpu.dot_dimension_numbers<[1], [0], [0], [1], [0, 0, 1, 1], [], []>} : vector<8x128xf32>, vector<128x512xf32>, vector<8x512xf32> -> vector<8x512xf32>
    %c0_3 = arith.constant 0 : index
    %c0_4 = arith.constant 0 : index
    %3 = vector.load %arg3[%c0_3, %c0_4] : memref<1x512xf32, #tpu.memory_space<vmem>>, vector<1x512xf32>
    %4 = vector.broadcast %3 : vector<1x512xf32> to vector<8x512xf32>
    %5 = arith.addf %2, %4 : vector<8x512xf32>
    %c0_5 = arith.constant 0 : index
    %c0_6 = arith.constant 0 : index
    %6 = vector.load %arg7[%c0_5, %c0_6] : memref<8x512xf32, #tpu.memory_space<vmem>>, vector<8x512xf32>
    tpu.vector_store %arg7[%c0_5, %c0_6], %5 {strides = array<i32>} : memref<8x512xf32, #tpu.memory_space<vmem>>, vector<8x512xf32>,
    %cst_7 = arith.constant 0.000000e+00 : f32
    %7 = vector.broadcast %cst_7 : f32 to vector<8x128xf32>
    %cst_8 = arith.constant 0.000000e+00 : f32
    %8 = vector.broadcast %cst_8 : f32 to vector<8x128xf32>
    %c0_i32 = arith.constant 0 : i32
    %9 = arith.index_cast %c0_i32 : i32 to index
    %c0_9 = arith.constant 0 : index
    %10 = vector.load %arg7[%9, %c0_9] : memref<8x512xf32, #tpu.memory_space<vmem>>, vector<1x512xf32>
    %c0_10 = arith.constant 0 : index
    %c0_11 = arith.constant 0 : index
    %11 = vector.load %arg2[%c0_10, %c0_11] : memref<128x512xf32, #tpu.memory_space<vmem>>, vector<128x512xf32>
    %cst_12 = arith.constant dense<0.000000e+00> : vector<8x512xf32>
    %12 = tpu.matmul %7, %11, %cst_12 {dimension_numbers = #tpu.dot_dimension_numbers<[1], [0], [0], [1], [0, 0, 1, 1], [], []>} : vector<8x128xf32>, vector<128x512xf32>, vector<8x512xf32> -> vector<8x512xf32>
    %13 = vector.broadcast %10 : vector<1x512xf32> to vector<8x512xf32>
    %14 = arith.addf %13, %12 : vector<8x512xf32>
    %15 = arith.negf %14 : vector<8x512xf32>
    %16 = math.exp %15 : vector<8x512xf32>
    %cst_13 = arith.constant 1.000000e+00 : f32
    %17 = vector.broadcast %cst_13 : f32 to vector<8x512xf32>
    %18 = arith.addf %17, %16 : vector<8x512xf32>
    %19 = arith.divf %17, %18 : vector<8x512xf32>
    %20 = vector.extract_strided_slice %19 {offsets = [0, 0], sizes = [8, 128], strides = [1, 1]} : vector<8x512xf32> to vector<8x128xf32>
    %21 = vector.extract_strided_slice %19 {offsets = [0, 128], sizes = [8, 128], strides = [1, 1]} : vector<8x512xf32> to vector<8x128xf32>
    %22 = vector.extract_strided_slice %19 {offsets = [0, 256], sizes = [8, 128], strides = [1, 1]} : vector<8x512xf32> to vector<8x128xf32>
    %cst_14 = arith.constant 2.000000e+00 : f32
    %23 = vector.broadcast %cst_14 : f32 to vector<8x128xf32>
    %24 = arith.mulf %23, %22 : vector<8x128xf32>
    %cst_15 = arith.constant 1.000000e+00 : f32
    %25 = vector.broadcast %cst_15 : f32 to vector<8x128xf32>
    %26 = arith.subf %24, %25 : vector<8x128xf32>
    %27 = vector.extract_strided_slice %19 {offsets = [0, 384], sizes = [8, 128], strides = [1, 1]} : vector<8x512xf32> to vector<8x128xf32>
    %28 = arith.mulf %21, %8 : vector<8x128xf32>
    %29 = arith.mulf %20, %26 : vector<8x128xf32>
    %30 = arith.addf %28, %29 : vector<8x128xf32>
    %cst_16 = arith.constant 2.000000e+00 : f32
    %31 = vector.broadcast %cst_16 : f32 to vector<8x128xf32>
    %32 = arith.mulf %31, %30 : vector<8x128xf32>
    %33 = arith.negf %32 : vector<8x128xf32>
    %34 = math.exp %33 : vector<8x128xf32>
    %cst_17 = arith.constant 1.000000e+00 : f32
    %35 = vector.broadcast %cst_17 : f32 to vector<8x128xf32>
    %36 = arith.addf %35, %34 : vector<8x128xf32>
    %37 = arith.divf %35, %36 : vector<8x128xf32>
    %cst_18 = arith.constant 2.000000e+00 : f32
    %38 = vector.broadcast %cst_18 : f32 to vector<8x128xf32>
    %39 = arith.mulf %38, %37 : vector<8x128xf32>
    %cst_19 = arith.constant 1.000000e+00 : f32
    %40 = vector.broadcast %cst_19 : f32 to vector<8x128xf32>
    %41 = arith.subf %39, %40 : vector<8x128xf32>
    %42 = arith.mulf %27, %41 : vector<8x128xf32>
    %43 = vector.extract_strided_slice %42 {offsets = [0, 0], sizes = [1, 128], strides = [1, 1]} : vector<8x128xf32> to vector<1x128xf32>
    %44 = arith.index_cast %c0_i32 : i32 to index
    %c0_20 = arith.constant 0 : index
    %45 = vector.load %arg8[%44, %c0_20] : memref<8x128xf32, #tpu.memory_space<vmem>>, vector<1x128xf32>
    tpu.vector_store %arg8[%44, %c0_20], %43 {strides = array<i32>} : memref<8x128xf32, #tpu.memory_space<vmem>>, vector<1x128xf32>,
    %c1_i32 = arith.constant 1 : i32
    %46 = arith.index_cast %c1_i32 : i32 to index
    %c0_21 = arith.constant 0 : index
    %47 = vector.load %arg7[%46, %c0_21] : memref<8x512xf32, #tpu.memory_space<vmem>>, vector<1x512xf32>
    %c0_22 = arith.constant 0 : index
    %c0_23 = arith.constant 0 : index
    %48 = vector.load %arg2[%c0_22, %c0_23] : memref<128x512xf32, #tpu.memory_space<vmem>>, vector<128x512xf32>
    %cst_24 = arith.constant dense<0.000000e+00> : vector<8x512xf32>
    %49 = tpu.matmul %42, %48, %cst_24 {dimension_numbers = #tpu.dot_dimension_numbers<[1], [0], [0], [1], [0, 0, 1, 1], [], []>} : vector<8x128xf32>, vector<128x512xf32>, vector<8x512xf32> -> vector<8x512xf32>
    %50 = vector.broadcast %47 : vector<1x512xf32> to vector<8x512xf32>
    %51 = arith.addf %50, %49 : vector<8x512xf32>
    %52 = arith.negf %51 : vector<8x512xf32>
    %53 = math.exp %52 : vector<8x512xf32>
    %cst_25 = arith.constant 1.000000e+00 : f32
    %54 = vector.broadcast %cst_25 : f32 to vector<8x512xf32>
    %55 = arith.addf %54, %53 : vector<8x512xf32>
    %56 = arith.divf %54, %55 : vector<8x512xf32>
    %57 = vector.extract_strided_slice %56 {offsets = [0, 0], sizes = [8, 128], strides = [1, 1]} : vector<8x512xf32> to vector<8x128xf32>
    %58 = vector.extract_strided_slice %56 {offsets = [0, 128], sizes = [8, 128], strides = [1, 1]} : vector<8x512xf32> to vector<8x128xf32>
    %59 = vector.extract_strided_slice %56 {offsets = [0, 256], sizes = [8, 128], strides = [1, 1]} : vector<8x512xf32> to vector<8x128xf32>
    %cst_26 = arith.constant 2.000000e+00 : f32
    %60 = vector.broadcast %cst_26 : f32 to vector<8x128xf32>
    %61 = arith.mulf %60, %59 : vector<8x128xf32>
    %cst_27 = arith.constant 1.000000e+00 : f32
    %62 = vector.broadcast %cst_27 : f32 to vector<8x128xf32>
    %63 = arith.subf %61, %62 : vector<8x128xf32>
    %64 = vector.extract_strided_slice %56 {offsets = [0, 384], sizes = [8, 128], strides = [1, 1]} : vector<8x512xf32> to vector<8x128xf32>
    %65 = arith.mulf %58, %30 : vector<8x128xf32>
    %66 = arith.mulf %57, %63 : vector<8x128xf32>
    %67 = arith.addf %65, %66 : vector<8x128xf32>
    %cst_28 = arith.constant 2.000000e+00 : f32
    %68 = vector.broadcast %cst_28 : f32 to vector<8x128xf32>
    %69 = arith.mulf %68, %67 : vector<8x128xf32>
    %70 = arith.negf %69 : vector<8x128xf32>
    %71 = math.exp %70 : vector<8x128xf32>
    %cst_29 = arith.constant 1.000000e+00 : f32
    %72 = vector.broadcast %cst_29 : f32 to vector<8x128xf32>
    %73 = arith.addf %72, %71 : vector<8x128xf32>
    %74 = arith.divf %72, %73 : vector<8x128xf32>
    %cst_30 = arith.constant 2.000000e+00 : f32
    %75 = vector.broadcast %cst_30 : f32 to vector<8x128xf32>
    %76 = arith.mulf %75, %74 : vector<8x128xf32>
    %cst_31 = arith.constant 1.000000e+00 : f32
    %77 = vector.broadcast %cst_31 : f32 to vector<8x128xf32>
    %78 = arith.subf %76, %77 : vector<8x128xf32>
    %79 = arith.mulf %64, %78 : vector<8x128xf32>
    %80 = vector.extract_strided_slice %79 {offsets = [0, 0], sizes = [1, 128], strides = [1, 1]} : vector<8x128xf32> to vector<1x128xf32>
    %81 = arith.index_cast %c1_i32 : i32 to index
    %c0_32 = arith.constant 0 : index
    %82 = vector.load %arg8[%81, %c0_32] : memref<8x128xf32, #tpu.memory_space<vmem>>, vector<1x128xf32>
    tpu.vector_store %arg8[%81, %c0_32], %80 {strides = array<i32>} : memref<8x128xf32, #tpu.memory_space<vmem>>, vector<1x128xf32>,
    %c2_i32 = arith.constant 2 : i32
    %83 = arith.index_cast %c2_i32 : i32 to index
    %c0_33 = arith.constant 0 : index
    %84 = vector.load %arg7[%83, %c0_33] : memref<8x512xf32, #tpu.memory_space<vmem>>, vector<1x512xf32>
    %c0_34 = arith.constant 0 : index
    %c0_35 = arith.constant 0 : index
    %85 = vector.load %arg2[%c0_34, %c0_35] : memref<128x512xf32, #tpu.memory_space<vmem>>, vector<128x512xf32>
    %cst_36 = arith.constant dense<0.000000e+00> : vector<8x512xf32>
    %86 = tpu.matmul %79, %85, %cst_36 {dimension_numbers = #tpu.dot_dimension_numbers<[1], [0], [0], [1], [0, 0, 1, 1], [], []>} : vector<8x128xf32>, vector<128x512xf32>, vector<8x512xf32> -> vector<8x512xf32>
    %87 = vector.broadcast %84 : vector<1x512xf32> to vector<8x512xf32>
    %88 = arith.addf %87, %86 : vector<8x512xf32>
    %89 = arith.negf %88 : vector<8x512xf32>
    %90 = math.exp %89 : vector<8x512xf32>
    %cst_37 = arith.constant 1.000000e+00 : f32
    %91 = vector.broadcast %cst_37 : f32 to vector<8x512xf32>
    %92 = arith.addf %91, %90 : vector<8x512xf32>
    %93 = arith.divf %91, %92 : vector<8x512xf32>
    %94 = vector.extract_strided_slice %93 {offsets = [0, 0], sizes = [8, 128], strides = [1, 1]} : vector<8x512xf32> to vector<8x128xf32>
    %95 = vector.extract_strided_slice %93 {offsets = [0, 128], sizes = [8, 128], strides = [1, 1]} : vector<8x512xf32> to vector<8x128xf32>
    %96 = vector.extract_strided_slice %93 {offsets = [0, 256], sizes = [8, 128], strides = [1, 1]} : vector<8x512xf32> to vector<8x128xf32>
    %cst_38 = arith.constant 2.000000e+00 : f32
    %97 = vector.broadcast %cst_38 : f32 to vector<8x128xf32>
    %98 = arith.mulf %97, %96 : vector<8x128xf32>
    %cst_39 = arith.constant 1.000000e+00 : f32
    %99 = vector.broadcast %cst_39 : f32 to vector<8x128xf32>
    %100 = arith.subf %98, %99 : vector<8x128xf32>
    %101 = vector.extract_strided_slice %93 {offsets = [0, 384], sizes = [8, 128], strides = [1, 1]} : vector<8x512xf32> to vector<8x128xf32>
    %102 = arith.mulf %95, %67 : vector<8x128xf32>
    %103 = arith.mulf %94, %100 : vector<8x128xf32>
    %104 = arith.addf %102, %103 : vector<8x128xf32>
    %cst_40 = arith.constant 2.000000e+00 : f32
    %105 = vector.broadcast %cst_40 : f32 to vector<8x128xf32>
    %106 = arith.mulf %105, %104 : vector<8x128xf32>
    %107 = arith.negf %106 : vector<8x128xf32>
    %108 = math.exp %107 : vector<8x128xf32>
    %cst_41 = arith.constant 1.000000e+00 : f32
    %109 = vector.broadcast %cst_41 : f32 to vector<8x128xf32>
    %110 = arith.addf %109, %108 : vector<8x128xf32>
    %111 = arith.divf %109, %110 : vector<8x128xf32>
    %cst_42 = arith.constant 2.000000e+00 : f32
    %112 = vector.broadcast %cst_42 : f32 to vector<8x128xf32>
    %113 = arith.mulf %112, %111 : vector<8x128xf32>
    %cst_43 = arith.constant 1.000000e+00 : f32
    %114 = vector.broadcast %cst_43 : f32 to vector<8x128xf32>
    %115 = arith.subf %113, %114 : vector<8x128xf32>
    %116 = arith.mulf %101, %115 : vector<8x128xf32>
    %117 = vector.extract_strided_slice %116 {offsets = [0, 0], sizes = [1, 128], strides = [1, 1]} : vector<8x128xf32> to vector<1x128xf32>
    %118 = arith.index_cast %c2_i32 : i32 to index
    %c0_44 = arith.constant 0 : index
    %119 = vector.load %arg8[%118, %c0_44] : memref<8x128xf32, #tpu.memory_space<vmem>>, vector<1x128xf32>
    tpu.vector_store %arg8[%118, %c0_44], %117 {strides = array<i32>} : memref<8x128xf32, #tpu.memory_space<vmem>>, vector<1x128xf32>,
    %c3_i32 = arith.constant 3 : i32
    %120 = arith.index_cast %c3_i32 : i32 to index
    %c0_45 = arith.constant 0 : index
    %121 = vector.load %arg7[%120, %c0_45] : memref<8x512xf32, #tpu.memory_space<vmem>>, vector<1x512xf32>
    %c0_46 = arith.constant 0 : index
    %c0_47 = arith.constant 0 : index
    %122 = vector.load %arg2[%c0_46, %c0_47] : memref<128x512xf32, #tpu.memory_space<vmem>>, vector<128x512xf32>
    %cst_48 = arith.constant dense<0.000000e+00> : vector<8x512xf32>
    %123 = tpu.matmul %116, %122, %cst_48 {dimension_numbers = #tpu.dot_dimension_numbers<[1], [0], [0], [1], [0, 0, 1, 1], [], []>} : vector<8x128xf32>, vector<128x512xf32>, vector<8x512xf32> -> vector<8x512xf32>
    %124 = vector.broadcast %121 : vector<1x512xf32> to vector<8x512xf32>
    %125 = arith.addf %124, %123 : vector<8x512xf32>
    %126 = arith.negf %125 : vector<8x512xf32>
    %127 = math.exp %126 : vector<8x512xf32>
    %cst_49 = arith.constant 1.000000e+00 : f32
    %128 = vector.broadcast %cst_49 : f32 to vector<8x512xf32>
    %129 = arith.addf %128, %127 : vector<8x512xf32>
    %130 = arith.divf %128, %129 : vector<8x512xf32>
    %131 = vector.extract_strided_slice %130 {offsets = [0, 0], sizes = [8, 128], strides = [1, 1]} : vector<8x512xf32> to vector<8x128xf32>
    %132 = vector.extract_strided_slice %130 {offsets = [0, 128], sizes = [8, 128], strides = [1, 1]} : vector<8x512xf32> to vector<8x128xf32>
    %133 = vector.extract_strided_slice %130 {offsets = [0, 256], sizes = [8, 128], strides = [1, 1]} : vector<8x512xf32> to vector<8x128xf32>
    %cst_50 = arith.constant 2.000000e+00 : f32
    %134 = vector.broadcast %cst_50 : f32 to vector<8x128xf32>
    %135 = arith.mulf %134, %133 : vector<8x128xf32>
    %cst_51 = arith.constant 1.000000e+00 : f32
    %136 = vector.broadcast %cst_51 : f32 to vector<8x128xf32>
    %137 = arith.subf %135, %136 : vector<8x128xf32>
    %138 = vector.extract_strided_slice %130 {offsets = [0, 384], sizes = [8, 128], strides = [1, 1]} : vector<8x512xf32> to vector<8x128xf32>
    %139 = arith.mulf %132, %104 : vector<8x128xf32>
    %140 = arith.mulf %131, %137 : vector<8x128xf32>
    %141 = arith.addf %139, %140 : vector<8x128xf32>
    %cst_52 = arith.constant 2.000000e+00 : f32
    %142 = vector.broadcast %cst_52 : f32 to vector<8x128xf32>
    %143 = arith.mulf %142, %141 : vector<8x128xf32>
    %144 = arith.negf %143 : vector<8x128xf32>
    %145 = math.exp %144 : vector<8x128xf32>
    %cst_53 = arith.constant 1.000000e+00 : f32
    %146 = vector.broadcast %cst_53 : f32 to vector<8x128xf32>
    %147 = arith.addf %146, %145 : vector<8x128xf32>
    %148 = arith.divf %146, %147 : vector<8x128xf32>
    %cst_54 = arith.constant 2.000000e+00 : f32
    %149 = vector.broadcast %cst_54 : f32 to vector<8x128xf32>
    %150 = arith.mulf %149, %148 : vector<8x128xf32>
    %cst_55 = arith.constant 1.000000e+00 : f32
    %151 = vector.broadcast %cst_55 : f32 to vector<8x128xf32>
    %152 = arith.subf %150, %151 : vector<8x128xf32>
    %153 = arith.mulf %138, %152 : vector<8x128xf32>
    %154 = vector.extract_strided_slice %153 {offsets = [0, 0], sizes = [1, 128], strides = [1, 1]} : vector<8x128xf32> to vector<1x128xf32>
    %155 = arith.index_cast %c3_i32 : i32 to index
    %c0_56 = arith.constant 0 : index
    %156 = vector.load %arg8[%155, %c0_56] : memref<8x128xf32, #tpu.memory_space<vmem>>, vector<1x128xf32>
    tpu.vector_store %arg8[%155, %c0_56], %154 {strides = array<i32>} : memref<8x128xf32, #tpu.memory_space<vmem>>, vector<1x128xf32>,
    %c4_i32 = arith.constant 4 : i32
    %157 = arith.index_cast %c4_i32 : i32 to index
    %c0_57 = arith.constant 0 : index
    %158 = vector.load %arg7[%157, %c0_57] : memref<8x512xf32, #tpu.memory_space<vmem>>, vector<1x512xf32>
    %c0_58 = arith.constant 0 : index
    %c0_59 = arith.constant 0 : index
    %159 = vector.load %arg2[%c0_58, %c0_59] : memref<128x512xf32, #tpu.memory_space<vmem>>, vector<128x512xf32>
    %cst_60 = arith.constant dense<0.000000e+00> : vector<8x512xf32>
    %160 = tpu.matmul %153, %159, %cst_60 {dimension_numbers = #tpu.dot_dimension_numbers<[1], [0], [0], [1], [0, 0, 1, 1], [], []>} : vector<8x128xf32>, vector<128x512xf32>, vector<8x512xf32> -> vector<8x512xf32>
    %161 = vector.broadcast %158 : vector<1x512xf32> to vector<8x512xf32>
    %162 = arith.addf %161, %160 : vector<8x512xf32>
    %163 = arith.negf %162 : vector<8x512xf32>
    %164 = math.exp %163 : vector<8x512xf32>
    %cst_61 = arith.constant 1.000000e+00 : f32
    %165 = vector.broadcast %cst_61 : f32 to vector<8x512xf32>
    %166 = arith.addf %165, %164 : vector<8x512xf32>
    %167 = arith.divf %165, %166 : vector<8x512xf32>
    %168 = vector.extract_strided_slice %167 {offsets = [0, 0], sizes = [8, 128], strides = [1, 1]} : vector<8x512xf32> to vector<8x128xf32>
    %169 = vector.extract_strided_slice %167 {offsets = [0, 128], sizes = [8, 128], strides = [1, 1]} : vector<8x512xf32> to vector<8x128xf32>
    %170 = vector.extract_strided_slice %167 {offsets = [0, 256], sizes = [8, 128], strides = [1, 1]} : vector<8x512xf32> to vector<8x128xf32>
    %cst_62 = arith.constant 2.000000e+00 : f32
    %171 = vector.broadcast %cst_62 : f32 to vector<8x128xf32>
    %172 = arith.mulf %171, %170 : vector<8x128xf32>
    %cst_63 = arith.constant 1.000000e+00 : f32
    %173 = vector.broadcast %cst_63 : f32 to vector<8x128xf32>
    %174 = arith.subf %172, %173 : vector<8x128xf32>
    %175 = vector.extract_strided_slice %167 {offsets = [0, 384], sizes = [8, 128], strides = [1, 1]} : vector<8x512xf32> to vector<8x128xf32>
    %176 = arith.mulf %169, %141 : vector<8x128xf32>
    %177 = arith.mulf %168, %174 : vector<8x128xf32>
    %178 = arith.addf %176, %177 : vector<8x128xf32>
    %cst_64 = arith.constant 2.000000e+00 : f32
    %179 = vector.broadcast %cst_64 : f32 to vector<8x128xf32>
    %180 = arith.mulf %179, %178 : vector<8x128xf32>
    %181 = arith.negf %180 : vector<8x128xf32>
    %182 = math.exp %181 : vector<8x128xf32>
    %cst_65 = arith.constant 1.000000e+00 : f32
    %183 = vector.broadcast %cst_65 : f32 to vector<8x128xf32>
    %184 = arith.addf %183, %182 : vector<8x128xf32>
    %185 = arith.divf %183, %184 : vector<8x128xf32>
    %cst_66 = arith.constant 2.000000e+00 : f32
    %186 = vector.broadcast %cst_66 : f32 to vector<8x128xf32>
    %187 = arith.mulf %186, %185 : vector<8x128xf32>
    %cst_67 = arith.constant 1.000000e+00 : f32
    %188 = vector.broadcast %cst_67 : f32 to vector<8x128xf32>
    %189 = arith.subf %187, %188 : vector<8x128xf32>
    %190 = arith.mulf %175, %189 : vector<8x128xf32>
    %191 = vector.extract_strided_slice %190 {offsets = [0, 0], sizes = [1, 128], strides = [1, 1]} : vector<8x128xf32> to vector<1x128xf32>
    %192 = arith.index_cast %c4_i32 : i32 to index
    %c0_68 = arith.constant 0 : index
    %193 = vector.load %arg8[%192, %c0_68] : memref<8x128xf32, #tpu.memory_space<vmem>>, vector<1x128xf32>
    tpu.vector_store %arg8[%192, %c0_68], %191 {strides = array<i32>} : memref<8x128xf32, #tpu.memory_space<vmem>>, vector<1x128xf32>,
    %c5_i32 = arith.constant 5 : i32
    %194 = arith.index_cast %c5_i32 : i32 to index
    %c0_69 = arith.constant 0 : index
    %195 = vector.load %arg7[%194, %c0_69] : memref<8x512xf32, #tpu.memory_space<vmem>>, vector<1x512xf32>
    %c0_70 = arith.constant 0 : index
    %c0_71 = arith.constant 0 : index
    %196 = vector.load %arg2[%c0_70, %c0_71] : memref<128x512xf32, #tpu.memory_space<vmem>>, vector<128x512xf32>
    %cst_72 = arith.constant dense<0.000000e+00> : vector<8x512xf32>
    %197 = tpu.matmul %190, %196, %cst_72 {dimension_numbers = #tpu.dot_dimension_numbers<[1], [0], [0], [1], [0, 0, 1, 1], [], []>} : vector<8x128xf32>, vector<128x512xf32>, vector<8x512xf32> -> vector<8x512xf32>
    %198 = vector.broadcast %195 : vector<1x512xf32> to vector<8x512xf32>
    %199 = arith.addf %198, %197 : vector<8x512xf32>
    %200 = arith.negf %199 : vector<8x512xf32>
    %201 = math.exp %200 : vector<8x512xf32>
    %cst_73 = arith.constant 1.000000e+00 : f32
    %202 = vector.broadcast %cst_73 : f32 to vector<8x512xf32>
    %203 = arith.addf %202, %201 : vector<8x512xf32>
    %204 = arith.divf %202, %203 : vector<8x512xf32>
    %205 = vector.extract_strided_slice %204 {offsets = [0, 0], sizes = [8, 128], strides = [1, 1]} : vector<8x512xf32> to vector<8x128xf32>
    %206 = vector.extract_strided_slice %204 {offsets = [0, 128], sizes = [8, 128], strides = [1, 1]} : vector<8x512xf32> to vector<8x128xf32>
    %207 = vector.extract_strided_slice %204 {offsets = [0, 256], sizes = [8, 128], strides = [1, 1]} : vector<8x512xf32> to vector<8x128xf32>
    %cst_74 = arith.constant 2.000000e+00 : f32
    %208 = vector.broadcast %cst_74 : f32 to vector<8x128xf32>
    %209 = arith.mulf %208, %207 : vector<8x128xf32>
    %cst_75 = arith.constant 1.000000e+00 : f32
    %210 = vector.broadcast %cst_75 : f32 to vector<8x128xf32>
    %211 = arith.subf %209, %210 : vector<8x128xf32>
    %212 = vector.extract_strided_slice %204 {offsets = [0, 384], sizes = [8, 128], strides = [1, 1]} : vector<8x512xf32> to vector<8x128xf32>
    %213 = arith.mulf %206, %178 : vector<8x128xf32>
    %214 = arith.mulf %205, %211 : vector<8x128xf32>
    %215 = arith.addf %213, %214 : vector<8x128xf32>
    %cst_76 = arith.constant 2.000000e+00 : f32
    %216 = vector.broadcast %cst_76 : f32 to vector<8x128xf32>
    %217 = arith.mulf %216, %215 : vector<8x128xf32>
    %218 = arith.negf %217 : vector<8x128xf32>
    %219 = math.exp %218 : vector<8x128xf32>
    %cst_77 = arith.constant 1.000000e+00 : f32
    %220 = vector.broadcast %cst_77 : f32 to vector<8x128xf32>
    %221 = arith.addf %220, %219 : vector<8x128xf32>
    %222 = arith.divf %220, %221 : vector<8x128xf32>
    %cst_78 = arith.constant 2.000000e+00 : f32
    %223 = vector.broadcast %cst_78 : f32 to vector<8x128xf32>
    %224 = arith.mulf %223, %222 : vector<8x128xf32>
    %cst_79 = arith.constant 1.000000e+00 : f32
    %225 = vector.broadcast %cst_79 : f32 to vector<8x128xf32>
    %226 = arith.subf %224, %225 : vector<8x128xf32>
    %227 = arith.mulf %212, %226 : vector<8x128xf32>
    %228 = vector.extract_strided_slice %227 {offsets = [0, 0], sizes = [1, 128], strides = [1, 1]} : vector<8x128xf32> to vector<1x128xf32>
    %229 = arith.index_cast %c5_i32 : i32 to index
    %c0_80 = arith.constant 0 : index
    %230 = vector.load %arg8[%229, %c0_80] : memref<8x128xf32, #tpu.memory_space<vmem>>, vector<1x128xf32>
    tpu.vector_store %arg8[%229, %c0_80], %228 {strides = array<i32>} : memref<8x128xf32, #tpu.memory_space<vmem>>, vector<1x128xf32>,
    %c6_i32 = arith.constant 6 : i32
    %231 = arith.index_cast %c6_i32 : i32 to index
    %c0_81 = arith.constant 0 : index
    %232 = vector.load %arg7[%231, %c0_81] : memref<8x512xf32, #tpu.memory_space<vmem>>, vector<1x512xf32>
    %c0_82 = arith.constant 0 : index
    %c0_83 = arith.constant 0 : index
    %233 = vector.load %arg2[%c0_82, %c0_83] : memref<128x512xf32, #tpu.memory_space<vmem>>, vector<128x512xf32>
    %cst_84 = arith.constant dense<0.000000e+00> : vector<8x512xf32>
    %234 = tpu.matmul %227, %233, %cst_84 {dimension_numbers = #tpu.dot_dimension_numbers<[1], [0], [0], [1], [0, 0, 1, 1], [], []>} : vector<8x128xf32>, vector<128x512xf32>, vector<8x512xf32> -> vector<8x512xf32>
    %235 = vector.broadcast %232 : vector<1x512xf32> to vector<8x512xf32>
    %236 = arith.addf %235, %234 : vector<8x512xf32>
    %237 = arith.negf %236 : vector<8x512xf32>
    %238 = math.exp %237 : vector<8x512xf32>
    %cst_85 = arith.constant 1.000000e+00 : f32
    %239 = vector.broadcast %cst_85 : f32 to vector<8x512xf32>
    %240 = arith.addf %239, %238 : vector<8x512xf32>
    %241 = arith.divf %239, %240 : vector<8x512xf32>
    %242 = vector.extract_strided_slice %241 {offsets = [0, 0], sizes = [8, 128], strides = [1, 1]} : vector<8x512xf32> to vector<8x128xf32>
    %243 = vector.extract_strided_slice %241 {offsets = [0, 128], sizes = [8, 128], strides = [1, 1]} : vector<8x512xf32> to vector<8x128xf32>
    %244 = vector.extract_strided_slice %241 {offsets = [0, 256], sizes = [8, 128], strides = [1, 1]} : vector<8x512xf32> to vector<8x128xf32>
    %cst_86 = arith.constant 2.000000e+00 : f32
    %245 = vector.broadcast %cst_86 : f32 to vector<8x128xf32>
    %246 = arith.mulf %245, %244 : vector<8x128xf32>
    %cst_87 = arith.constant 1.000000e+00 : f32
    %247 = vector.broadcast %cst_87 : f32 to vector<8x128xf32>
    %248 = arith.subf %246, %247 : vector<8x128xf32>
    %249 = vector.extract_strided_slice %241 {offsets = [0, 384], sizes = [8, 128], strides = [1, 1]} : vector<8x512xf32> to vector<8x128xf32>
    %250 = arith.mulf %243, %215 : vector<8x128xf32>
    %251 = arith.mulf %242, %248 : vector<8x128xf32>
    %252 = arith.addf %250, %251 : vector<8x128xf32>
    %cst_88 = arith.constant 2.000000e+00 : f32
    %253 = vector.broadcast %cst_88 : f32 to vector<8x128xf32>
    %254 = arith.mulf %253, %252 : vector<8x128xf32>
    %255 = arith.negf %254 : vector<8x128xf32>
    %256 = math.exp %255 : vector<8x128xf32>
    %cst_89 = arith.constant 1.000000e+00 : f32
    %257 = vector.broadcast %cst_89 : f32 to vector<8x128xf32>
    %258 = arith.addf %257, %256 : vector<8x128xf32>
    %259 = arith.divf %257, %258 : vector<8x128xf32>
    %cst_90 = arith.constant 2.000000e+00 : f32
    %260 = vector.broadcast %cst_90 : f32 to vector<8x128xf32>
    %261 = arith.mulf %260, %259 : vector<8x128xf32>
    %cst_91 = arith.constant 1.000000e+00 : f32
    %262 = vector.broadcast %cst_91 : f32 to vector<8x128xf32>
    %263 = arith.subf %261, %262 : vector<8x128xf32>
    %264 = arith.mulf %249, %263 : vector<8x128xf32>
    %265 = vector.extract_strided_slice %264 {offsets = [0, 0], sizes = [1, 128], strides = [1, 1]} : vector<8x128xf32> to vector<1x128xf32>
    %266 = arith.index_cast %c6_i32 : i32 to index
    %c0_92 = arith.constant 0 : index
    %267 = vector.load %arg8[%266, %c0_92] : memref<8x128xf32, #tpu.memory_space<vmem>>, vector<1x128xf32>
    tpu.vector_store %arg8[%266, %c0_92], %265 {strides = array<i32>} : memref<8x128xf32, #tpu.memory_space<vmem>>, vector<1x128xf32>,
    %c7_i32 = arith.constant 7 : i32
    %268 = arith.index_cast %c7_i32 : i32 to index
    %c0_93 = arith.constant 0 : index
    %269 = vector.load %arg7[%268, %c0_93] : memref<8x512xf32, #tpu.memory_space<vmem>>, vector<1x512xf32>
    %c0_94 = arith.constant 0 : index
    %c0_95 = arith.constant 0 : index
    %270 = vector.load %arg2[%c0_94, %c0_95] : memref<128x512xf32, #tpu.memory_space<vmem>>, vector<128x512xf32>
    %cst_96 = arith.constant dense<0.000000e+00> : vector<8x512xf32>
    %271 = tpu.matmul %264, %270, %cst_96 {dimension_numbers = #tpu.dot_dimension_numbers<[1], [0], [0], [1], [0, 0, 1, 1], [], []>} : vector<8x128xf32>, vector<128x512xf32>, vector<8x512xf32> -> vector<8x512xf32>
    %272 = vector.broadcast %269 : vector<1x512xf32> to vector<8x512xf32>
    %273 = arith.addf %272, %271 : vector<8x512xf32>
    %274 = arith.negf %273 : vector<8x512xf32>
    %275 = math.exp %274 : vector<8x512xf32>
    %cst_97 = arith.constant 1.000000e+00 : f32
    %276 = vector.broadcast %cst_97 : f32 to vector<8x512xf32>
    %277 = arith.addf %276, %275 : vector<8x512xf32>
    %278 = arith.divf %276, %277 : vector<8x512xf32>
    %279 = vector.extract_strided_slice %278 {offsets = [0, 0], sizes = [8, 128], strides = [1, 1]} : vector<8x512xf32> to vector<8x128xf32>
    %280 = vector.extract_strided_slice %278 {offsets = [0, 128], sizes = [8, 128], strides = [1, 1]} : vector<8x512xf32> to vector<8x128xf32>
    %281 = vector.extract_strided_slice %278 {offsets = [0, 256], sizes = [8, 128], strides = [1, 1]} : vector<8x512xf32> to vector<8x128xf32>
    %cst_98 = arith.constant 2.000000e+00 : f32
    %282 = vector.broadcast %cst_98 : f32 to vector<8x128xf32>
    %283 = arith.mulf %282, %281 : vector<8x128xf32>
    %cst_99 = arith.constant 1.000000e+00 : f32
    %284 = vector.broadcast %cst_99 : f32 to vector<8x128xf32>
    %285 = arith.subf %283, %284 : vector<8x128xf32>
    %286 = vector.extract_strided_slice %278 {offsets = [0, 384], sizes = [8, 128], strides = [1, 1]} : vector<8x512xf32> to vector<8x128xf32>
    %287 = arith.mulf %280, %252 : vector<8x128xf32>
    %288 = arith.mulf %279, %285 : vector<8x128xf32>
    %289 = arith.addf %287, %288 : vector<8x128xf32>
    %cst_100 = arith.constant 2.000000e+00 : f32
    %290 = vector.broadcast %cst_100 : f32 to vector<8x128xf32>
    %291 = arith.mulf %290, %289 : vector<8x128xf32>
    %292 = arith.negf %291 : vector<8x128xf32>
    %293 = math.exp %292 : vector<8x128xf32>
    %cst_101 = arith.constant 1.000000e+00 : f32
    %294 = vector.broadcast %cst_101 : f32 to vector<8x128xf32>
    %295 = arith.addf %294, %293 : vector<8x128xf32>
    %296 = arith.divf %294, %295 : vector<8x128xf32>
    %cst_102 = arith.constant 2.000000e+00 : f32
    %297 = vector.broadcast %cst_102 : f32 to vector<8x128xf32>
    %298 = arith.mulf %297, %296 : vector<8x128xf32>
    %cst_103 = arith.constant 1.000000e+00 : f32
    %299 = vector.broadcast %cst_103 : f32 to vector<8x128xf32>
    %300 = arith.subf %298, %299 : vector<8x128xf32>
    %301 = arith.mulf %286, %300 : vector<8x128xf32>
    %302 = vector.extract_strided_slice %301 {offsets = [0, 0], sizes = [1, 128], strides = [1, 1]} : vector<8x128xf32> to vector<1x128xf32>
    %303 = arith.index_cast %c7_i32 : i32 to index
    %c0_104 = arith.constant 0 : index
    %304 = vector.load %arg8[%303, %c0_104] : memref<8x128xf32, #tpu.memory_space<vmem>>, vector<1x128xf32>
    tpu.vector_store %arg8[%303, %c0_104], %302 {strides = array<i32>} : memref<8x128xf32, #tpu.memory_space<vmem>>, vector<1x128xf32>,
    %c8_i32 = arith.constant 8 : i32
    %c0_105 = arith.constant 0 : index
    %c0_106 = arith.constant 0 : index
    %305 = vector.load %arg8[%c0_105, %c0_106] : memref<8x128xf32, #tpu.memory_space<vmem>>, vector<8x128xf32>
    %c0_107 = arith.constant 0 : index
    %c0_108 = arith.constant 0 : index
    %306 = vector.load %arg4[%c0_107, %c0_108] : memref<1x128xf32, #tpu.memory_space<vmem>>, vector<1x128xf32>
    %307 = vector.broadcast %306 : vector<1x128xf32> to vector<8x128xf32>
    %308 = arith.mulf %305, %307 : vector<8x128xf32>
    %cst_109 = arith.constant dense<0.000000e+00> : vector<8xf32>
    %309 = vector.multi_reduction <add>, %308, %cst_109 [1] : vector<8x128xf32> to vector<8xf32>
    %310 = vector.shape_cast %309 : vector<8xf32> to vector<8x1xf32>
    %c0_110 = arith.constant 0 : index
    %c0_111 = arith.constant 0 : index
    %311 = vector.load %arg5[%c0_110, %c0_111] : memref<1x1xf32, #tpu.memory_space<vmem>>, vector<1x1xf32>
    %312 = vector.broadcast %311 : vector<1x1xf32> to vector<8x1xf32>
    %313 = arith.addf %310, %312 : vector<8x1xf32>
    %314 = arith.negf %313 : vector<8x1xf32>
    %315 = math.exp %314 : vector<8x1xf32>
    %cst_112 = arith.constant 1.000000e+00 : f32
    %316 = vector.broadcast %cst_112 : f32 to vector<8x1xf32>
    %317 = arith.addf %316, %315 : vector<8x1xf32>
    %318 = arith.divf %316, %317 : vector<8x1xf32>
    %c0_113 = arith.constant 0 : index
    %c0_114 = arith.constant 0 : index
    %319 = vector.load %arg6[%c0_113, %c0_114] : memref<8x1xf32, #tpu.memory_space<vmem>>, vector<8x1xf32>
    tpu.vector_store %arg6[%c0_113, %c0_114], %318 {strides = array<i32>} : memref<8x1xf32, #tpu.memory_space<vmem>>, vector<8x1xf32>,
    return
  }
}

</mosaic_0001>

<bundles_post_ra>
// kernel: jstocks_forward.1
= control target key start
LH: loop header
LB: loop body
LE: loop exit
PB: predicated region body
PF: predicated region fallthrough
CT: control target
= control target key end

     0   :  { %s3849_s0 = inlined_call_operand.vmem [shape: f32[8,128], index: 0, kind: input, shape index: {}]   ;;  %s3850_s1 = inlined_call_operand.hbm [shape: f32[128,512], index: 1, kind: input, shape index: {}]   ;;  %s3851_s2 = inlined_call_operand.hbm [shape: f32[128,512], index: 2, kind: input, shape index: {}]   ;;  %s3852_s3 = inlined_call_operand.vmem [shape: f32[1,512], index: 3, kind: input, shape index: {}]   ;;  %s3853_s4 = inlined_call_operand.vmem [shape: f32[1,128], index: 4, kind: input, shape index: {}]   ;;  %s3854_s5 = inlined_call_operand.<no memory space> [shape: f32[1,1], index: 5, kind: input, shape index: {}]   ;;  %s3855_s6 = inlined_call_operand.vmem [shape: f32[8,1], index: 6, kind: output, shape index: {}]  }
   0x1   :  { %v11_v0 = vstv %s3854_s5 }
   0x2   :  { %12 = vst [vmem:[#allocation4] sm:$0x1] %v11_v0 }
   0x3   :  { %13 = vsyncpa [#allocation6], 0  ;;  %s21_s25 = sshll.u32 %s3850_s1, 4  ;;  %s22_s25 = int_to_ptr.hbm [resolvable:$true] %s21_s25 }
   0x4   :  { %14 = vsyncpa [#allocation8], 0  ;;  %s2647_s26 = smov [#allocation5]   ;;  %s34_s30 = sshll.u32 %s3851_s2, 4  ;;  %s35_s30 = int_to_ptr.hbm [resolvable:$true] %s34_s30 }
   0x5   :  { %s23_s27 = sshll.u32 %s2647_s26, 4  ;;  %s2648_s7 = smov 512   ;;  %s24_s27 = int_to_ptr.vmem [resolvable:$true] %s23_s27 }
   0x6   :  { %s2649_s8 = smov 32   ;;  %s2650_s5 = smov [#allocation7]  }
   0x7   :  { %29 = dma.hbm_to_vmem [thread:$0]  %s22_s25, 8192, %s24_s27, [#allocation6], %s2648_s7, %s2648_s7, %s2649_s8  }
   0x8   :  { %s36_s9 = sshll.u32 %s2650_s5, 4  ;;  %s37_s9 = int_to_ptr.vmem [resolvable:$true] %s36_s9 }
   0x9   :  { %42 = dma.hbm_to_vmem [thread:$0]  %s35_s30, 8192, %s37_s9, [#allocation8], %s2648_s7, %s2648_s7, %s2649_s8  }
   0xa   :  { %2643 = dma.done.wait [#allocation6], 8192  }
   0xb   :  { %2644 = vsyncadd [#allocation6], 4294959104 }
   0xc   :  { %2645 = dma.done.wait [#allocation8], 8192  }
   0xd   :  { %2646 = vsyncadd [#allocation8], 4294959104  ;;  %v118_v1 = vld [vmem:[#allocation5 + $0x1e0] sm:$0xff]  ;;  %v119_v2 = vld [vmem:[#allocation5 + $0x1e8] sm:$0xff] }
   0xe   :  { %v120_v3 = vld [vmem:[#allocation5 + $0x1f0] sm:$0xff]  ;;  %132 = vmatpush.msra.mxu0 %v118_v1  ;;  %152 = vmatpush.msra.mxu1 %v119_v2  ;;  %v121_v4 = vld [vmem:[#allocation5 + $0x1f8] sm:$0xff]  ;;  %v114_v5 = vld [vmem:[#allocation5 + $0x1c0] sm:$0xff] }
   0xf   :  { %v115_v6 = vld [vmem:[#allocation5 + $0x1c8] sm:$0xff]  ;;  %172 = vmatpush.msra.mxu2 %v120_v3  ;;  %192 = vmatpush.msra.mxu3 %v121_v4  ;;  %v116_v7 = vld [vmem:[#allocation5 + $0x1d0] sm:$0xff]  ;;  %v117_v8 = vld [vmem:[#allocation5 + $0x1d8] sm:$0xff] }
  0x10   :  { %v110_v9 = vld [vmem:[#allocation5 + $0x1a0] sm:$0xff]  ;;  %133 = vmatpush.msra.mxu0 %v114_v5  ;;  %153 = vmatpush.msra.mxu1 %v115_v6  ;;  %v111_v10 = vld [vmem:[#allocation5 + $0x1a8] sm:$0xff]  ;;  %v112_v11 = vld [vmem:[#allocation5 + $0x1b0] sm:$0xff] }
  0x11   :  { %v113_v12 = vld [vmem:[#allocation5 + $0x1b8] sm:$0xff]  ;;  %173 = vmatpush.msra.mxu2 %v116_v7  ;;  %193 = vmatpush.msra.mxu3 %v117_v8  ;;  %v106_v13 = vld [vmem:[#allocation5 + $0x180] sm:$0xff]  ;;  %v107_v14 = vld [vmem:[#allocation5 + $0x188] sm:$0xff] }
  0x12   :  { %134 = vmatpush.msra.mxu0 %v110_v9  ;;  %154 = vmatpush.msra.mxu1 %v111_v10  ;;  %v108_v15 = vld [vmem:[#allocation5 + $0x190] sm:$0xff]  ;;  %v109_v16 = vld [vmem:[#allocation5 + $0x198] sm:$0xff]  ;;  %v102_v17 = vld [vmem:[#allocation5 + $0x160] sm:$0xff] }
  0x13   :  { %174 = vmatpush.msra.mxu2 %v112_v11  ;;  %194 = vmatpush.msra.mxu3 %v113_v12  ;;  %v103_v18 = vld [vmem:[#allocation5 + $0x168] sm:$0xff]  ;;  %v104_v19 = vld [vmem:[#allocation5 + $0x170] sm:$0xff]  ;;  %v105_v20 = vld [vmem:[#allocation5 + $0x178] sm:$0xff] }
  0x14   :  { %135 = vmatpush.msra.mxu0 %v106_v13  ;;  %155 = vmatpush.msra.mxu1 %v107_v14  ;;  %v98_v21 = vld [vmem:[#allocation5 + $0x140] sm:$0xff]  ;;  %v99_v22 = vld [vmem:[#allocation5 + $0x148] sm:$0xff]  ;;  %v100_v23 = vld [vmem:[#allocation5 + $0x150] sm:$0xff] }
  0x15   :  { %175 = vmatpush.msra.mxu2 %v108_v15  ;;  %195 = vmatpush.msra.mxu3 %v109_v16  ;;  %v101_v24 = vld [vmem:[#allocation5 + $0x158] sm:$0xff]  ;;  %v94_v25 = vld [vmem:[#allocation5 + $0x120] sm:$0xff]  ;;  %v95_v26 = vld [vmem:[#allocation5 + $0x128] sm:$0xff] }
  0x16   :  { %136 = vmatpush.msra.mxu0 %v102_v17  ;;  %156 = vmatpush.msra.mxu1 %v103_v18  ;;  %v96_v27 = vld [vmem:[#allocation5 + $0x130] sm:$0xff]  ;;  %v97_v28 = vld [vmem:[#allocation5 + $0x138] sm:$0xff]  ;;  %v90_v29 = vld [vmem:[#allocation5 + $0x100] sm:$0xff] }
  0x17   :  { %176 = vmatpush.msra.mxu2 %v104_v19  ;;  %196 = vmatpush.msra.mxu3 %v105_v20  ;;  %v91_v30 = vld [vmem:[#allocation5 + $0x108] sm:$0xff]  ;;  %v92_v31 = vld [vmem:[#allocation5 + $0x110] sm:$0xff]  ;;  %v93_v32 = vld [vmem:[#allocation5 + $0x118] sm:$0xff] }
  0x18   :  { %137 = vmatpush.msra.mxu0 %v98_v21  ;;  %157 = vmatpush.msra.mxu1 %v99_v22  ;;  %v86_v33 = vld [vmem:[#allocation5 + $0xe0] sm:$0xff]  ;;  %v87_v34 = vld [vmem:[#allocation5 + $0xe8] sm:$0xff]  ;;  %v88_v35 = vld [vmem:[#allocation5 + $0xf0] sm:$0xff] }
  0x19   :  { %177 = vmatpush.msra.mxu2 %v100_v23  ;;  %197 = vmatpush.msra.mxu3 %v101_v24  ;;  %v89_v36 = vld [vmem:[#allocation5 + $0xf8] sm:$0xff]  ;;  %v82_v37 = vld [vmem:[#allocation5 + $0xc0] sm:$0xff]  ;;  %v83_v38 = vld [vmem:[#allocation5 + $0xc8] sm:$0xff] }
  0x1a   :  { %138 = vmatpush.msra.mxu0 %v94_v25  ;;  %158 = vmatpush.msra.mxu1 %v95_v26  ;;  %v84_v39 = vld [vmem:[#allocation5 + $0xd0] sm:$0xff]  ;;  %v85_v40 = vld [vmem:[#allocation5 + $0xd8] sm:$0xff]  ;;  %v78_v41 = vld [vmem:[#allocation5 + $0xa0] sm:$0xff] }
  0x1b   :  { %178 = vmatpush.msra.mxu2 %v96_v27  ;;  %198 = vmatpush.msra.mxu3 %v97_v28  ;;  %v79_v42 = vld [vmem:[#allocation5 + $0xa8] sm:$0xff]  ;;  %v80_v43 = vld [vmem:[#allocation5 + $0xb0] sm:$0xff]  ;;  %v81_v44 = vld [vmem:[#allocation5 + $0xb8] sm:$0xff] }
  0x1c   :  { %139 = vmatpush.msra.mxu0 %v90_v29  ;;  %159 = vmatpush.msra.mxu1 %v91_v30  ;;  %v74_v45 = vld [vmem:[#allocation5 + $0x80] sm:$0xff]  ;;  %v75_v46 = vld [vmem:[#allocation5 + $0x88] sm:$0xff]  ;;  %v76_v47 = vld [vmem:[#allocation5 + $0x90] sm:$0xff] }
  0x1d   :  { %179 = vmatpush.msra.mxu2 %v92_v31  ;;  %199 = vmatpush.msra.mxu3 %v93_v32  ;;  %v77_v48 = vld [vmem:[#allocation5 + $0x98] sm:$0xff]  ;;  %v70_v49 = vld [vmem:[#allocation5 + $0x60] sm:$0xff]  ;;  %v71_v50 = vld [vmem:[#allocation5 + $0x68] sm:$0xff] }
  0x1e   :  { %140 = vmatpush.msra.mxu0 %v86_v33  ;;  %160 = vmatpush.msra.mxu1 %v87_v34  ;;  %v72_v51 = vld [vmem:[#allocation5 + $0x70] sm:$0xff]  ;;  %v73_v52 = vld [vmem:[#allocation5 + $0x78] sm:$0xff]  ;;  %v66_v53 = vld [vmem:[#allocation5 + $0x40] sm:$0xff] }
  0x1f   :  { %180 = vmatpush.msra.mxu2 %v88_v35  ;;  %200 = vmatpush.msra.mxu3 %v89_v36  ;;  %v67_v54 = vld [vmem:[#allocation5 + $0x48] sm:$0xff]  ;;  %v68_v55 = vld [vmem:[#allocation5 + $0x50] sm:$0xff]  ;;  %v69_v56 = vld [vmem:[#allocation5 + $0x58] sm:$0xff] }
  0x20   :  { %141 = vmatpush.msra.mxu0 %v82_v37  ;;  %161 = vmatpush.msra.mxu1 %v83_v38  ;;  %v62_v57 = vld [vmem:[#allocation5 + $0x20] sm:$0xff]  ;;  %v63_v58 = vld [vmem:[#allocation5 + $0x28] sm:$0xff]  ;;  %v64_v59 = vld [vmem:[#allocation5 + $0x30] sm:$0xff] }
  0x21   :  { %181 = vmatpush.msra.mxu2 %v84_v39  ;;  %201 = vmatpush.msra.mxu3 %v85_v40  ;;  %v65_v60 = vld [vmem:[#allocation5 + $0x38] sm:$0xff]  ;;  %v58_v61 = vld [vmem:[#allocation5] sm:$0xff]  ;;  %v59_v62 = vld [vmem:[#allocation5 + $0x8] sm:$0xff] }
  0x22   :  { %142 = vmatpush.msra.mxu0 %v78_v41  ;;  %162 = vmatpush.msra.mxu1 %v79_v42  ;;  %v60_v63 = vld [vmem:[#allocation5 + $0x10] sm:$0xff]  ;;  %v61_v0 = vld [vmem:[#allocation5 + $0x18] sm:$0xff]  ;;  %v2696_v1 = vld [vmem:[#allocation7 + $0x1e0] sm:$0xff] }
  0x23   :  { %182 = vmatpush.msra.mxu2 %v80_v43  ;;  %202 = vmatpush.msra.mxu3 %v81_v44  ;;  %v2698_v2 = vld [vmem:[#allocation7 + $0x1e8] sm:$0xff]  ;;  %v2700_v3 = vld [vmem:[#allocation7 + $0x1f0] sm:$0xff]  ;;  %v2702_v4 = vld [vmem:[#allocation7 + $0x1f8] sm:$0xff] }
  0x24   :  { %143 = vmatpush.msra.mxu0 %v74_v45  ;;  %163 = vmatpush.msra.mxu1 %v75_v46  ;;  %v2704_v5 = vld [vmem:[#allocation7 + $0x1c0] sm:$0xff]  ;;  %v2706_v6 = vld [vmem:[#allocation7 + $0x1c8] sm:$0xff]  ;;  %v2710_v7 = vld [vmem:[#allocation7 + $0x1d0] sm:$0xff] }
  0x25   :  { %183 = vmatpush.msra.mxu2 %v76_v47  ;;  %203 = vmatpush.msra.mxu3 %v77_v48  ;;  %v2712_v8 = vld [vmem:[#allocation7 + $0x1d8] sm:$0xff]  ;;  %v2716_v9 = vld [vmem:[#allocation7 + $0x1a0] sm:$0xff]  ;;  %v2718_v10 = vld [vmem:[#allocation7 + $0x1a8] sm:$0xff] }
  0x26   :  { %144 = vmatpush.msra.mxu0 %v70_v49  ;;  %164 = vmatpush.msra.mxu1 %v71_v50  ;;  %v2722_v11 = vld [vmem:[#allocation7 + $0x1b0] sm:$0xff]  ;;  %v2724_v12 = vld [vmem:[#allocation7 + $0x1b8] sm:$0xff]  ;;  %v2728_v13 = vld [vmem:[#allocation7 + $0x180] sm:$0xff] }
  0x27   :  { %184 = vmatpush.msra.mxu2 %v72_v51  ;;  %204 = vmatpush.msra.mxu3 %v73_v52  ;;  %v2730_v14 = vld [vmem:[#allocation7 + $0x188] sm:$0xff]  ;;  %v2734_v15 = vld [vmem:[#allocation7 + $0x190] sm:$0xff]  ;;  %v2736_v16 = vld [vmem:[#allocation7 + $0x198] sm:$0xff] }
  0x28   :  { %145 = vmatpush.msra.mxu0 %v66_v53  ;;  %165 = vmatpush.msra.mxu1 %v67_v54  ;;  %v2740_v17 = vld [vmem:[#allocation7 + $0x160] sm:$0xff]  ;;  %v2742_v18 = vld [vmem:[#allocation7 + $0x168] sm:$0xff]  ;;  %v2746_v19 = vld [vmem:[#allocation7 + $0x170] sm:$0xff] }
  0x29   :  { %185 = vmatpush.msra.mxu2 %v68_v55  ;;  %205 = vmatpush.msra.mxu3 %v69_v56  ;;  %v2748_v20 = vld [vmem:[#allocation7 + $0x178] sm:$0xff]  ;;  %v2752_v21 = vld [vmem:[#allocation7 + $0x140] sm:$0xff]  ;;  %v2754_v22 = vld [vmem:[#allocation7 + $0x148] sm:$0xff] }
  0x2a   :  { %146 = vmatpush.msra.mxu0 %v62_v57  ;;  %166 = vmatpush.msra.mxu1 %v63_v58  ;;  %v2758_v23 = vld [vmem:[#allocation7 + $0x150] sm:$0xff]  ;;  %v2760_v24 = vld [vmem:[#allocation7 + $0x158] sm:$0xff]  ;;  %v2764_v25 = vld [vmem:[#allocation7 + $0x120] sm:$0xff] }
  0x2b   :  { %186 = vmatpush.msra.mxu2 %v64_v59  ;;  %206 = vmatpush.msra.mxu3 %v65_v60  ;;  %v2766_v26 = vld [vmem:[#allocation7 + $0x128] sm:$0xff]  ;;  %v2768_v27 = vld [vmem:[#allocation7 + $0x130] sm:$0xff]  ;;  %v2772_v28 = vld [vmem:[#allocation7 + $0x138] sm:$0xff] }
  0x2c   :  { %147 = vmatpush.msra.mxu0 %v58_v61  ;;  %167 = vmatpush.msra.mxu1 %v59_v62  ;;  %v57_v29 = vld [vmem:[%s3849_s0] sm:$0xff]  ;;  %v2781_v30 = vld [vmem:[#allocation7 + $0x100] sm:$0xff]  ;;  %v2783_v31 = vld [vmem:[#allocation7 + $0x108] sm:$0xff] }
  0x2d   :  { %187 = vmatpush.msra.mxu2 %v60_v63  ;;  %207 = vmatpush.msra.mxu3 %v61_v0  ;;  %v2787_v32 = vld [vmem:[#allocation7 + $0x110] sm:$0xff]  ;;  %v2789_v33 = vld [vmem:[#allocation7 + $0x118] sm:$0xff]  ;;  %v2791_v34 = vld [vmem:[#allocation7 + $0xe0] sm:$0xff] }
  0x2e   :  { %281 = vmatpush.msrb.mxu0 %v2696_v1  ;;  %301 = vmatpush.msrb.mxu1 %v2698_v2  ;;  %v2793_v35 = vld [vmem:[#allocation7 + $0xe8] sm:$0xff]  ;;  %v2797_v36 = vld [vmem:[#allocation7 + $0xf0] sm:$0xff]  ;;  %v2799_v37 = vld [vmem:[#allocation7 + $0xf8] sm:$0xff] }
  0x2f   :  { %321 = vmatpush.msrb.mxu2 %v2700_v3  ;;  %341 = vmatpush.msrb.mxu3 %v2702_v4  ;;  %v2803_v38 = vld [vmem:[#allocation7 + $0xc0] sm:$0xff]  ;;  %v2805_v39 = vld [vmem:[#allocation7 + $0xc8] sm:$0xff]  ;;  %v2809_v40 = vld [vmem:[#allocation7 + $0xd0] sm:$0xff] }
  0x30   :  { %282 = vmatpush.msrb.mxu0 %v2704_v5  ;;  %302 = vmatpush.msrb.mxu1 %v2706_v6  ;;  %v2811_v41 = vld [vmem:[#allocation7 + $0xd8] sm:$0xff]  ;;  %v2817_v42 = vld [vmem:[#allocation7 + $0xa0] sm:$0xff]  ;;  %v2819_v43 = vld [vmem:[#allocation7 + $0xa8] sm:$0xff] }
  0x31   :  { %322 = vmatpush.msrb.mxu2 %v2710_v7  ;;  %342 = vmatpush.msrb.mxu3 %v2712_v8  ;;  %v2823_v44 = vld [vmem:[#allocation7 + $0xb0] sm:$0xff]  ;;  %v2825_v45 = vld [vmem:[#allocation7 + $0xb8] sm:$0xff]  ;;  %v2827_v46 = vld [vmem:[#allocation7 + $0x80] sm:$0xff] }
  0x32   :  { %283 = vmatpush.msrb.mxu0 %v2716_v9  ;;  %303 = vmatpush.msrb.mxu1 %v2718_v10  ;;  %v2829_v47 = vld [vmem:[#allocation7 + $0x88] sm:$0xff]  ;;  %v2833_v48 = vld [vmem:[#allocation7 + $0x90] sm:$0xff]  ;;  %v2835_v49 = vld [vmem:[#allocation7 + $0x98] sm:$0xff] }
  0x33   :  { %323 = vmatpush.msrb.mxu2 %v2722_v11  ;;  %343 = vmatpush.msrb.mxu3 %v2724_v12  ;;  %v2839_v50 = vld [vmem:[#allocation7 + $0x60] sm:$0xff]  ;;  %v2841_v51 = vld [vmem:[#allocation7 + $0x68] sm:$0xff]  ;;  %v2845_v52 = vld [vmem:[#allocation7 + $0x70] sm:$0xff] }
  0x34   :  { %284 = vmatpush.msrb.mxu0 %v2728_v13  ;;  %304 = vmatpush.msrb.mxu1 %v2730_v14  ;;  %v2847_v53 = vld [vmem:[#allocation7 + $0x78] sm:$0xff]  ;;  %v2851_v54 = vld [vmem:[#allocation7 + $0x40] sm:$0xff]  ;;  %v2853_v55 = vld [vmem:[#allocation7 + $0x48] sm:$0xff] }
  0x35   :  { %324 = vmatpush.msrb.mxu2 %v2734_v15  ;;  %344 = vmatpush.msrb.mxu3 %v2736_v16  ;;  %v2857_v56 = vld [vmem:[#allocation7 + $0x50] sm:$0xff]  ;;  %v2859_v57 = vld [vmem:[#allocation7 + $0x58] sm:$0xff]  ;;  %v2863_v58 = vld [vmem:[#allocation7 + $0x20] sm:$0xff] }
  0x36   :  { %285 = vmatpush.msrb.mxu0 %v2740_v17  ;;  %305 = vmatpush.msrb.mxu1 %v2742_v18  ;;  %3882 = vst [vmem:[#allocation11_spill] sm:$0xff] %v2859_v57  ;;  %v2865_v59 = vld [vmem:[#allocation7 + $0x28] sm:$0xff]  ;;  %v2869_v60 = vld [vmem:[#allocation7 + $0x30] sm:$0xff]  ;;  %v2871_v61 = vld [vmem:[#allocation7 + $0x38] sm:$0xff] }
  0x37   :  { %325 = vmatpush.msrb.mxu2 %v2746_v19  ;;  %345 = vmatpush.msrb.mxu3 %v2748_v20  ;;  %v2875_v62 = vld [vmem:[#allocation7] sm:$0xff]  ;;  %v2877_v63 = vld [vmem:[#allocation7 + $0x8] sm:$0xff]  ;;  %v2881_v0 = vld [vmem:[#allocation7 + $0x10] sm:$0xff] }
  0x38   :  { %286 = vmatpush.msrb.mxu0 %v2752_v21  ;;  %306 = vmatpush.msrb.mxu1 %v2754_v22 }
  0x39   :  { %326 = vmatpush.msrb.mxu2 %v2758_v23  ;;  %346 = vmatpush.msrb.mxu3 %v2760_v24 }
  0x3a   :  { %287 = vmatpush.msrb.mxu0 %v2764_v25  ;;  %307 = vmatpush.msrb.mxu1 %v2766_v26 }
  0x3b   :  { %327 = vmatpush.msrb.mxu2 %v2768_v27  ;;  %347 = vmatpush.msrb.mxu3 %v2772_v28 }
  0x3c   :  { %188 = vmatmul.f32.vlgmr.msra.gmra.mxu2 %v57_v29  ;;  %208 = vmatmul.f32.vlgmr.msra.gmra.mxu3 %v57_v29 }
  0x3d   :  { %288 = vmatpush.msrb.mxu0 %v2781_v30  ;;  %308 = vmatpush.msrb.mxu1 %v2783_v31 }
  0x3e   :  { %328 = vmatpush.msrb.mxu2 %v2787_v32  ;;  %348 = vmatpush.msrb.mxu3 %v2789_v33 }
  0x3f   :  { %289 = vmatpush.msrb.mxu0 %v2791_v34  ;;  %309 = vmatpush.msrb.mxu1 %v2793_v35 }
  0x40   :  { %329 = vmatpush.msrb.mxu2 %v2797_v36  ;;  %349 = vmatpush.msrb.mxu3 %v2799_v37 }
  0x41   :  { %290 = vmatpush.msrb.mxu0 %v2803_v38  ;;  %310 = vmatpush.msrb.mxu1 %v2805_v39 }
  0x42   :  { %330 = vmatpush.msrb.mxu2 %v2809_v40  ;;  %350 = vmatpush.msrb.mxu3 %v2811_v41 }
  0x43   :  { %148 = vmatmul.f32.vlgmr.msra.gmra.mxu0 %v57_v29  ;;  %168 = vmatmul.f32.vlgmr.msra.gmra.mxu1 %v57_v29  ;;  %v2883_v29 = vld [vmem:[#allocation7 + $0x18] sm:$0xff] }
  0x44   :  { %291 = vmatpush.msrb.mxu0 %v2817_v42  ;;  %311 = vmatpush.msrb.mxu1 %v2819_v43 }
  0x45   :  { %331 = vmatpush.msrb.mxu2 %v2823_v44  ;;  %351 = vmatpush.msrb.mxu3 %v2825_v45 }
  0x46   :  { %292 = vmatpush.msrb.mxu0 %v2827_v46  ;;  %312 = vmatpush.msrb.mxu1 %v2829_v47 }
  0x47   :  { %332 = vmatpush.msrb.mxu2 %v2833_v48  ;;  %352 = vmatpush.msrb.mxu3 %v2835_v49 }
  0x48   :  { %293 = vmatpush.msrb.mxu0 %v2839_v50  ;;  %313 = vmatpush.msrb.mxu1 %v2841_v51 }
  0x49   :  { %333 = vmatpush.msrb.mxu2 %v2845_v52  ;;  %353 = vmatpush.msrb.mxu3 %v2847_v53 }
  0x4a   :  { %294 = vmatpush.msrb.mxu0 %v2851_v54  ;;  %314 = vmatpush.msrb.mxu1 %v2853_v55 }
  0x4b   :  { %334 = vmatpush.msrb.mxu2 %v2857_v56  ;;  %354 = vmatpush.msrb.mxu3 %v2859_v57  ;;  %v2651_v57 = vmov 0.0  }
  0x4c   :  { %295 = vmatpush.msrb.mxu0 %v2863_v58  ;;  %315 = vmatpush.msrb.mxu1 %v2865_v59 }
  0x4d   :  { %335 = vmatpush.msrb.mxu2 %v2869_v60  ;;  %355 = vmatpush.msrb.mxu3 %v2871_v61 }
  0x4e   :  { %296 = vmatpush.msrb.mxu0 %v2875_v62  ;;  %316 = vmatpush.msrb.mxu1 %v2877_v63 }
  0x4f   :  { %336 = vmatpush.msrb.mxu2 %v2881_v0  ;;  %356 = vmatpush.msrb.mxu3 %v2883_v29 }
  0x50   :  { %297 = vmatmul.f32.vlgmr.msrb.gmra.mxu0 %v2651_v57  ;;  %317 = vmatmul.f32.vlgmr.msrb.gmra.mxu1 %v2651_v57 }
  0x51   :  { %337 = vmatmul.f32.vlgmr.msrb.gmra.mxu2 %v2651_v57  ;;  %357 = vmatmul.f32.vlgmr.msrb.gmra.mxu3 %v2651_v57  ;;  %v3883_v57 = vld [vmem:[#allocation11_spill] sm:$0xff] }
  0x52   :  { %545 = vmatpush.msra.mxu0 %v2696_v1  ;;  %565 = vmatpush.msra.mxu1 %v2698_v2 }
  0x53   :  { %585 = vmatpush.msra.mxu2 %v2700_v3  ;;  %605 = vmatpush.msra.mxu3 %v2702_v4 }
  0x54   :  { %546 = vmatpush.msra.mxu0 %v2704_v5  ;;  %566 = vmatpush.msra.mxu1 %v2706_v6 }
  0x55   :  { %586 = vmatpush.msra.mxu2 %v2710_v7  ;;  %606 = vmatpush.msra.mxu3 %v2712_v8 }
  0x56   :  { %547 = vmatpush.msra.mxu0 %v2716_v9  ;;  %567 = vmatpush.msra.mxu1 %v2718_v10 }
  0x57   :  { %587 = vmatpush.msra.mxu2 %v2722_v11  ;;  %607 = vmatpush.msra.mxu3 %v2724_v12 }
  0x58   :  { %548 = vmatpush.msra.mxu0 %v2728_v13  ;;  %568 = vmatpush.msra.mxu1 %v2730_v14 }
  0x59   :  { %588 = vmatpush.msra.mxu2 %v2734_v15  ;;  %608 = vmatpush.msra.mxu3 %v2736_v16 }
  0x5a   :  { %549 = vmatpush.msra.mxu0 %v2740_v17  ;;  %569 = vmatpush.msra.mxu1 %v2742_v18 }
  0x5b   :  { %589 = vmatpush.msra.mxu2 %v2746_v19  ;;  %609 = vmatpush.msra.mxu3 %v2748_v20 }
  0x5c   :  { %550 = vmatpush.msra.mxu0 %v2752_v21  ;;  %570 = vmatpush.msra.mxu1 %v2754_v22 }
  0x5d   :  { %590 = vmatpush.msra.mxu2 %v2758_v23  ;;  %610 = vmatpush.msra.mxu3 %v2760_v24 }
  0x5e   :  { %551 = vmatpush.msra.mxu0 %v2764_v25  ;;  %571 = vmatpush.msra.mxu1 %v2766_v26 }
  0x5f   :  { %591 = vmatpush.msra.mxu2 %v2768_v27  ;;  %611 = vmatpush.msra.mxu3 %v2772_v28 }
  0x60   :  { %552 = vmatpush.msra.mxu0 %v2781_v30  ;;  %572 = vmatpush.msra.mxu1 %v2783_v31 }
  0x61   :  { %592 = vmatpush.msra.mxu2 %v2787_v32  ;;  %612 = vmatpush.msra.mxu3 %v2789_v33 }
  0x62   :  { %553 = vmatpush.msra.mxu0 %v2791_v34  ;;  %573 = vmatpush.msra.mxu1 %v2793_v35 }
  0x63   :  { %593 = vmatpush.msra.mxu2 %v2797_v36  ;;  %613 = vmatpush.msra.mxu3 %v2799_v37 }
  0x64   :  { %554 = vmatpush.msra.mxu0 %v2803_v38  ;;  %574 = vmatpush.msra.mxu1 %v2805_v39 }
  0x65   :  { %594 = vmatpush.msra.mxu2 %v2809_v40  ;;  %614 = vmatpush.msra.mxu3 %v2811_v41 }
  0x66   :  { %555 = vmatpush.msra.mxu0 %v2817_v42  ;;  %575 = vmatpush.msra.mxu1 %v2819_v43 }
  0x67   :  { %595 = vmatpush.msra.mxu2 %v2823_v44  ;;  %615 = vmatpush.msra.mxu3 %v2825_v45 }
  0x68   :  { %556 = vmatpush.msra.mxu0 %v2827_v46  ;;  %576 = vmatpush.msra.mxu1 %v2829_v47 }
  0x69   :  { %596 = vmatpush.msra.mxu2 %v2833_v48  ;;  %616 = vmatpush.msra.mxu3 %v2835_v49 }
  0x6a   :  { %557 = vmatpush.msra.mxu0 %v2839_v50  ;;  %577 = vmatpush.msra.mxu1 %v2841_v51 }
  0x6b   :  { %597 = vmatpush.msra.mxu2 %v2845_v52  ;;  %617 = vmatpush.msra.mxu3 %v2847_v53 }
  0x6c   :  { %558 = vmatpush.msra.mxu0 %v2851_v54  ;;  %578 = vmatpush.msra.mxu1 %v2853_v55 }
  0x6d   :  { %598 = vmatpush.msra.mxu2 %v2857_v56  ;;  %618 = vmatpush.msra.mxu3 %v3883_v57 }
  0x6e   :  { %559 = vmatpush.msra.mxu0 %v2863_v58  ;;  %579 = vmatpush.msra.mxu1 %v2865_v59 }
  0x6f   :  { %599 = vmatpush.msra.mxu2 %v2869_v60  ;;  %619 = vmatpush.msra.mxu3 %v2871_v61 }
  0x70   :  { %560 = vmatpush.msra.mxu0 %v2875_v62  ;;  %580 = vmatpush.msra.mxu1 %v2877_v63 }
  0x71   :  { %600 = vmatpush.msra.mxu2 %v2881_v0  ;;  %620 = vmatpush.msra.mxu3 %v2883_v29 }
  0x72   :  { %809 = vmatpush.msrb.mxu0 %v2696_v1  ;;  %829 = vmatpush.msrb.mxu1 %v2698_v2  ;;  %v122_v1 = vld [vmem:[%s3852_s3] sm:$0xf] }
  0x73   :  { %849 = vmatpush.msrb.mxu2 %v2700_v3  ;;  %869 = vmatpush.msrb.mxu3 %v2702_v4  ;;  %v126_v2 = vperm.slane %v122_v1, 2  ;;  %v124_v3 = vperm.slane %v122_v1, 0  ;;  %v125_v4 = vperm.slane %v122_v1, 1 }
  0x74   :  { %810 = vmatpush.msrb.mxu0 %v2704_v5  ;;  %830 = vmatpush.msrb.mxu1 %v2706_v6  ;;  %v127_v5 = vperm.slane %v122_v1, 3 }
  0x75   :  { %850 = vmatpush.msrb.mxu2 %v2710_v7  ;;  %870 = vmatpush.msrb.mxu3 %v2712_v8 }
  0x76   :  { %811 = vmatpush.msrb.mxu0 %v2716_v9  ;;  %831 = vmatpush.msrb.mxu1 %v2718_v10 }
  0x77   :  { %851 = vmatpush.msrb.mxu2 %v2722_v11  ;;  %871 = vmatpush.msrb.mxu3 %v2724_v12 }
  0x78   :  { %812 = vmatpush.msrb.mxu0 %v2728_v13  ;;  %832 = vmatpush.msrb.mxu1 %v2730_v14 }
  0x79   :  { %852 = vmatpush.msrb.mxu2 %v2734_v15  ;;  %872 = vmatpush.msrb.mxu3 %v2736_v16 }
  0x7a   :  { %813 = vmatpush.msrb.mxu0 %v2740_v17  ;;  %833 = vmatpush.msrb.mxu1 %v2742_v18 }
  0x7b   :  { %853 = vmatpush.msrb.mxu2 %v2746_v19  ;;  %873 = vmatpush.msrb.mxu3 %v2748_v20 }
  0x7c   :  { %814 = vmatpush.msrb.mxu0 %v2752_v21  ;;  %834 = vmatpush.msrb.mxu1 %v2754_v22 }
  0x7d   :  { %854 = vmatpush.msrb.mxu2 %v2758_v23  ;;  %874 = vmatpush.msrb.mxu3 %v2760_v24 }
  0x7e   :  { %815 = vmatpush.msrb.mxu0 %v2764_v25  ;;  %835 = vmatpush.msrb.mxu1 %v2766_v26 }
  0x7f   :  { %855 = vmatpush.msrb.mxu2 %v2768_v27  ;;  %875 = vmatpush.msrb.mxu3 %v2772_v28 }
  0x80   :  { %816 = vmatpush.msrb.mxu0 %v2781_v30  ;;  %836 = vmatpush.msrb.mxu1 %v2783_v31 }
  0x81   :  { %856 = vmatpush.msrb.mxu2 %v2787_v32  ;;  %876 = vmatpush.msrb.mxu3 %v2789_v33 }
  0x82   :  { %817 = vmatpush.msrb.mxu0 %v2791_v34  ;;  %837 = vmatpush.msrb.mxu1 %v2793_v35 }
  0x83   :  { %857 = vmatpush.msrb.mxu2 %v2797_v36  ;;  %877 = vmatpush.msrb.mxu3 %v2799_v37 }
  0x84   :  { %818 = vmatpush.msrb.mxu0 %v2803_v38  ;;  %838 = vmatpush.msrb.mxu1 %v2805_v39 }
  0x85   :  { %858 = vmatpush.msrb.mxu2 %v2809_v40  ;;  %878 = vmatpush.msrb.mxu3 %v2811_v41 }
  0x86   :  { %819 = vmatpush.msrb.mxu0 %v2817_v42  ;;  %839 = vmatpush.msrb.mxu1 %v2819_v43 }
  0x87   :  { %859 = vmatpush.msrb.mxu2 %v2823_v44  ;;  %879 = vmatpush.msrb.mxu3 %v2825_v45 }
  0x88   :  { %820 = vmatpush.msrb.mxu0 %v2827_v46  ;;  %840 = vmatpush.msrb.mxu1 %v2829_v47 }
  0x89   :  { %860 = vmatpush.msrb.mxu2 %v2833_v48  ;;  %880 = vmatpush.msrb.mxu3 %v2835_v49 }
  0x8a   :  { %821 = vmatpush.msrb.mxu0 %v2839_v50  ;;  %841 = vmatpush.msrb.mxu1 %v2841_v51 }
  0x8b   :  { %861 = vmatpush.msrb.mxu2 %v2845_v52  ;;  %881 = vmatpush.msrb.mxu3 %v2847_v53 }
  0x8c   :  { %822 = vmatpush.msrb.mxu0 %v2851_v54  ;;  %842 = vmatpush.msrb.mxu1 %v2853_v55 }
  0x8d   :  { %862 = vmatpush.msrb.mxu2 %v2857_v56  ;;  %882 = vmatpush.msrb.mxu3 %v3883_v57 }
  0x8e   :  { %823 = vmatpush.msrb.mxu0 %v2863_v58  ;;  %843 = vmatpush.msrb.mxu1 %v2865_v59 }
  0x8f   :  { %863 = vmatpush.msrb.mxu2 %v2869_v60  ;;  %883 = vmatpush.msrb.mxu3 %v2871_v61 }
  0x90   :  { %824 = vmatpush.msrb.mxu0 %v2875_v62  ;;  %844 = vmatpush.msrb.mxu1 %v2877_v63 }
  0x91   :  { %864 = vmatpush.msrb.mxu2 %v2881_v0  ;;  %884 = vmatpush.msrb.mxu3 %v2883_v29 }
  0xbf   :  { %v189_v6 = vpop.f32.mrf.mxu2  ;;  %v209_v7 = vpop.f32.mrf.mxu3 }
  0xc0   :  { %v149_v8 = vpop.f32.mrf.mxu0  ;;  %v169_v9 = vpop.f32.mrf.mxu1  ;;  %v190_v10 = vadd.f32 %v189_v6, %v126_v2  ;;  %v210_v13 = vadd.f32 %v209_v7, %v127_v5 }
  0xc1   :  { %v150_v11 = vadd.f32 %v149_v8, %v124_v3  ;;  %v170_v12 = vadd.f32 %v169_v9, %v125_v4 }
  0xc2   :  { %214 = vst [vmem:[#allocation2 + $0x10] sm:$0xff] %v190_v10 }
  0xc3   :  { %212 = vst [vmem:[#allocation2] sm:$0xff] %v150_v11 }
  0xc4   :  { %213 = vst [vmem:[#allocation2 + $0x8] sm:$0xff] %v170_v12 }
  0xc5   :  { %215 = vst [vmem:[#allocation2 + $0x18] sm:$0xff] %v210_v13 }
  0xcc   :  { %v216_v14 = vld [vmem:[#allocation2] ss:$8 sm:$0xf] }
  0xcd   :  { %v298_v15 = vpop.f32.mrf.mxu0  ;;  %v362_v16 = vperm.slane %v216_v14, 0  ;;  %v318_v17 = vpop.f32.mrf.mxu1  ;;  %v363_v18 = vperm.slane %v216_v14, 1  ;;  %v364_v23 = vperm.slane %v216_v14, 2  ;;  %v365_v39 = vperm.slane %v216_v14, 3 }
  0xcf   :  { %v370_v19 = vadd.f32 %v362_v16, %v298_v15  ;;  %v371_v20 = vadd.f32 %v363_v18, %v318_v17 }
  0xd1   :  { %v2367_v21 = vmul.f32 -1.442695, %v370_v19  ;;  %v2368_v22 = vmul.f32 -1.442695, %v371_v20 }
  0xd3   :  { %2431 = vpow2.f32 %v2367_v21 }
  0xd4   :  { %2433 = vpow2.f32 %v2368_v22  ;;  %v338_v24 = vpop.f32.mrf.mxu2  ;;  %v358_v41 = vpop.f32.mrf.mxu3 }
  0xd5   :  { %v372_v25 = vadd.f32 %v364_v23, %v338_v24  ;;  %v373_v45 = vadd.f32 %v365_v39, %v358_v41  ;;  %v480_v39 = vld [vmem:[#allocation2 + $0x1] ss:$8 sm:$0xf] }
  0xd6   :  { %v627_v41 = vperm.slane %v480_v39, 1 }
  0xd7   :  { %v2369_v26 = vmul.f32 -1.442695, %v372_v25  ;;  %v2370_v54 = vmul.f32 -1.442695, %v373_v45 }
  0xd9   :  { %v2432_v27 = vpop.eup %2431  ;;  %2435 = vpow2.f32 %v2369_v26 }
  0xda   :  { %v2434_v28 = vpop.eup %2433  ;;  %v386_v30 = vadd.f32 1.0, %v2432_v27 }
  0xdb   :  { %v387_v31 = vadd.f32 1.0, %v2434_v28 }
  0xdc   :  { %2437 = vrcp.f32 %v386_v30  ;;  %vm395_vm3 = vweird.f32 %v386_v30  ;;  %v401_v59 = vand.u32 2147483648, %v386_v30  ;;  %v399_v61 = vand.u32 2147483647, %v386_v30 }
  0xdd   :  { %2439 = vrcp.f32 %v387_v31  ;;  %vm410_vm0 = vweird.f32 %v387_v31  ;;  %v414_v52 = vand.u32 2147483647, %v387_v31  ;;  %v416_v53 = vand.u32 2147483648, %v387_v31 }
  0xde   :  { %v402_v2 = vor.u32 1.1754944e-38, %v401_v59  ;;  %vm400_vm11 = vcmp.eq.f32.partialorder %v399_v61, 8.507059e+37 }
  0xdf   :  { %v2436_v32 = vpop.eup %2435  ;;  %v417_v0 = vor.u32 1.1754944e-38, %v416_v53  ;;  %vm415_vm10 = vcmp.eq.f32.partialorder %v414_v52, 8.507059e+37 }
  0xe0   :  { %v388_v33 = vadd.f32 1.0, %v2436_v32 }
  0xe2   :  { %v2438_v34 = vpop.eup %2437  ;;  %2441 = vrcp.f32 %v388_v33  ;;  %v431_v48 = vand.u32 2147483648, %v388_v33  ;;  %v429_v51 = vand.u32 2147483647, %v388_v33  ;;  %vm425_vm6 = vweird.f32 %v388_v33 }
  0xe3   :  { %v2440_v35 = vpop.eup %2439  ;;  %v391_v36 = vmul.f32 %v2438_v34, %v386_v30  ;;  %vm396_vm4 = vweird.f32 %v2438_v34  ;;  %2443 = vpow2.f32 %v2370_v54 }
  0xe4   :  { %v406_v37 = vmul.f32 %v2440_v35, %v387_v31  ;;  %vm411_vm1 = vweird.f32 %v2440_v35  ;;  %v432_v60 = vor.u32 1.1754944e-38, %v431_v48  ;;  %vm430_vm8 = vcmp.eq.f32.partialorder %v429_v51, 8.507059e+37  ;;  %vm397_vm9 = vmor %vm395_vm3, %vm396_vm4 }
  0xe5   :  { %v392_v40 = vsub.f32 1.0, %v391_v36  ;;  %vm3022_vm5 = vmor %vm410_vm0, %vm411_vm1  ;;  %v628_v48 = vperm.slane %v480_v39, 2 }
  0xe6   :  { %v407_v38 = vsub.f32 1.0, %v406_v37 }
  0xe7   :  { %v393_v46 = vmul.f32 %v2438_v34, %v392_v40  ;;  %v626_v40 = vperm.slane %v480_v39, 0 }
  0xe8   :  { %v2442_v42 = vpop.eup %2441  ;;  %v408_v43 = vmul.f32 %v2440_v35, %v407_v38 }
  0xe9   :  { %v421_v44 = vmul.f32 %v2442_v42, %v388_v33  ;;  %vm426_vm2 = vweird.f32 %v2442_v42  ;;  %v394_v55 = vadd.f32 %v2438_v34, %v393_v46  ;;  %v2444_v8 = vpop.eup %2443 }
  0xea   :  { %v409_v49 = vadd.f32 %v2440_v35, %v408_v43  ;;  %vm427_vm7 = vmor %vm425_vm6, %vm426_vm2  ;;  %v389_v11 = vadd.f32 1.0, %v2444_v8 }
  0xeb   :  { %v422_v47 = vsub.f32 1.0, %v421_v44  ;;  %v398_v57 = vsel %vm397_vm9, %v2438_v34, %v394_v55 }
  0xec   :  { %v413_v62 = vsel %vm3022_vm5, %v2440_v35, %v409_v49  ;;  %v403_v5 = vsel %vm400_vm11, %v402_v2, %v398_v57  ;;  %v446_v27 = vand.u32 2147483648, %v389_v11  ;;  %vm440_vm0 = vweird.f32 %v389_v11 }
  0xed   :  { %v423_v50 = vmul.f32 %v2442_v42, %v422_v47  ;;  %v418_v3 = vsel %vm415_vm10, %v417_v0, %v413_v62  ;;  %v444_v30 = vand.u32 2147483647, %v389_v11 }
  0xee   :  { %v452_v6 = vmul.f32 0.0, %v418_v3  ;;  %v447_v35 = vor.u32 1.1754944e-38, %v446_v27 }
  0xef   :  { %v424_v58 = vadd.f32 %v2442_v42, %v423_v50  ;;  %vm445_vm3 = vcmp.eq.f32.partialorder %v444_v30, 8.507059e+37 }
  0xf1   :  { %v428_v63 = vsel %vm427_vm7, %v2442_v42, %v424_v58 }
  0xf2   :  { %v433_v29 = vsel %vm430_vm8, %v432_v60, %v428_v63 }
  0xf3   :  { %v450_v1 = vmul.f32 2.0, %v433_v29 }
  0xf5   :  { %v2371_v4 = vadd.f32 -1.0, %v450_v1  ;;  %v629_v1 = vperm.slane %v480_v39, 3 }
  0xf7   :  { %v453_v7 = vmul.f32 %v2371_v4, %v403_v5 }
  0xf9   :  { %v3029_v9 = vadd.f32 %v453_v7, %v452_v6 }
  0xfb   :  { %v2372_v10 = vmul.f32 -2.0, %v3029_v9 }
  0xfd   :  { %v457_v12 = vmul.f32 1.442695, %v2372_v10 }
  0xff   :  { %2445 = vpow2.f32 %v457_v12 }
 0x100   :  { %2447 = vrcp.f32 %v389_v11 }
 0x105   :  { %v2446_v13 = vpop.eup %2445 }
 0x106   :  { %v2448_v14 = vpop.eup %2447  ;;  %v459_v15 = vadd.f32 1.0, %v2446_v13 }
 0x107   :  { %v436_v16 = vmul.f32 %v2448_v14, %v389_v11  ;;  %vm441_vm13 = vweird.f32 %v2448_v14 }
 0x108   :  { %2449 = vrcp.f32 %v459_v15  ;;  %v471_v22 = vand.u32 2147483648, %v459_v15  ;;  %v469_v24 = vand.u32 2147483647, %v459_v15  ;;  %vm465_vm14 = vweird.f32 %v459_v15  ;;  %vm442_vm2 = vmor %vm440_vm0, %vm441_vm13 }
 0x109   :  { %v437_v17 = vsub.f32 1.0, %v436_v16 }
 0x10a   :  { %v472_v28 = vor.u32 1.1754944e-38, %v471_v22  ;;  %vm470_vm1 = vcmp.eq.f32.partialorder %v469_v24, 8.507059e+37 }
 0x10b   :  { %v438_v20 = vmul.f32 %v2448_v14, %v437_v17 }
 0x10d   :  { %v439_v25 = vadd.f32 %v2448_v14, %v438_v20 }
 0x10e   :  { %v2450_v18 = vpop.eup %2449 }
 0x10f   :  { %v461_v19 = vmul.f32 %v2450_v18, %v459_v15  ;;  %vm466_vm12 = vweird.f32 %v2450_v18  ;;  %v443_v33 = vsel %vm442_vm2, %v2448_v14, %v439_v25 }
 0x110   :  { %vm467_vm15 = vmor %vm465_vm14, %vm466_vm12  ;;  %v448_v37 = vsel %vm445_vm3, %v447_v35, %v443_v33 }
 0x111   :  { %v462_v21 = vsub.f32 1.0, %v461_v19 }
 0x113   :  { %v463_v23 = vmul.f32 %v2450_v18, %v462_v21 }
 0x115   :  { %v464_v26 = vadd.f32 %v2450_v18, %v463_v23 }
 0x117   :  { %v468_v31 = vsel %vm467_vm15, %v2450_v18, %v464_v26 }
 0x118   :  { %v473_v32 = vsel %vm470_vm1, %v472_v28, %v468_v31 }
 0x119   :  { %v475_v34 = vmul.f32 2.0, %v473_v32 }
 0x11b   :  { %v2373_v36 = vadd.f32 -1.0, %v475_v34 }
 0x11d   :  { %v477_v38 = vmul.f32 %v2373_v36, %v448_v37 }
 0x11f   :  { %478 = vst [vmem:[#allocation3] sm:$0x1] %v477_v38  ;;  %561 = vmatmul.f32.vlgmr.msra.gmra.mxu0 %v477_v38  ;;  %581 = vmatmul.f32.vlgmr.msra.gmra.mxu1 %v477_v38 }
 0x120   :  { %601 = vmatmul.f32.vlgmr.msra.gmra.mxu2 %v477_v38  ;;  %621 = vmatmul.f32.vlgmr.msra.gmra.mxu3 %v477_v38 }
 0x19c   :  { %v562_v42 = vpop.f32.mrf.mxu0  ;;  %v582_v43 = vpop.f32.mrf.mxu1 }
 0x19d   :  { %v634_v44 = vadd.f32 %v626_v40, %v562_v42  ;;  %v635_v45 = vadd.f32 %v627_v41, %v582_v43 }
 0x19f   :  { %v2374_v46 = vmul.f32 -1.442695, %v634_v44  ;;  %v2375_v47 = vmul.f32 -1.442695, %v635_v45 }
 0x1a1   :  { %2451 = vpow2.f32 %v2374_v46 }
 0x1a2   :  { %2453 = vpow2.f32 %v2375_v47 }
 0x1a3   :  { %v602_v49 = vpop.f32.mrf.mxu2  ;;  %v622_v29 = vpop.f32.mrf.mxu3 }
 0x1a4   :  { %v636_v50 = vadd.f32 %v628_v48, %v602_v49  ;;  %v637_v4 = vadd.f32 %v629_v1, %v622_v29 }
 0x1a6   :  { %v2376_v51 = vmul.f32 -1.442695, %v636_v50  ;;  %v2377_v14 = vmul.f32 -1.442695, %v637_v4 }
 0x1a7   :  { %v2452_v52 = vpop.eup %2451 }
 0x1a8   :  { %v2454_v53 = vpop.eup %2453  ;;  %v650_v54 = vadd.f32 1.0, %v2452_v52  ;;  %2455 = vpow2.f32 %v2376_v51 }
 0x1a9   :  { %v651_v55 = vadd.f32 1.0, %v2454_v53 }
 0x1aa   :  { %2457 = vrcp.f32 %v650_v54  ;;  %vm659_vm10 = vweird.f32 %v650_v54  ;;  %v665_v18 = vand.u32 2147483648, %v650_v54  ;;  %v663_v20 = vand.u32 2147483647, %v650_v54 }
 0x1ab   :  { %2459 = vrcp.f32 %v651_v55  ;;  %vm674_vm6 = vweird.f32 %v651_v55  ;;  %v678_v12 = vand.u32 2147483647, %v651_v55  ;;  %v680_v13 = vand.u32 2147483648, %v651_v55 }
 0x1ac   :  { %v666_v27 = vor.u32 1.1754944e-38, %v665_v18  ;;  %vm664_vm15 = vcmp.eq.f32.partialorder %v663_v20, 8.507059e+37  ;;  %v3055_v20 = vld [vmem:[#allocation7 + $0x1e0] sm:$0xff] }
 0x1ad   :  { %v681_v23 = vor.u32 1.1754944e-38, %v680_v13  ;;  %vm679_vm14 = vcmp.eq.f32.partialorder %v678_v12, 8.507059e+37  ;;  %1073 = vmatpush.msra.mxu0 %v3055_v20 }
 0x1ae   :  { %v2456_v56 = vpop.eup %2455 }
 0x1af   :  { %v652_v58 = vadd.f32 1.0, %v2456_v56 }
 0x1b0   :  { %v2458_v59 = vpop.eup %2457 }
 0x1b1   :  { %v2460_v60 = vpop.eup %2459  ;;  %2461 = vrcp.f32 %v652_v58  ;;  %v655_v61 = vmul.f32 %v2458_v59, %v650_v54  ;;  %v695_v7 = vand.u32 2147483648, %v652_v58  ;;  %v693_v11 = vand.u32 2147483647, %v652_v58 }
 0x1b2   :  { %v670_v62 = vmul.f32 %v2460_v60, %v651_v55  ;;  %vm675_vm4 = vweird.f32 %v2460_v60  ;;  %vm660_vm7 = vweird.f32 %v2458_v59  ;;  %vm689_vm9 = vweird.f32 %v652_v58 }
 0x1b3   :  { %v656_v0 = vsub.f32 1.0, %v655_v61  ;;  %vm3032_vm8 = vmor %vm674_vm6, %vm675_vm4  ;;  %v696_v19 = vor.u32 1.1754944e-38, %v695_v7  ;;  %vm694_vm12 = vcmp.eq.f32.partialorder %v693_v11, 8.507059e+37  ;;  %2463 = vpow2.f32 %v2377_v14 }
 0x1b4   :  { %v671_v63 = vsub.f32 1.0, %v670_v62  ;;  %vm661_vm13 = vmor %vm659_vm10, %vm660_vm7 }
 0x1b5   :  { %v657_v5 = vmul.f32 %v2458_v59, %v656_v0  ;;  %v744_v0 = vld [vmem:[#allocation2 + $0x2] ss:$8 sm:$0xf] }
 0x1b6   :  { %v672_v2 = vmul.f32 %v2460_v60, %v671_v63  ;;  %v890_v29 = vperm.slane %v744_v0, 0  ;;  %v892_v7 = vperm.slane %v744_v0, 2 }
 0x1b7   :  { %v2462_v57 = vpop.eup %2461  ;;  %v658_v15 = vadd.f32 %v2458_v59, %v657_v5 }
 0x1b8   :  { %v685_v3 = vmul.f32 %v2462_v57, %v652_v58  ;;  %v673_v8 = vadd.f32 %v2460_v60, %v672_v2  ;;  %vm690_vm5 = vweird.f32 %v2462_v57 }
 0x1b9   :  { %vm691_vm11 = vmor %vm689_vm9, %vm690_vm5  ;;  %v662_v25 = vsel %vm661_vm13, %v2458_v59, %v658_v15  ;;  %v2464_v34 = vpop.eup %2463 }
 0x1ba   :  { %v686_v6 = vsub.f32 1.0, %v685_v3  ;;  %v677_v21 = vsel %vm3032_vm8, %v2460_v60, %v673_v8  ;;  %v667_v31 = vsel %vm664_vm15, %v666_v27, %v662_v25  ;;  %v653_v37 = vadd.f32 1.0, %v2464_v34  ;;  %v3067_v25 = vld [vmem:[#allocation7 + $0x1f8] sm:$0xff]  ;;  %v3073_v27 = vld [vmem:[#allocation7 + $0x1c8] sm:$0xff]  ;;  %v3083_v34 = vld [vmem:[#allocation7 + $0x1a0] sm:$0xff] }
 0x1bb   :  { %v682_v28 = vsel %vm679_vm14, %v681_v23, %v677_v21  ;;  %v3057_v21 = vld [vmem:[#allocation7 + $0x1e8] sm:$0xff]  ;;  %1133 = vmatpush.msra.mxu3 %v3067_v25 }
 0x1bc   :  { %v687_v10 = vmul.f32 %v2462_v57, %v686_v6  ;;  %v716_v32 = vmul.f32 %v682_v28, %v3029_v9  ;;  %v710_v52 = vand.u32 2147483648, %v653_v37  ;;  %vm704_vm4 = vweird.f32 %v653_v37  ;;  %1093 = vmatpush.msra.mxu1 %v3057_v21 }
 0x1bd   :  { %v708_v54 = vand.u32 2147483647, %v653_v37 }
 0x1be   :  { %v688_v17 = vadd.f32 %v2462_v57, %v687_v10  ;;  %v711_v60 = vor.u32 1.1754944e-38, %v710_v52  ;;  %1094 = vmatpush.msra.mxu1 %v3073_v27 }
 0x1bf   :  { %vm709_vm7 = vcmp.eq.f32.partialorder %v708_v54, 8.507059e+37  ;;  %v3125_v54 = vld [vmem:[#allocation7 + $0x148] sm:$0xff] }
 0x1c0   :  { %v692_v22 = vsel %vm691_vm11, %v2462_v57, %v688_v17  ;;  %v891_v57 = vperm.slane %v744_v0, 1  ;;  %3892 = vst [vmem:[#allocation15_spill] sm:$0xff] %v3125_v54 }
 0x1c1   :  { %v697_v24 = vsel %vm694_vm12, %v696_v19, %v692_v22  ;;  %v3059_v22 = vld [vmem:[#allocation7 + $0x1f0] sm:$0xff] }
 0x1c2   :  { %v714_v26 = vmul.f32 2.0, %v697_v24  ;;  %1113 = vmatpush.msra.mxu2 %v3059_v22 }
 0x1c4   :  { %v2378_v30 = vadd.f32 -1.0, %v714_v26  ;;  %v3071_v26 = vld [vmem:[#allocation7 + $0x1c0] sm:$0xff] }
 0x1c5   :  { %3888 = vst [vmem:[#allocation11_spill] sm:$0xff] %v3071_v26  ;;  %1074 = vmatpush.msra.mxu0 %v3071_v26 }
 0x1c6   :  { %v717_v33 = vmul.f32 %v2378_v30, %v667_v31  ;;  %v3077_v31 = vld [vmem:[#allocation7 + $0x1d0] sm:$0xff] }
 0x1c7   :  { %1114 = vmatpush.msra.mxu2 %v3077_v31  ;;  %1075 = vmatpush.msra.mxu0 %v3083_v34 }
 0x1c8   :  { %v3039_v35 = vadd.f32 %v717_v33, %v716_v32  ;;  %v3079_v32 = vld [vmem:[#allocation7 + $0x1d8] sm:$0xff]  ;;  %v893_v33 = vperm.slane %v744_v0, 3 }
 0x1c9   :  { %1134 = vmatpush.msra.mxu3 %v3079_v32 }
 0x1ca   :  { %v2379_v36 = vmul.f32 -2.0, %v3039_v35 }
 0x1cc   :  { %v721_v38 = vmul.f32 1.442695, %v2379_v36  ;;  %v3085_v36 = vld [vmem:[#allocation7 + $0x1a8] sm:$0xff] }
 0x1cd   :  { %1095 = vmatpush.msra.mxu1 %v3085_v36 }
 0x1ce   :  { %2465 = vpow2.f32 %v721_v38 }
 0x1cf   :  { %2467 = vrcp.f32 %v653_v37 }
 0x1d4   :  { %v2466_v39 = vpop.eup %2465 }
 0x1d5   :  { %v2468_v40 = vpop.eup %2467  ;;  %v723_v41 = vadd.f32 1.0, %v2466_v39  ;;  %v3091_v39 = vld [vmem:[#allocation7 + $0x1b8] sm:$0xff] }
 0x1d6   :  { %v700_v42 = vmul.f32 %v2468_v40, %v653_v37  ;;  %vm705_vm1 = vweird.f32 %v2468_v40  ;;  %v3087_v37 = vld [vmem:[#allocation7 + $0x1b0] sm:$0xff]  ;;  %1135 = vmatpush.msra.mxu3 %v3091_v39 }
 0x1d7   :  { %2469 = vrcp.f32 %v723_v41  ;;  %v735_v47 = vand.u32 2147483648, %v723_v41  ;;  %v733_v49 = vand.u32 2147483647, %v723_v41  ;;  %vm729_vm2 = vweird.f32 %v723_v41  ;;  %vm706_vm6 = vmor %vm704_vm4, %vm705_vm1  ;;  %1115 = vmatpush.msra.mxu2 %v3087_v37 }
 0x1d8   :  { %v701_v43 = vsub.f32 1.0, %v700_v42  ;;  %v3097_v42 = vld [vmem:[#allocation7 + $0x180] sm:$0xff] }
 0x1d9   :  { %v736_v53 = vor.u32 1.1754944e-38, %v735_v47  ;;  %vm734_vm5 = vcmp.eq.f32.partialorder %v733_v49, 8.507059e+37  ;;  %3889 = vst [vmem:[#allocation12_spill] sm:$0xff] %v3097_v42  ;;  %1076 = vmatpush.msra.mxu0 %v3097_v42  ;;  %v3110_v47 = vld [vmem:[#allocation7 + $0x160] sm:$0xff]  ;;  %v3116_v49 = vld [vmem:[#allocation7 + $0x170] sm:$0xff] }
 0x1da   :  { %v702_v46 = vmul.f32 %v2468_v40, %v701_v43  ;;  %v3099_v43 = vld [vmem:[#allocation7 + $0x188] sm:$0xff] }
 0x1db   :  { %1096 = vmatpush.msra.mxu1 %v3099_v43  ;;  %1077 = vmatpush.msra.mxu0 %v3110_v47 }
 0x1dc   :  { %v703_v50 = vadd.f32 %v2468_v40, %v702_v46 }
 0x1dd   :  { %v2470_v44 = vpop.eup %2469 }
 0x1de   :  { %v725_v45 = vmul.f32 %v2470_v44, %v723_v41  ;;  %vm730_vm0 = vweird.f32 %v2470_v44  ;;  %v707_v58 = vsel %vm706_vm6, %v2468_v40, %v703_v50  ;;  %v3118_v50 = vld [vmem:[#allocation7 + $0x178] sm:$0xff] }
 0x1df   :  { %vm731_vm3 = vmor %vm729_vm2, %vm730_vm0  ;;  %v712_v62 = vsel %vm709_vm7, %v711_v60, %v707_v58  ;;  %3891 = vst [vmem:[#allocation14_spill] sm:$0xff] %v3118_v50  ;;  %v3135_v60 = vld [vmem:[#allocation7 + $0x120] sm:$0xff] }
 0x1e0   :  { %v726_v9 = vsub.f32 1.0, %v725_v45  ;;  %3894 = vst [vmem:[#allocation17_spill] sm:$0xff] %v3135_v60 }
 0x1e2   :  { %v727_v48 = vmul.f32 %v2470_v44, %v726_v9  ;;  %v3108_v9 = vld [vmem:[#allocation7 + $0x198] sm:$0xff] }
 0x1e3   :  { %1136 = vmatpush.msra.mxu3 %v3108_v9 }
 0x1e4   :  { %v728_v51 = vadd.f32 %v2470_v44, %v727_v48  ;;  %v3112_v48 = vld [vmem:[#allocation7 + $0x168] sm:$0xff] }
 0x1e5   :  { %1097 = vmatpush.msra.mxu1 %v3112_v48  ;;  %1137 = vmatpush.msra.mxu3 %v3118_v50 }
 0x1e6   :  { %v732_v55 = vsel %vm731_vm3, %v2470_v44, %v728_v51  ;;  %v3101_v44 = vld [vmem:[#allocation7 + $0x190] sm:$0xff] }
 0x1e7   :  { %v737_v56 = vsel %vm734_vm5, %v736_v53, %v732_v55  ;;  %3890 = vst [vmem:[#allocation13_spill] sm:$0xff] %v3101_v44  ;;  %1116 = vmatpush.msra.mxu2 %v3101_v44  ;;  %v3123_v53 = vld [vmem:[#allocation7 + $0x140] sm:$0xff]  ;;  %v3127_v55 = vld [vmem:[#allocation7 + $0x150] sm:$0xff]  ;;  %1098 = vmatpush.msra.mxu1 %v3125_v54 }
 0x1e8   :  { %v739_v59 = vmul.f32 2.0, %v737_v56  ;;  %1078 = vmatpush.msra.mxu0 %v3123_v53 }
 0x1e9   :  { %1117 = vmatpush.msra.mxu2 %v3116_v49 }
 0x1ea   :  { %v2380_v61 = vadd.f32 -1.0, %v739_v59  ;;  %v3133_v59 = vld [vmem:[#allocation7 + $0x158] sm:$0xff]  ;;  %1079 = vmatpush.msra.mxu0 %v3135_v60 }
 0x1eb   :  { %3893 = vst [vmem:[#allocation16_spill] sm:$0xff] %v3133_v59  ;;  %1118 = vmatpush.msra.mxu2 %v3127_v55  ;;  %1138 = vmatpush.msra.mxu3 %v3133_v59 }
 0x1ec   :  { %v741_v63 = vmul.f32 %v2380_v61, %v712_v62  ;;  %v3137_v61 = vld [vmem:[#allocation7 + $0x128] sm:$0xff] }
 0x1ed   :  { %1099 = vmatpush.msra.mxu1 %v3137_v61 }
 0x1ee   :  { %742 = vst [vmem:[#allocation3 + $0x1] sm:$0x1] %v741_v63  ;;  %825 = vmatmul.f32.vlgmr.msrb.gmra.mxu0 %v741_v63  ;;  %845 = vmatmul.f32.vlgmr.msrb.gmra.mxu1 %v741_v63 }
 0x1ef   :  { %865 = vmatmul.f32.vlgmr.msrb.gmra.mxu2 %v741_v63  ;;  %885 = vmatmul.f32.vlgmr.msrb.gmra.mxu3 %v741_v63 }
 0x26b   :  { %v826_v1 = vpop.f32.mrf.mxu0  ;;  %v846_v2 = vpop.f32.mrf.mxu1 }
 0x26c   :  { %v898_v3 = vadd.f32 %v890_v29, %v826_v1  ;;  %v899_v4 = vadd.f32 %v891_v57, %v846_v2  ;;  %v3145_v29 = vld [vmem:[#allocation7 + $0x130] sm:$0xff]  ;;  %v3147_v57 = vld [vmem:[#allocation7 + $0x138] sm:$0xff] }
 0x26d   :  { %1119 = vmatpush.msra.mxu2 %v3145_v29  ;;  %1139 = vmatpush.msra.mxu3 %v3147_v57 }
 0x26e   :  { %v2381_v5 = vmul.f32 -1.442695, %v898_v3  ;;  %v2382_v6 = vmul.f32 -1.442695, %v899_v4  ;;  %v3154_v3 = vld [vmem:[#allocation7 + $0x100] sm:$0xff]  ;;  %v3156_v4 = vld [vmem:[#allocation7 + $0x108] sm:$0xff] }
 0x26f   :  { %1080 = vmatpush.msra.mxu0 %v3154_v3  ;;  %1100 = vmatpush.msra.mxu1 %v3156_v4 }
 0x270   :  { %2471 = vpow2.f32 %v2381_v5 }
 0x271   :  { %2473 = vpow2.f32 %v2382_v6 }
 0x272   :  { %v866_v8 = vpop.f32.mrf.mxu2  ;;  %v886_v30 = vpop.f32.mrf.mxu3 }
 0x273   :  { %v900_v10 = vadd.f32 %v892_v7, %v866_v8  ;;  %v901_v41 = vadd.f32 %v893_v33, %v886_v30  ;;  %v3170_v8 = vld [vmem:[#allocation7 + $0x110] sm:$0xff]  ;;  %v3199_v30 = vld [vmem:[#allocation7 + $0xf8] sm:$0xff] }
 0x274   :  { %3901 = vst [vmem:[#allocation20_spill] sm:$0xff] %v3199_v30  ;;  %1120 = vmatpush.msra.mxu2 %v3170_v8  ;;  %v3261_v33 = vld [vmem:[#allocation7 + $0x78] sm:$0xff] }
 0x275   :  { %v2383_v11 = vmul.f32 -1.442695, %v900_v10  ;;  %v2384_v58 = vmul.f32 -1.442695, %v901_v41  ;;  %v3172_v10 = vld [vmem:[#allocation7 + $0x118] sm:$0xff]  ;;  %v3213_v41 = vld [vmem:[#allocation7 + $0xc8] sm:$0xff] }
 0x276   :  { %v2472_v12 = vpop.eup %2471  ;;  %1140 = vmatpush.msra.mxu3 %v3172_v10  ;;  %3905 = vst [vmem:[#allocation22_spill] sm:$0xff] %v3261_v33 }
 0x277   :  { %v2474_v13 = vpop.eup %2473  ;;  %v3042_v14 = vadd.f32 1.0, %v2472_v12  ;;  %2475 = vpow2.f32 %v2383_v11  ;;  %v3247_v12 = vld [vmem:[#allocation7 + $0x98] sm:$0xff] }
 0x278   :  { %v3044_v15 = vadd.f32 1.0, %v2474_v13  ;;  %1141 = vmatpush.msra.mxu3 %v3199_v30 }
 0x279   :  { %2477 = vrcp.f32 %v3042_v14  ;;  %vm923_vm14 = vweird.f32 %v3042_v14  ;;  %v929_v11 = vand.u32 2147483648, %v3042_v14 }
 0x27a   :  { %2479 = vrcp.f32 %v3044_v15  ;;  %vm938_vm10 = vweird.f32 %v3044_v15  ;;  %v942_v1 = vand.u32 2147483647, %v3044_v15  ;;  %v944_v2 = vand.u32 2147483648, %v3044_v15 }
 0x27c   :  { %vm943_vm2 = vcmp.eq.f32.partialorder %v942_v1, 8.507059e+37 }
 0x27d   :  { %v2476_v16 = vpop.eup %2475 }
 0x27e   :  { %v3048_v17 = vadd.f32 1.0, %v2476_v16  ;;  %v3186_v16 = vld [vmem:[#allocation7 + $0xe8] sm:$0xff] }
 0x27f   :  { %v3050_v18 = vpop.eup %2477  ;;  %1101 = vmatpush.msra.mxu1 %v3186_v16 }
 0x280   :  { %v3052_v19 = vpop.eup %2479  ;;  %2481 = vrcp.f32 %v3048_v17  ;;  %v919_v23 = vmul.f32 %v3050_v18, %v3042_v14  ;;  %v959_v56 = vand.u32 2147483648, %v3048_v17  ;;  %v957_v0 = vand.u32 2147483647, %v3048_v17 }
 0x281   :  { %v934_v24 = vmul.f32 %v3052_v19, %v3044_v15  ;;  %vm939_vm8 = vweird.f32 %v3052_v19  ;;  %vm924_vm11 = vweird.f32 %v3050_v18  ;;  %vm953_vm13 = vweird.f32 %v3048_v17  ;;  %v3184_v15 = vld [vmem:[#allocation7 + $0xe0] sm:$0xff]  ;;  %1102 = vmatpush.msra.mxu1 %v3213_v41 }
 0x282   :  { %v920_v38 = vsub.f32 1.0, %v919_v23  ;;  %vm3162_vm12 = vmor %vm938_vm10, %vm939_vm8  ;;  %v960_v13 = vor.u32 1.1754944e-38, %v959_v56  ;;  %3899 = vst [vmem:[#allocation18_spill] sm:$0xff] %v3184_v15  ;;  %vm958_vm0 = vcmp.eq.f32.partialorder %v957_v0, 8.507059e+37  ;;  %2483 = vpow2.f32 %v2384_v58  ;;  %1081 = vmatpush.msra.mxu0 %v3184_v15  ;;  %v3234_v0 = vld [vmem:[#allocation7 + $0xb8] sm:$0xff] }
 0x283   :  { %v935_v28 = vsub.f32 1.0, %v934_v24  ;;  %vm3205_vm1 = vmor %vm923_vm14, %vm924_vm11 }
 0x284   :  { %v921_v51 = vmul.f32 %v3050_v18, %v920_v38 }
 0x285   :  { %v936_v45 = vmul.f32 %v3052_v19, %v935_v28  ;;  %v3197_v28 = vld [vmem:[#allocation7 + $0xf0] sm:$0xff] }
 0x286   :  { %v3093_v40 = vpop.eup %2481  ;;  %v922_v5 = vadd.f32 %v3050_v18, %v921_v51  ;;  %3900 = vst [vmem:[#allocation19_spill] sm:$0xff] %v3197_v28  ;;  %v3222_v51 = vld [vmem:[#allocation7 + $0xd8] sm:$0xff]  ;;  %1121 = vmatpush.msra.mxu2 %v3197_v28 }
 0x287   :  { %v949_v46 = vmul.f32 %v3093_v40, %v3048_v17  ;;  %v937_v62 = vadd.f32 %v3052_v19, %v936_v45  ;;  %vm954_vm9 = vweird.f32 %v3093_v40  ;;  %v927_v17 = vand.u32 2147483647, %v3042_v14  ;;  %1142 = vmatpush.msra.mxu3 %v3222_v51 }
 0x288   :  { %vm3178_vm15 = vmor %vm953_vm13, %vm954_vm9  ;;  %v926_v45 = vsel %vm3205_vm1, %v3050_v18, %v922_v5  ;;  %v3228_v18 = vld [vmem:[#allocation7 + $0xa8] sm:$0xff] }
 0x289   :  { %v950_v52 = vsub.f32 1.0, %v949_v46  ;;  %v941_v23 = vsel %vm3162_vm12, %v3052_v19, %v937_v62  ;;  %v945_v19 = vor.u32 1.1754944e-38, %v944_v2  ;;  %v3220_v46 = vld [vmem:[#allocation7 + $0xd0] sm:$0xff]  ;;  %v3226_v62 = vld [vmem:[#allocation7 + $0xa0] sm:$0xff]  ;;  %vm928_vm3 = vcmp.eq.f32.partialorder %v927_v17, 8.507059e+37  ;;  %v3240_v5 = vld [vmem:[#allocation7 + $0x88] sm:$0xff]  ;;  %1103 = vmatpush.msra.mxu1 %v3228_v18  ;;  %1143 = vmatpush.msra.mxu3 %v3234_v0 }
 0x28a   :  { %1122 = vmatpush.msra.mxu2 %v3220_v46  ;;  %v3238_v2 = vld [vmem:[#allocation7 + $0x80] sm:$0xff]  ;;  %v3253_v17 = vld [vmem:[#allocation7 + $0x68] sm:$0xff] }
 0x28b   :  { %v951_v63 = vmul.f32 %v3093_v40, %v950_v52  ;;  %v930_v52 = vor.u32 1.1754944e-38, %v929_v11  ;;  %v946_v56 = vsel %vm943_vm2, %v945_v19, %v941_v23  ;;  %v3245_v11 = vld [vmem:[#allocation7 + $0x90] sm:$0xff]  ;;  %v2484_v23 = vpop.eup %2483  ;;  %1104 = vmatpush.msra.mxu1 %v3240_v5  ;;  %1144 = vmatpush.msra.mxu3 %v3247_v12  ;;  %v3265_v19 = vld [vmem:[#allocation7 + $0x40] sm:$0xff] }
 0x28c   :  { %v980_v6 = vmul.f32 %v946_v56, %v3039_v35  ;;  %v3259_v35 = vld [vmem:[#allocation7 + $0x70] sm:$0xff]  ;;  %v3276_v56 = vadd.f32 1.0, %v2484_v23  ;;  %v3292_v23 = vld [vmem:[#allocation7] sm:$0xff] }
 0x28d   :  { %v952_v7 = vadd.f32 %v3093_v40, %v951_v63  ;;  %v3232_v63 = vld [vmem:[#allocation7 + $0xb0] sm:$0xff]  ;;  %v931_v1 = vsel %vm928_vm3, %v930_v52, %v926_v45  ;;  %1105 = vmatpush.msra.mxu1 %v3253_v17  ;;  %v3274_v52 = vld [vmem:[#allocation7 + $0x58] sm:$0xff]  ;;  %1145 = vmatpush.msra.mxu3 %v3261_v33  ;;  %3907 = vst [vmem:[#allocation24_spill] sm:$0xff] %v3292_v23  ;;  %v3294_v33 = vld [vmem:[#allocation7 + $0x8] sm:$0xff] }
 0x28e   :  { %1123 = vmatpush.msra.mxu2 %v3232_v63  ;;  %3908 = vst [vmem:[#allocation25_spill] sm:$0xff] %v3294_v33  ;;  %vm968_vm8 = vweird.f32 %v3276_v56 }
 0x28f   :  { %v956_v24 = vsel %vm3178_vm15, %v3093_v40, %v952_v7  ;;  %v3211_v40 = vld [vmem:[#allocation7 + $0xc0] sm:$0xff]  ;;  %1146 = vmatpush.msra.mxu3 %v3274_v52 }
 0x290   :  { %v961_v38 = vsel %vm958_vm0, %v960_v13, %v956_v24  ;;  %1082 = vmatpush.msra.mxu0 %v3211_v40  ;;  %v3251_v13 = vld [vmem:[#allocation7 + $0x60] sm:$0xff]  ;;  %1124 = vmatpush.msra.mxu2 %v3245_v11 }
 0x291   :  { %v978_v14 = vmul.f32 2.0, %v961_v38  ;;  %v3267_v38 = vld [vmem:[#allocation7 + $0x48] sm:$0xff] }
 0x292   :  { %1083 = vmatpush.msra.mxu0 %v3226_v62  ;;  %3906 = vst [vmem:[#allocation23_spill] sm:$0xff] %v3267_v38  ;;  %1125 = vmatpush.msra.mxu2 %v3259_v35 }
 0x293   :  { %v2385_v58 = vadd.f32 -1.0, %v978_v14  ;;  %v3272_v14 = vld [vmem:[#allocation7 + $0x50] sm:$0xff]  ;;  %1106 = vmatpush.msra.mxu1 %v3267_v38  ;;  %v3300_v38 = vld [vmem:[#allocation7 + $0x18] sm:$0xff] }
 0x294   :  { %1084 = vmatpush.msra.mxu0 %v3238_v2  ;;  %1126 = vmatpush.msra.mxu2 %v3272_v14 }
 0x295   :  { %v981_v7 = vmul.f32 %v2385_v58, %v931_v1  ;;  %v3280_v58 = vld [vmem:[#allocation7 + $0x20] sm:$0xff]  ;;  %v3282_v1 = vld [vmem:[#allocation7 + $0x28] sm:$0xff] }
 0x296   :  { %1085 = vmatpush.msra.mxu0 %v3251_v13  ;;  %1107 = vmatpush.msra.mxu1 %v3282_v1 }
 0x297   :  { %v3255_v24 = vadd.f32 %v981_v7, %v980_v6  ;;  %v3286_v7 = vld [vmem:[#allocation7 + $0x30] sm:$0xff] }
 0x298   :  { %1086 = vmatpush.msra.mxu0 %v3265_v19  ;;  %1127 = vmatpush.msra.mxu2 %v3286_v7 }
 0x299   :  { %3904 = vst [vmem:[#allocation21_spill] sm:$0xff] %v3255_v24  ;;  %v2386_v45 = vmul.f32 -2.0, %v3255_v24  ;;  %v3288_v24 = vld [vmem:[#allocation7 + $0x38] sm:$0xff]  ;;  %1108 = vmatpush.msra.mxu1 %v3294_v33 }
 0x29a   :  { %1087 = vmatpush.msra.mxu0 %v3280_v58  ;;  %1147 = vmatpush.msra.mxu3 %v3288_v24 }
 0x29b   :  { %v985_v6 = vmul.f32 1.442695, %v2386_v45  ;;  %v3298_v45 = vld [vmem:[#allocation7 + $0x10] sm:$0xff]  ;;  %1357 = vmatpush.msrb.mxu1 %v3057_v21 }
 0x29c   :  { %1088 = vmatpush.msra.mxu0 %v3292_v23  ;;  %1128 = vmatpush.msra.mxu2 %v3298_v45 }
 0x29d   :  { %2485 = vpow2.f32 %v985_v6  ;;  %1148 = vmatpush.msra.mxu3 %v3300_v38  ;;  %1358 = vmatpush.msrb.mxu1 %v3073_v27 }
 0x29e   :  { %2487 = vrcp.f32 %v3276_v56  ;;  %1337 = vmatpush.msrb.mxu0 %v3055_v20  ;;  %1377 = vmatpush.msrb.mxu2 %v3059_v22 }
 0x29f   :  { %1397 = vmatpush.msrb.mxu3 %v3067_v25  ;;  %1359 = vmatpush.msrb.mxu1 %v3085_v36 }
 0x2a0   :  { %1338 = vmatpush.msrb.mxu0 %v3071_v26  ;;  %1378 = vmatpush.msrb.mxu2 %v3077_v31 }
 0x2a1   :  { %1398 = vmatpush.msrb.mxu3 %v3079_v32  ;;  %1360 = vmatpush.msrb.mxu1 %v3099_v43 }
 0x2a2   :  { %1339 = vmatpush.msrb.mxu0 %v3083_v34  ;;  %1379 = vmatpush.msrb.mxu2 %v3087_v37 }
 0x2a3   :  { %v2486_v6 = vpop.eup %2485  ;;  %1399 = vmatpush.msrb.mxu3 %v3091_v39  ;;  %1361 = vmatpush.msrb.mxu1 %v3112_v48 }
 0x2a4   :  { %v3315_v23 = vpop.eup %2487  ;;  %v987_v33 = vadd.f32 1.0, %v2486_v6  ;;  %1340 = vmatpush.msrb.mxu0 %v3097_v42  ;;  %1380 = vmatpush.msrb.mxu2 %v3101_v44 }
 0x2a5   :  { %v964_v26 = vmul.f32 %v3315_v23, %v3276_v56  ;;  %1400 = vmatpush.msrb.mxu3 %v3108_v9  ;;  %1362 = vmatpush.msrb.mxu1 %v3125_v54  ;;  %vm969_vm5 = vweird.f32 %v3315_v23 }
 0x2a6   :  { %2489 = vrcp.f32 %v987_v33  ;;  %1341 = vmatpush.msrb.mxu0 %v3110_v47  ;;  %1381 = vmatpush.msrb.mxu2 %v3116_v49  ;;  %v999_v54 = vand.u32 2147483648, %v987_v33  ;;  %vm993_vm6 = vweird.f32 %v987_v33  ;;  %vm3363_vm10 = vmor %vm968_vm8, %vm969_vm5 }
 0x2a7   :  { %1401 = vmatpush.msrb.mxu3 %v3118_v50  ;;  %v965_v6 = vsub.f32 1.0, %v964_v26  ;;  %1363 = vmatpush.msrb.mxu1 %v3137_v61 }
 0x2a8   :  { %1342 = vmatpush.msrb.mxu0 %v3123_v53  ;;  %1382 = vmatpush.msrb.mxu2 %v3127_v55 }
 0x2a9   :  { %1402 = vmatpush.msrb.mxu3 %v3133_v59  ;;  %v966_v26 = vmul.f32 %v3315_v23, %v965_v6  ;;  %1364 = vmatpush.msrb.mxu1 %v3156_v4 }
 0x2aa   :  { %1343 = vmatpush.msrb.mxu0 %v3135_v60  ;;  %1383 = vmatpush.msrb.mxu2 %v3145_v29  ;;  %v997_v60 = vand.u32 2147483647, %v987_v33 }
 0x2ab   :  { %1403 = vmatpush.msrb.mxu3 %v3147_v57  ;;  %1365 = vmatpush.msrb.mxu1 %v3186_v16 }
 0x2ac   :  { %v2490_v42 = vpop.eup %2489  ;;  %1344 = vmatpush.msrb.mxu0 %v3154_v3  ;;  %1384 = vmatpush.msrb.mxu2 %v3170_v8  ;;  %vm998_vm9 = vcmp.eq.f32.partialorder %v997_v60, 8.507059e+37 }
 0x2ad   :  { %v989_v44 = vmul.f32 %v2490_v42, %v987_v33  ;;  %1404 = vmatpush.msrb.mxu3 %v3172_v10  ;;  %vm994_vm4 = vweird.f32 %v2490_v42  ;;  %1366 = vmatpush.msrb.mxu1 %v3213_v41 }
 0x2ae   :  { %1345 = vmatpush.msrb.mxu0 %v3184_v15  ;;  %1385 = vmatpush.msrb.mxu2 %v3197_v28  ;;  %vm995_vm7 = vmor %vm993_vm6, %vm994_vm4  ;;  %v1000_v15 = vor.u32 1.1754944e-38, %v999_v54 }
 0x2af   :  { %v990_v50 = vsub.f32 1.0, %v989_v44  ;;  %1405 = vmatpush.msrb.mxu3 %v3199_v30  ;;  %v967_v44 = vadd.f32 %v3315_v23, %v966_v26  ;;  %v972_v30 = vand.u32 2147483647, %v3276_v56  ;;  %1367 = vmatpush.msrb.mxu1 %v3228_v18  ;;  %v3912_v26 = vld [vmem:[#allocation23_spill] sm:$0xff] }
 0x2b0   :  { %1346 = vmatpush.msrb.mxu0 %v3211_v40  ;;  %1386 = vmatpush.msrb.mxu2 %v3220_v46 }
 0x2b1   :  { %v991_v59 = vmul.f32 %v2490_v42, %v990_v50  ;;  %v974_v50 = vand.u32 2147483648, %v3276_v56  ;;  %1406 = vmatpush.msrb.mxu3 %v3222_v51  ;;  %1368 = vmatpush.msrb.mxu1 %v3240_v5  ;;  %vm973_vm11 = vcmp.eq.f32.partialorder %v972_v30, 8.507059e+37  ;;  %v3911_v56 = vld [vmem:[#allocation22_spill] sm:$0xff]  ;;  %v3913_v30 = vld [vmem:[#allocation24_spill] sm:$0xff] }
 0x2b2   :  { %1347 = vmatpush.msrb.mxu0 %v3226_v62  ;;  %1387 = vmatpush.msrb.mxu2 %v3232_v63 }
 0x2b3   :  { %v992_v6 = vadd.f32 %v2490_v42, %v991_v59  ;;  %1407 = vmatpush.msrb.mxu3 %v3234_v0  ;;  %v975_v33 = vor.u32 1.1754944e-38, %v974_v50  ;;  %1369 = vmatpush.msrb.mxu1 %v3253_v17 }
 0x2b4   :  { %1348 = vmatpush.msrb.mxu0 %v3238_v2  ;;  %1388 = vmatpush.msrb.mxu2 %v3245_v11 }
 0x2b5   :  { %v996_v28 = vsel %vm995_vm7, %v2490_v42, %v992_v6  ;;  %v971_v42 = vsel %vm3363_vm10, %v3315_v23, %v967_v44  ;;  %1408 = vmatpush.msrb.mxu3 %v3247_v12  ;;  %1370 = vmatpush.msrb.mxu1 %v3912_v26  ;;  %v3914_v44 = vld [vmem:[#allocation25_spill] sm:$0xff]  ;;  %v3915_v6 = vld [vmem:[#allocation11_spill] sm:$0xff] }
 0x2b6   :  { %v1001_v54 = vsel %vm998_vm9, %v1000_v15, %v996_v28  ;;  %1349 = vmatpush.msrb.mxu0 %v3251_v13  ;;  %v976_v28 = vsel %vm973_vm11, %v975_v33, %v971_v42  ;;  %1389 = vmatpush.msrb.mxu2 %v3259_v35 }
 0x2b7   :  { %v1003_v60 = vmul.f32 2.0, %v1001_v54  ;;  %1409 = vmatpush.msrb.mxu3 %v3911_v56  ;;  %1371 = vmatpush.msrb.mxu1 %v3282_v1 }
 0x2b8   :  { %1350 = vmatpush.msrb.mxu0 %v3265_v19  ;;  %1390 = vmatpush.msrb.mxu2 %v3272_v14 }
 0x2b9   :  { %v2387_v15 = vadd.f32 -1.0, %v1003_v60  ;;  %1410 = vmatpush.msrb.mxu3 %v3274_v52  ;;  %1372 = vmatpush.msrb.mxu1 %v3914_v44 }
 0x2ba   :  { %1351 = vmatpush.msrb.mxu0 %v3280_v58  ;;  %1391 = vmatpush.msrb.mxu2 %v3286_v7 }
 0x2bb   :  { %v1005_v23 = vmul.f32 %v2387_v15, %v976_v28  ;;  %1411 = vmatpush.msrb.mxu3 %v3288_v24 }
 0x2bc   :  { %1352 = vmatpush.msrb.mxu0 %v3913_v30  ;;  %1392 = vmatpush.msrb.mxu2 %v3298_v45 }
 0x2bd   :  { %1006 = vst [vmem:[#allocation3 + $0x2] sm:$0x1] %v1005_v23  ;;  %1089 = vmatmul.f32.vlgmr.msra.gmra.mxu0 %v1005_v23  ;;  %1109 = vmatmul.f32.vlgmr.msra.gmra.mxu1 %v1005_v23 }
 0x2be   :  { %1129 = vmatmul.f32.vlgmr.msra.gmra.mxu2 %v1005_v23  ;;  %1149 = vmatmul.f32.vlgmr.msra.gmra.mxu3 %v1005_v23 }
 0x2bf   :  { %1412 = vmatpush.msrb.mxu3 %v3300_v38  ;;  %1601 = vmatpush.msra.mxu0 %v3055_v20  ;;  %v3916_v20 = vld [vmem:[#allocation12_spill] sm:$0xff] }
 0x2c0   :  { %1621 = vmatpush.msra.mxu1 %v3057_v21  ;;  %1641 = vmatpush.msra.mxu2 %v3059_v22  ;;  %v3917_v21 = vld [vmem:[#allocation13_spill] sm:$0xff]  ;;  %v3918_v22 = vld [vmem:[#allocation14_spill] sm:$0xff] }
 0x2c1   :  { %1661 = vmatpush.msra.mxu3 %v3067_v25  ;;  %1602 = vmatpush.msra.mxu0 %v3915_v6  ;;  %v3919_v25 = vld [vmem:[#allocation15_spill] sm:$0xff] }
 0x2c2   :  { %1622 = vmatpush.msra.mxu1 %v3073_v27  ;;  %1642 = vmatpush.msra.mxu2 %v3077_v31  ;;  %v3920_v27 = vld [vmem:[#allocation16_spill] sm:$0xff]  ;;  %v3921_v31 = vld [vmem:[#allocation17_spill] sm:$0xff] }
 0x2c3   :  { %1662 = vmatpush.msra.mxu3 %v3079_v32  ;;  %1603 = vmatpush.msra.mxu0 %v3083_v34  ;;  %v3922_v32 = vld [vmem:[#allocation18_spill] sm:$0xff]  ;;  %v3923_v34 = vld [vmem:[#allocation19_spill] sm:$0xff] }
 0x2c4   :  { %1623 = vmatpush.msra.mxu1 %v3085_v36  ;;  %1643 = vmatpush.msra.mxu2 %v3087_v37  ;;  %v3924_v36 = vld [vmem:[#allocation20_spill] sm:$0xff] }
 0x2c5   :  { %1663 = vmatpush.msra.mxu3 %v3091_v39  ;;  %1604 = vmatpush.msra.mxu0 %v3916_v20  ;;  %v1008_v37 = vld [vmem:[#allocation2 + $0x3] ss:$8 sm:$0xf] }
 0x2c6   :  { %1624 = vmatpush.msra.mxu1 %v3099_v43  ;;  %1644 = vmatpush.msra.mxu2 %v3917_v21  ;;  %v1154_v39 = vperm.slane %v1008_v37, 0  ;;  %v1155_v43 = vperm.slane %v1008_v37, 1  ;;  %v3927_v21 = vld [vmem:[#allocation21_spill] sm:$0xff] }
 0x2c7   :  { %1664 = vmatpush.msra.mxu3 %v3108_v9  ;;  %1605 = vmatpush.msra.mxu0 %v3110_v47 }
 0x2c8   :  { %1625 = vmatpush.msra.mxu1 %v3112_v48  ;;  %1645 = vmatpush.msra.mxu2 %v3116_v49 }
 0x2c9   :  { %1665 = vmatpush.msra.mxu3 %v3918_v22  ;;  %1606 = vmatpush.msra.mxu0 %v3123_v53 }
 0x2ca   :  { %1626 = vmatpush.msra.mxu1 %v3919_v25  ;;  %1646 = vmatpush.msra.mxu2 %v3127_v55 }
 0x2cb   :  { %1666 = vmatpush.msra.mxu3 %v3920_v27  ;;  %1607 = vmatpush.msra.mxu0 %v3921_v31 }
 0x2cc   :  { %1627 = vmatpush.msra.mxu1 %v3137_v61  ;;  %1647 = vmatpush.msra.mxu2 %v3145_v29  ;;  %v1156_v61 = vperm.slane %v1008_v37, 2 }
 0x2cd   :  { %1667 = vmatpush.msra.mxu3 %v3147_v57  ;;  %1608 = vmatpush.msra.mxu0 %v3154_v3 }
 0x2ce   :  { %1628 = vmatpush.msra.mxu1 %v3156_v4  ;;  %1648 = vmatpush.msra.mxu2 %v3170_v8 }
 0x2cf   :  { %1668 = vmatpush.msra.mxu3 %v3172_v10  ;;  %1609 = vmatpush.msra.mxu0 %v3922_v32 }
 0x2d0   :  { %1629 = vmatpush.msra.mxu1 %v3186_v16  ;;  %1649 = vmatpush.msra.mxu2 %v3923_v34 }
 0x2d1   :  { %1669 = vmatpush.msra.mxu3 %v3924_v36  ;;  %1610 = vmatpush.msra.mxu0 %v3211_v40 }
 0x2d2   :  { %1630 = vmatpush.msra.mxu1 %v3213_v41  ;;  %1650 = vmatpush.msra.mxu2 %v3220_v46 }
 0x2d3   :  { %1670 = vmatpush.msra.mxu3 %v3222_v51  ;;  %1611 = vmatpush.msra.mxu0 %v3226_v62 }
 0x2d4   :  { %1631 = vmatpush.msra.mxu1 %v3228_v18  ;;  %1651 = vmatpush.msra.mxu2 %v3232_v63 }
 0x2d5   :  { %1671 = vmatpush.msra.mxu3 %v3234_v0  ;;  %1612 = vmatpush.msra.mxu0 %v3238_v2 }
 0x2d6   :  { %1632 = vmatpush.msra.mxu1 %v3240_v5  ;;  %1652 = vmatpush.msra.mxu2 %v3245_v11  ;;  %v1157_v11 = vperm.slane %v1008_v37, 3 }
 0x2d7   :  { %1672 = vmatpush.msra.mxu3 %v3247_v12  ;;  %1613 = vmatpush.msra.mxu0 %v3251_v13 }
 0x2d8   :  { %1633 = vmatpush.msra.mxu1 %v3253_v17  ;;  %1653 = vmatpush.msra.mxu2 %v3259_v35 }
 0x2d9   :  { %1673 = vmatpush.msra.mxu3 %v3911_v56  ;;  %1614 = vmatpush.msra.mxu0 %v3265_v19 }
 0x2da   :  { %1634 = vmatpush.msra.mxu1 %v3912_v26  ;;  %1654 = vmatpush.msra.mxu2 %v3272_v14 }
 0x2db   :  { %1674 = vmatpush.msra.mxu3 %v3274_v52  ;;  %1615 = vmatpush.msra.mxu0 %v3280_v58 }
 0x2dc   :  { %1635 = vmatpush.msra.mxu1 %v3282_v1  ;;  %1655 = vmatpush.msra.mxu2 %v3286_v7 }
 0x2dd   :  { %1675 = vmatpush.msra.mxu3 %v3288_v24  ;;  %1616 = vmatpush.msra.mxu0 %v3913_v30 }
 0x2de   :  { %1636 = vmatpush.msra.mxu1 %v3914_v44  ;;  %1656 = vmatpush.msra.mxu2 %v3298_v45 }
 0x2df   :  { %1676 = vmatpush.msra.mxu3 %v3300_v38 }
 0x33a   :  { %v1090_v9 = vpop.f32.mrf.mxu0  ;;  %v1110_v47 = vpop.f32.mrf.mxu1 }
 0x33b   :  { %v1162_v48 = vadd.f32 %v1154_v39, %v1090_v9  ;;  %v1163_v49 = vadd.f32 %v1155_v43, %v1110_v47 }
 0x33d   :  { %v2388_v53 = vmul.f32 -1.442695, %v1162_v48  ;;  %v2389_v55 = vmul.f32 -1.442695, %v1163_v49 }
 0x33f   :  { %2491 = vpow2.f32 %v2388_v53 }
 0x340   :  { %2493 = vpow2.f32 %v2389_v55 }
 0x341   :  { %v1130_v29 = vpop.f32.mrf.mxu2  ;;  %v1150_v2 = vpop.f32.mrf.mxu3 }
 0x342   :  { %v1164_v57 = vadd.f32 %v1156_v61, %v1130_v29  ;;  %v1165_v17 = vadd.f32 %v1157_v11, %v1150_v2  ;;  %v1272_v2 = vld [vmem:[#allocation2 + $0x4] ss:$8 sm:$0xf] }
 0x343   :  { %v1419_v11 = vperm.slane %v1272_v2, 1 }
 0x344   :  { %v2390_v3 = vmul.f32 -1.442695, %v1164_v57  ;;  %v2391_v7 = vmul.f32 -1.442695, %v1165_v17 }
 0x345   :  { %v2492_v4 = vpop.eup %2491 }
 0x346   :  { %v2494_v8 = vpop.eup %2493  ;;  %v1178_v10 = vadd.f32 1.0, %v2492_v4  ;;  %2495 = vpow2.f32 %v2390_v3 }
 0x347   :  { %v1179_v16 = vadd.f32 1.0, %v2494_v8 }
 0x348   :  { %2497 = vrcp.f32 %v1178_v10  ;;  %vm1187_vm2 = vweird.f32 %v1178_v10  ;;  %v1193_v54 = vand.u32 2147483648, %v1178_v10  ;;  %v1191_v60 = vand.u32 2147483647, %v1178_v10 }
 0x349   :  { %2499 = vrcp.f32 %v1179_v16  ;;  %vm1202_vm14 = vweird.f32 %v1179_v16  ;;  %v1206_v58 = vand.u32 2147483647, %v1179_v16  ;;  %v1208_v1 = vand.u32 2147483648, %v1179_v16 }
 0x34a   :  { %v1194_v30 = vor.u32 1.1754944e-38, %v1193_v54  ;;  %vm1192_vm7 = vcmp.eq.f32.partialorder %v1191_v60, 8.507059e+37 }
 0x34b   :  { %v1209_v28 = vor.u32 1.1754944e-38, %v1208_v1  ;;  %vm1207_vm6 = vcmp.eq.f32.partialorder %v1206_v58, 8.507059e+37 }
 0x34c   :  { %v2496_v40 = vpop.eup %2495 }
 0x34d   :  { %v1180_v41 = vadd.f32 1.0, %v2496_v40 }
 0x34e   :  { %v2498_v46 = vpop.eup %2497 }
 0x34f   :  { %v2500_v51 = vpop.eup %2499  ;;  %2501 = vrcp.f32 %v1180_v41  ;;  %v1183_v62 = vmul.f32 %v2498_v46, %v1178_v10  ;;  %v1223_v19 = vand.u32 2147483648, %v1180_v41  ;;  %v1221_v52 = vand.u32 2147483647, %v1180_v41 }
 0x350   :  { %v1198_v18 = vmul.f32 %v2500_v51, %v1179_v16  ;;  %vm1203_vm12 = vweird.f32 %v2500_v51  ;;  %vm1188_vm15 = vweird.f32 %v2498_v46  ;;  %vm1217_vm1 = vweird.f32 %v1180_v41 }
 0x351   :  { %v1184_v0 = vsub.f32 1.0, %v1183_v62  ;;  %vm3456_vm0 = vmor %vm1202_vm14, %vm1203_vm12  ;;  %v1224_v42 = vor.u32 1.1754944e-38, %v1223_v19  ;;  %vm1222_vm4 = vcmp.eq.f32.partialorder %v1221_v52, 8.507059e+37  ;;  %2503 = vpow2.f32 %v2391_v7 }
 0x352   :  { %v1199_v63 = vsub.f32 1.0, %v1198_v18  ;;  %vm1189_vm5 = vmor %vm1187_vm2, %vm1188_vm15 }
 0x353   :  { %v1185_v24 = vmul.f32 %v2498_v46, %v1184_v0 }
 0x354   :  { %v1200_v12 = vmul.f32 %v2500_v51, %v1199_v63 }
 0x355   :  { %v2502_v5 = vpop.eup %2501  ;;  %v1186_v45 = vadd.f32 %v2498_v46, %v1185_v24 }
 0x356   :  { %v1213_v13 = vmul.f32 %v2502_v5, %v1180_v41  ;;  %v1201_v38 = vadd.f32 %v2500_v51, %v1200_v12  ;;  %vm1218_vm13 = vweird.f32 %v2502_v5 }
 0x357   :  { %vm1219_vm3 = vmor %vm1217_vm1, %vm1218_vm13  ;;  %v1190_v23 = vsel %vm1189_vm5, %v2498_v46, %v1186_v45  ;;  %v2504_v27 = vpop.eup %2503 }
 0x358   :  { %v1214_v35 = vsub.f32 1.0, %v1213_v13  ;;  %v1205_v33 = vsel %vm3456_vm0, %v2500_v51, %v1201_v38  ;;  %v1195_v20 = vsel %vm1192_vm7, %v1194_v30, %v1190_v23  ;;  %v1181_v34 = vadd.f32 1.0, %v2504_v27 }
 0x359   :  { %v1210_v44 = vsel %vm1207_vm6, %v1209_v28, %v1205_v33  ;;  %v1420_v38 = vperm.slane %v1272_v2, 2  ;;  %v1421_v30 = vperm.slane %v1272_v2, 3 }
 0x35a   :  { %v1215_v14 = vmul.f32 %v2502_v5, %v1214_v35  ;;  %v1244_v22 = vmul.f32 %v1210_v44, %v3927_v21  ;;  %v1238_v8 = vand.u32 2147483648, %v1181_v34  ;;  %vm1232_vm12 = vweird.f32 %v1181_v34 }
 0x35b   :  { %v1236_v16 = vand.u32 2147483647, %v1181_v34 }
 0x35c   :  { %v1216_v59 = vadd.f32 %v2502_v5, %v1215_v14  ;;  %v1239_v62 = vor.u32 1.1754944e-38, %v1238_v8 }
 0x35d   :  { %vm1237_vm15 = vcmp.eq.f32.partialorder %v1236_v16, 8.507059e+37 }
 0x35e   :  { %v1220_v15 = vsel %vm1219_vm3, %v2502_v5, %v1216_v59  ;;  %v1418_v5 = vperm.slane %v1272_v2, 0 }
 0x35f   :  { %v1225_v56 = vsel %vm1222_vm4, %v1224_v42, %v1220_v15 }
 0x360   :  { %v1242_v26 = vmul.f32 2.0, %v1225_v56 }
 0x362   :  { %v2392_v6 = vadd.f32 -1.0, %v1242_v26 }
 0x364   :  { %v1245_v25 = vmul.f32 %v2392_v6, %v1195_v20 }
 0x366   :  { %v3463_v31 = vadd.f32 %v1245_v25, %v1244_v22 }
 0x368   :  { %v2393_v32 = vmul.f32 -2.0, %v3463_v31 }
 0x36a   :  { %v1249_v36 = vmul.f32 1.442695, %v2393_v32 }
 0x36c   :  { %2505 = vpow2.f32 %v1249_v36 }
 0x36d   :  { %2507 = vrcp.f32 %v1181_v34 }
 0x372   :  { %v2506_v37 = vpop.eup %2505 }
 0x373   :  { %v2508_v39 = vpop.eup %2507  ;;  %v1251_v43 = vadd.f32 1.0, %v2506_v37 }
 0x374   :  { %v1228_v9 = vmul.f32 %v2508_v39, %v1181_v34  ;;  %vm1233_vm9 = vweird.f32 %v2508_v39 }
 0x375   :  { %2509 = vrcp.f32 %v1251_v43  ;;  %v1263_v61 = vand.u32 2147483648, %v1251_v43  ;;  %v1261_v57 = vand.u32 2147483647, %v1251_v43  ;;  %vm1257_vm10 = vweird.f32 %v1251_v43  ;;  %vm1234_vm14 = vmor %vm1232_vm12, %vm1233_vm9 }
 0x376   :  { %v1229_v47 = vsub.f32 1.0, %v1228_v9 }
 0x377   :  { %v1264_v10 = vor.u32 1.1754944e-38, %v1263_v61  ;;  %vm1262_vm13 = vcmp.eq.f32.partialorder %v1261_v57, 8.507059e+37 }
 0x378   :  { %v1230_v53 = vmul.f32 %v2508_v39, %v1229_v47 }
 0x37a   :  { %v1231_v3 = vadd.f32 %v2508_v39, %v1230_v53 }
 0x37b   :  { %v2510_v48 = vpop.eup %2509 }
 0x37c   :  { %v1253_v49 = vmul.f32 %v2510_v48, %v1251_v43  ;;  %vm1258_vm8 = vweird.f32 %v2510_v48  ;;  %v1235_v46 = vsel %vm1234_vm14, %v2508_v39, %v1231_v3 }
 0x37d   :  { %vm1259_vm11 = vmor %vm1257_vm10, %vm1258_vm8  ;;  %v1240_v63 = vsel %vm1237_vm15, %v1239_v62, %v1235_v46 }
 0x37e   :  { %v1254_v55 = vsub.f32 1.0, %v1253_v49 }
 0x380   :  { %v1255_v29 = vmul.f32 %v2510_v48, %v1254_v55 }
 0x382   :  { %v1256_v4 = vadd.f32 %v2510_v48, %v1255_v29 }
 0x384   :  { %v1260_v40 = vsel %vm1259_vm11, %v2510_v48, %v1256_v4 }
 0x385   :  { %v1265_v41 = vsel %vm1262_vm13, %v1264_v10, %v1260_v40 }
 0x386   :  { %v1267_v51 = vmul.f32 2.0, %v1265_v41 }
 0x388   :  { %v2394_v18 = vadd.f32 -1.0, %v1267_v51 }
 0x38a   :  { %v1269_v0 = vmul.f32 %v2394_v18, %v1240_v63 }
 0x38c   :  { %1270 = vst [vmem:[#allocation3 + $0x3] sm:$0x1] %v1269_v0  ;;  %1353 = vmatmul.f32.vlgmr.msrb.gmra.mxu0 %v1269_v0  ;;  %1373 = vmatmul.f32.vlgmr.msrb.gmra.mxu1 %v1269_v0 }
 0x38d   :  { %1393 = vmatmul.f32.vlgmr.msrb.gmra.mxu2 %v1269_v0  ;;  %1413 = vmatmul.f32.vlgmr.msrb.gmra.mxu3 %v1269_v0 }
 0x409   :  { %v1354_v12 = vpop.f32.mrf.mxu0  ;;  %v1374_v13 = vpop.f32.mrf.mxu1 }
 0x40a   :  { %v1426_v17 = vadd.f32 %v1418_v5, %v1354_v12  ;;  %v1427_v24 = vadd.f32 %v1419_v11, %v1374_v13 }
 0x40c   :  { %v2395_v35 = vmul.f32 -1.442695, %v1426_v17  ;;  %v2396_v19 = vmul.f32 -1.442695, %v1427_v24 }
 0x40e   :  { %2511 = vpow2.f32 %v2395_v35 }
 0x40f   :  { %2513 = vpow2.f32 %v2396_v19 }
 0x410   :  { %v1394_v14 = vpop.f32.mrf.mxu2  ;;  %v1414_v23 = vpop.f32.mrf.mxu3 }
 0x411   :  { %v1428_v52 = vadd.f32 %v1420_v38, %v1394_v14  ;;  %v1429_v20 = vadd.f32 %v1421_v30, %v1414_v23 }
 0x413   :  { %v2397_v58 = vmul.f32 -1.442695, %v1428_v52  ;;  %v2398_v39 = vmul.f32 -1.442695, %v1429_v20 }
 0x414   :  { %v2512_v1 = vpop.eup %2511 }
 0x415   :  { %v2514_v7 = vpop.eup %2513  ;;  %v1442_v45 = vadd.f32 1.0, %v2512_v1  ;;  %2515 = vpow2.f32 %v2397_v58 }
 0x416   :  { %v1443_v50 = vadd.f32 1.0, %v2514_v7 }
 0x417   :  { %2517 = vrcp.f32 %v1442_v45  ;;  %vm1451_vm6 = vweird.f32 %v1442_v45  ;;  %v1457_v48 = vand.u32 2147483648, %v1442_v45  ;;  %v1455_v53 = vand.u32 2147483647, %v1442_v45 }
 0x418   :  { %2519 = vrcp.f32 %v1443_v50  ;;  %vm1466_vm2 = vweird.f32 %v1443_v50  ;;  %v1470_v36 = vand.u32 2147483647, %v1443_v50  ;;  %v1472_v37 = vand.u32 2147483648, %v1443_v50 }
 0x419   :  { %v1458_v8 = vor.u32 1.1754944e-38, %v1457_v48  ;;  %vm1456_vm11 = vcmp.eq.f32.partialorder %v1455_v53, 8.507059e+37  ;;  %v3489_v53 = vld [vmem:[#allocation7 + $0x1e0] sm:$0xff] }
 0x41a   :  { %v1473_v29 = vor.u32 1.1754944e-38, %v1472_v37  ;;  %vm1471_vm10 = vcmp.eq.f32.partialorder %v1470_v36, 8.507059e+37  ;;  %1865 = vmatpush.msrb.mxu0 %v3489_v53 }
 0x41b   :  { %v2516_v59 = vpop.eup %2515 }
 0x41c   :  { %v1444_v54 = vadd.f32 1.0, %v2516_v59 }
 0x41d   :  { %v2518_v42 = vpop.eup %2517 }
 0x41e   :  { %v2520_v60 = vpop.eup %2519  ;;  %2521 = vrcp.f32 %v1444_v54  ;;  %v1447_v33 = vmul.f32 %v2518_v42, %v1442_v45  ;;  %v1487_v25 = vand.u32 2147483648, %v1444_v54  ;;  %v1485_v34 = vand.u32 2147483647, %v1444_v54 }
 0x41f   :  { %v1462_v15 = vmul.f32 %v2520_v60, %v1443_v50  ;;  %vm1467_vm0 = vweird.f32 %v2520_v60  ;;  %vm1452_vm3 = vweird.f32 %v2518_v42  ;;  %vm1481_vm5 = vweird.f32 %v1444_v54 }
 0x420   :  { %v1448_v56 = vsub.f32 1.0, %v1447_v33  ;;  %vm3466_vm4 = vmor %vm1466_vm2, %vm1467_vm0  ;;  %v1488_v49 = vor.u32 1.1754944e-38, %v1487_v25  ;;  %vm1486_vm8 = vcmp.eq.f32.partialorder %v1485_v34, 8.507059e+37  ;;  %2523 = vpow2.f32 %v2398_v39 }
 0x421   :  { %v1463_v28 = vsub.f32 1.0, %v1462_v15  ;;  %vm1453_vm9 = vmor %vm1451_vm6, %vm1452_vm3 }
 0x422   :  { %v1449_v21 = vmul.f32 %v2518_v42, %v1448_v56  ;;  %v1536_v56 = vld [vmem:[#allocation2 + $0x5] ss:$8 sm:$0xf] }
 0x423   :  { %v1464_v44 = vmul.f32 %v2520_v60, %v1463_v28  ;;  %v1682_v23 = vperm.slane %v1536_v56, 0  ;;  %v1684_v25 = vperm.slane %v1536_v56, 2 }
 0x424   :  { %v2522_v26 = vpop.eup %2521  ;;  %v1450_v43 = vadd.f32 %v2518_v42, %v1449_v21 }
 0x425   :  { %v1477_v6 = vmul.f32 %v2522_v26, %v1444_v54  ;;  %v1465_v27 = vadd.f32 %v2520_v60, %v1464_v44  ;;  %vm1482_vm1 = vweird.f32 %v2522_v26 }
 0x426   :  { %vm1483_vm7 = vmor %vm1481_vm5, %vm1482_vm1  ;;  %v1454_v3 = vsel %vm1453_vm9, %v2518_v42, %v1450_v43  ;;  %v2524_v51 = vpop.eup %2523 }
 0x427   :  { %v1478_v22 = vsub.f32 1.0, %v1477_v6  ;;  %v1469_v55 = vsel %vm3466_vm4, %v2520_v60, %v1465_v27  ;;  %v1459_v40 = vsel %vm1456_vm11, %v1458_v8, %v1454_v3  ;;  %v1445_v63 = vadd.f32 1.0, %v2524_v51  ;;  %v3501_v3 = vld [vmem:[#allocation7 + $0x1f8] sm:$0xff]  ;;  %v3507_v8 = vld [vmem:[#allocation7 + $0x1c8] sm:$0xff]  ;;  %v3517_v51 = vld [vmem:[#allocation7 + $0x1a0] sm:$0xff] }
 0x428   :  { %v1474_v10 = vsel %vm1471_vm10, %v1473_v29, %v1469_v55  ;;  %v3491_v55 = vld [vmem:[#allocation7 + $0x1e8] sm:$0xff]  ;;  %1925 = vmatpush.msrb.mxu3 %v3501_v3 }
 0x429   :  { %v1479_v32 = vmul.f32 %v2522_v26, %v1478_v22  ;;  %v1508_v41 = vmul.f32 %v1474_v10, %v3463_v31  ;;  %v1502_v1 = vand.u32 2147483648, %v1445_v63  ;;  %vm1496_vm0 = vweird.f32 %v1445_v63  ;;  %1885 = vmatpush.msrb.mxu1 %v3491_v55 }
 0x42a   :  { %v1500_v45 = vand.u32 2147483647, %v1445_v63 }
 0x42b   :  { %v1480_v47 = vadd.f32 %v2522_v26, %v1479_v32  ;;  %v1503_v60 = vor.u32 1.1754944e-38, %v1502_v1  ;;  %1886 = vmatpush.msrb.mxu1 %v3507_v8 }
 0x42c   :  { %vm1501_vm3 = vcmp.eq.f32.partialorder %v1500_v45, 8.507059e+37  ;;  %v3559_v45 = vld [vmem:[#allocation7 + $0x148] sm:$0xff] }
 0x42d   :  { %v1484_v61 = vsel %vm1483_vm7, %v2522_v26, %v1480_v47  ;;  %v1683_v26 = vperm.slane %v1536_v56, 1 }
 0x42e   :  { %v1489_v57 = vsel %vm1486_vm8, %v1488_v49, %v1484_v61  ;;  %v3493_v61 = vld [vmem:[#allocation7 + $0x1f0] sm:$0xff] }
 0x42f   :  { %v1506_v4 = vmul.f32 2.0, %v1489_v57  ;;  %1905 = vmatpush.msrb.mxu2 %v3493_v61 }
 0x431   :  { %v2399_v16 = vadd.f32 -1.0, %v1506_v4  ;;  %v3505_v4 = vld [vmem:[#allocation7 + $0x1c0] sm:$0xff] }
 0x432   :  { %1866 = vmatpush.msrb.mxu0 %v3505_v4 }
 0x433   :  { %v1509_v46 = vmul.f32 %v2399_v16, %v1459_v40  ;;  %v3511_v40 = vld [vmem:[#allocation7 + $0x1d0] sm:$0xff] }
 0x434   :  { %1906 = vmatpush.msrb.mxu2 %v3511_v40  ;;  %1867 = vmatpush.msrb.mxu0 %v3517_v51 }
 0x435   :  { %v3473_v62 = vadd.f32 %v1509_v46, %v1508_v41  ;;  %v3513_v41 = vld [vmem:[#allocation7 + $0x1d8] sm:$0xff]  ;;  %v1685_v46 = vperm.slane %v1536_v56, 3 }
 0x436   :  { %1926 = vmatpush.msrb.mxu3 %v3513_v41 }
 0x437   :  { %v2400_v18 = vmul.f32 -2.0, %v3473_v62 }
 0x439   :  { %v1513_v0 = vmul.f32 1.442695, %v2400_v18  ;;  %v3519_v18 = vld [vmem:[#allocation7 + $0x1a8] sm:$0xff] }
 0x43a   :  { %1887 = vmatpush.msrb.mxu1 %v3519_v18 }
 0x43b   :  { %2525 = vpow2.f32 %v1513_v0 }
 0x43c   :  { %2527 = vrcp.f32 %v1445_v63 }
 0x441   :  { %v2526_v2 = vpop.eup %2525 }
 0x442   :  { %v2528_v5 = vpop.eup %2527  ;;  %v1515_v11 = vadd.f32 1.0, %v2526_v2  ;;  %v3525_v2 = vld [vmem:[#allocation7 + $0x1b8] sm:$0xff] }
 0x443   :  { %v1492_v12 = vmul.f32 %v2528_v5, %v1445_v63  ;;  %vm1497_vm13 = vweird.f32 %v2528_v5  ;;  %v3521_v63 = vld [vmem:[#allocation7 + $0x1b0] sm:$0xff]  ;;  %1927 = vmatpush.msrb.mxu3 %v3525_v2 }
 0x444   :  { %2529 = vrcp.f32 %v1515_v11  ;;  %v1527_v19 = vand.u32 2147483648, %v1515_v11  ;;  %v1525_v14 = vand.u32 2147483647, %v1515_v11  ;;  %vm1521_vm14 = vweird.f32 %v1515_v11  ;;  %vm1498_vm2 = vmor %vm1496_vm0, %vm1497_vm13  ;;  %1907 = vmatpush.msrb.mxu2 %v3521_v63 }
 0x445   :  { %v1493_v13 = vsub.f32 1.0, %v1492_v12  ;;  %v3531_v12 = vld [vmem:[#allocation7 + $0x180] sm:$0xff] }
 0x446   :  { %v1528_v7 = vor.u32 1.1754944e-38, %v1527_v19  ;;  %vm1526_vm1 = vcmp.eq.f32.partialorder %v1525_v14, 8.507059e+37  ;;  %1868 = vmatpush.msrb.mxu0 %v3531_v12  ;;  %v3544_v19 = vld [vmem:[#allocation7 + $0x160] sm:$0xff]  ;;  %v3550_v14 = vld [vmem:[#allocation7 + $0x170] sm:$0xff] }
 0x447   :  { %v1494_v35 = vmul.f32 %v2528_v5, %v1493_v13  ;;  %v3533_v13 = vld [vmem:[#allocation7 + $0x188] sm:$0xff] }
 0x448   :  { %1888 = vmatpush.msrb.mxu1 %v3533_v13  ;;  %1869 = vmatpush.msrb.mxu0 %v3544_v19 }
 0x449   :  { %v1495_v52 = vadd.f32 %v2528_v5, %v1494_v35 }
 0x44a   :  { %v2530_v17 = vpop.eup %2529 }
 0x44b   :  { %v1517_v24 = vmul.f32 %v2530_v17, %v1515_v11  ;;  %vm1522_vm12 = vweird.f32 %v2530_v17  ;;  %v1499_v54 = vsel %vm1498_vm2, %v2528_v5, %v1495_v52  ;;  %v3552_v52 = vld [vmem:[#allocation7 + $0x178] sm:$0xff] }
 0x44c   :  { %vm1523_vm15 = vmor %vm1521_vm14, %vm1522_vm12  ;;  %v1504_v15 = vsel %vm1501_vm3, %v1503_v60, %v1499_v54  ;;  %v3569_v60 = vld [vmem:[#allocation7 + $0x120] sm:$0xff] }
 0x44d   :  { %v1518_v31 = vsub.f32 1.0, %v1517_v24 }
 0x44f   :  { %v1519_v38 = vmul.f32 %v2530_v17, %v1518_v31  ;;  %v3542_v31 = vld [vmem:[#allocation7 + $0x198] sm:$0xff] }
 0x450   :  { %1928 = vmatpush.msrb.mxu3 %v3542_v31 }
 0x451   :  { %v1520_v58 = vadd.f32 %v2530_v17, %v1519_v38  ;;  %v3546_v38 = vld [vmem:[#allocation7 + $0x168] sm:$0xff] }
 0x452   :  { %1889 = vmatpush.msrb.mxu1 %v3546_v38  ;;  %1929 = vmatpush.msrb.mxu3 %v3552_v52 }
 0x453   :  { %v1524_v50 = vsel %vm1523_vm15, %v2530_v17, %v1520_v58  ;;  %v3535_v17 = vld [vmem:[#allocation7 + $0x190] sm:$0xff] }
 0x454   :  { %v1529_v59 = vsel %vm1526_vm1, %v1528_v7, %v1524_v50  ;;  %1908 = vmatpush.msrb.mxu2 %v3535_v17  ;;  %v3557_v7 = vld [vmem:[#allocation7 + $0x140] sm:$0xff]  ;;  %v3561_v50 = vld [vmem:[#allocation7 + $0x150] sm:$0xff]  ;;  %1890 = vmatpush.msrb.mxu1 %v3559_v45 }
 0x455   :  { %v1531_v42 = vmul.f32 2.0, %v1529_v59  ;;  %1870 = vmatpush.msrb.mxu0 %v3557_v7 }
 0x456   :  { %1909 = vmatpush.msrb.mxu2 %v3550_v14 }
 0x457   :  { %v2401_v33 = vadd.f32 -1.0, %v1531_v42  ;;  %v3567_v42 = vld [vmem:[#allocation7 + $0x158] sm:$0xff]  ;;  %1871 = vmatpush.msrb.mxu0 %v3569_v60 }
 0x458   :  { %1910 = vmatpush.msrb.mxu2 %v3561_v50  ;;  %1930 = vmatpush.msrb.mxu3 %v3567_v42 }
 0x459   :  { %v1533_v28 = vmul.f32 %v2401_v33, %v1504_v15  ;;  %v3571_v33 = vld [vmem:[#allocation7 + $0x128] sm:$0xff] }
 0x45a   :  { %1891 = vmatpush.msrb.mxu1 %v3571_v33 }
 0x45b   :  { %1534 = vst [vmem:[#allocation3 + $0x4] sm:$0x1] %v1533_v28  ;;  %1617 = vmatmul.f32.vlgmr.msra.gmra.mxu0 %v1533_v28  ;;  %1637 = vmatmul.f32.vlgmr.msra.gmra.mxu1 %v1533_v28 }
 0x45c   :  { %1657 = vmatmul.f32.vlgmr.msra.gmra.mxu2 %v1533_v28  ;;  %1677 = vmatmul.f32.vlgmr.msra.gmra.mxu3 %v1533_v28 }
 0x4d8   :  { %v1618_v30 = vpop.f32.mrf.mxu0  ;;  %v1638_v44 = vpop.f32.mrf.mxu1 }
 0x4d9   :  { %v1690_v6 = vadd.f32 %v1682_v23, %v1618_v30  ;;  %v1691_v20 = vadd.f32 %v1683_v26, %v1638_v44  ;;  %v3579_v23 = vld [vmem:[#allocation7 + $0x130] sm:$0xff]  ;;  %v3581_v26 = vld [vmem:[#allocation7 + $0x138] sm:$0xff] }
 0x4da   :  { %1911 = vmatpush.msrb.mxu2 %v3579_v23  ;;  %1931 = vmatpush.msrb.mxu3 %v3581_v26 }
 0x4db   :  { %v2402_v21 = vmul.f32 -1.442695, %v1690_v6  ;;  %v2403_v22 = vmul.f32 -1.442695, %v1691_v20  ;;  %v3588_v6 = vld [vmem:[#allocation7 + $0x100] sm:$0xff]  ;;  %v3590_v20 = vld [vmem:[#allocation7 + $0x108] sm:$0xff] }
 0x4dc   :  { %1872 = vmatpush.msrb.mxu0 %v3588_v6  ;;  %1892 = vmatpush.msrb.mxu1 %v3590_v20 }
 0x4dd   :  { %2531 = vpow2.f32 %v2402_v21 }
 0x4de   :  { %2533 = vpow2.f32 %v2403_v22 }
 0x4df   :  { %v1658_v27 = vpop.f32.mrf.mxu2  ;;  %v1678_v16 = vpop.f32.mrf.mxu3 }
 0x4e0   :  { %v1692_v32 = vadd.f32 %v1684_v25, %v1658_v27  ;;  %v1693_v11 = vadd.f32 %v1685_v46, %v1678_v16  ;;  %v3604_v27 = vld [vmem:[#allocation7 + $0x110] sm:$0xff]  ;;  %v3633_v16 = vld [vmem:[#allocation7 + $0xf8] sm:$0xff] }
 0x4e1   :  { %1912 = vmatpush.msrb.mxu2 %v3604_v27  ;;  %v3695_v46 = vld [vmem:[#allocation7 + $0x78] sm:$0xff] }
 0x4e2   :  { %v2404_v34 = vmul.f32 -1.442695, %v1692_v32  ;;  %v2405_v54 = vmul.f32 -1.442695, %v1693_v11  ;;  %v3606_v32 = vld [vmem:[#allocation7 + $0x118] sm:$0xff]  ;;  %v3647_v11 = vld [vmem:[#allocation7 + $0xc8] sm:$0xff] }
 0x4e3   :  { %v2532_v36 = vpop.eup %2531  ;;  %1932 = vmatpush.msrb.mxu3 %v3606_v32  ;;  %3937 = vst [vmem:[#allocation23_spill] sm:$0xff] %v3695_v46 }
 0x4e4   :  { %v2534_v37 = vpop.eup %2533  ;;  %v3476_v39 = vadd.f32 1.0, %v2532_v36  ;;  %2535 = vpow2.f32 %v2404_v34  ;;  %v3681_v36 = vld [vmem:[#allocation7 + $0x98] sm:$0xff] }
 0x4e5   :  { %v3478_v43 = vadd.f32 1.0, %v2534_v37  ;;  %1933 = vmatpush.msrb.mxu3 %v3633_v16 }
 0x4e6   :  { %2537 = vrcp.f32 %v3476_v39  ;;  %vm1715_vm10 = vweird.f32 %v3476_v39  ;;  %v1721_v34 = vand.u32 2147483648, %v3476_v39 }
 0x4e7   :  { %2539 = vrcp.f32 %v3478_v43  ;;  %vm1730_vm6 = vweird.f32 %v3478_v43  ;;  %v1734_v30 = vand.u32 2147483647, %v3478_v43  ;;  %v1736_v44 = vand.u32 2147483648, %v3478_v43 }
 0x4e9   :  { %vm1735_vm14 = vcmp.eq.f32.partialorder %v1734_v30, 8.507059e+37 }
 0x4ea   :  { %v2536_v9 = vpop.eup %2535 }
 0x4eb   :  { %v3482_v47 = vadd.f32 1.0, %v2536_v9  ;;  %v3620_v9 = vld [vmem:[#allocation7 + $0xe8] sm:$0xff] }
 0x4ec   :  { %v3484_v48 = vpop.eup %2537  ;;  %1893 = vmatpush.msrb.mxu1 %v3620_v9 }
 0x4ed   :  { %v3486_v49 = vpop.eup %2539  ;;  %2541 = vrcp.f32 %v3482_v47  ;;  %v1711_v29 = vmul.f32 %v3484_v48, %v3476_v39  ;;  %v1751_v59 = vand.u32 2147483648, %v3482_v47  ;;  %v1749_v56 = vand.u32 2147483647, %v3482_v47 }
 0x4ee   :  { %v1726_v57 = vmul.f32 %v3486_v49, %v3478_v43  ;;  %vm1731_vm4 = vweird.f32 %v3486_v49  ;;  %vm1716_vm7 = vweird.f32 %v3484_v48  ;;  %vm1745_vm9 = vweird.f32 %v3482_v47  ;;  %v3618_v43 = vld [vmem:[#allocation7 + $0xe0] sm:$0xff]  ;;  %1894 = vmatpush.msrb.mxu1 %v3647_v11 }
 0x4ef   :  { %v1712_v0 = vsub.f32 1.0, %v1711_v29  ;;  %vm3596_vm8 = vmor %vm1730_vm6, %vm1731_vm4  ;;  %v1752_v37 = vor.u32 1.1754944e-38, %v1751_v59  ;;  %vm1750_vm12 = vcmp.eq.f32.partialorder %v1749_v56, 8.507059e+37  ;;  %2543 = vpow2.f32 %v2405_v54  ;;  %1873 = vmatpush.msrb.mxu0 %v3618_v43  ;;  %v3668_v56 = vld [vmem:[#allocation7 + $0xb8] sm:$0xff] }
 0x4f0   :  { %v1727_v10 = vsub.f32 1.0, %v1726_v57  ;;  %vm3639_vm13 = vmor %vm1715_vm10, %vm1716_vm7 }
 0x4f1   :  { %v1713_v58 = vmul.f32 %v3484_v48, %v1712_v0 }
 0x4f2   :  { %v1728_v24 = vmul.f32 %v3486_v49, %v1727_v10  ;;  %v3631_v10 = vld [vmem:[#allocation7 + $0xf0] sm:$0xff] }
 0x4f3   :  { %v3527_v5 = vpop.eup %2541  ;;  %v1714_v21 = vadd.f32 %v3484_v48, %v1713_v58  ;;  %v3656_v58 = vld [vmem:[#allocation7 + $0xd8] sm:$0xff]  ;;  %1913 = vmatpush.msrb.mxu2 %v3631_v10 }
 0x4f4   :  { %v1741_v35 = vmul.f32 %v3527_v5, %v3482_v47  ;;  %v1729_v15 = vadd.f32 %v3486_v49, %v1728_v24  ;;  %vm1746_vm5 = vweird.f32 %v3527_v5  ;;  %v1719_v47 = vand.u32 2147483647, %v3476_v39  ;;  %1934 = vmatpush.msrb.mxu3 %v3656_v58 }
 0x4f5   :  { %vm3612_vm11 = vmor %vm1745_vm9, %vm1746_vm5  ;;  %v1718_v24 = vsel %vm3639_vm13, %v3484_v48, %v1714_v21  ;;  %v3662_v48 = vld [vmem:[#allocation7 + $0xa8] sm:$0xff] }
 0x4f6   :  { %v1742_v1 = vsub.f32 1.0, %v1741_v35  ;;  %v1733_v29 = vsel %vm3596_vm8, %v3486_v49, %v1729_v15  ;;  %v1737_v49 = vor.u32 1.1754944e-38, %v1736_v44  ;;  %v3654_v35 = vld [vmem:[#allocation7 + $0xd0] sm:$0xff]  ;;  %v3660_v15 = vld [vmem:[#allocation7 + $0xa0] sm:$0xff]  ;;  %vm1720_vm15 = vcmp.eq.f32.partialorder %v1719_v47, 8.507059e+37  ;;  %v3674_v21 = vld [vmem:[#allocation7 + $0x88] sm:$0xff]  ;;  %1895 = vmatpush.msrb.mxu1 %v3662_v48  ;;  %1935 = vmatpush.msrb.mxu3 %v3668_v56 }
 0x4f7   :  { %1914 = vmatpush.msrb.mxu2 %v3654_v35  ;;  %v3672_v44 = vld [vmem:[#allocation7 + $0x80] sm:$0xff]  ;;  %v3687_v47 = vld [vmem:[#allocation7 + $0x68] sm:$0xff] }
 0x4f8   :  { %v1743_v28 = vmul.f32 %v3527_v5, %v1742_v1  ;;  %v1722_v1 = vor.u32 1.1754944e-38, %v1721_v34  ;;  %v1738_v59 = vsel %vm1735_vm14, %v1737_v49, %v1733_v29  ;;  %v3679_v34 = vld [vmem:[#allocation7 + $0x90] sm:$0xff]  ;;  %v2544_v29 = vpop.eup %2543  ;;  %1896 = vmatpush.msrb.mxu1 %v3674_v21  ;;  %1936 = vmatpush.msrb.mxu3 %v3681_v36  ;;  %v3699_v49 = vld [vmem:[#allocation7 + $0x40] sm:$0xff] }
 0x4f9   :  { %v1772_v22 = vmul.f32 %v1738_v59, %v3473_v62  ;;  %v3693_v62 = vld [vmem:[#allocation7 + $0x70] sm:$0xff]  ;;  %v3710_v59 = vadd.f32 1.0, %v2544_v29  ;;  %v3726_v29 = vld [vmem:[#allocation7] sm:$0xff] }
 0x4fa   :  { %v1744_v25 = vadd.f32 %v3527_v5, %v1743_v28  ;;  %v3666_v28 = vld [vmem:[#allocation7 + $0xb0] sm:$0xff]  ;;  %v1723_v30 = vsel %vm1720_vm15, %v1722_v1, %v1718_v24  ;;  %1897 = vmatpush.msrb.mxu1 %v3687_v47  ;;  %v3708_v1 = vld [vmem:[#allocation7 + $0x58] sm:$0xff]  ;;  %1937 = vmatpush.msrb.mxu3 %v3695_v46  ;;  %3939 = vst [vmem:[#allocation25_spill] sm:$0xff] %v3726_v29  ;;  %v3728_v46 = vld [vmem:[#allocation7 + $0x8] sm:$0xff] }
 0x4fb   :  { %1915 = vmatpush.msrb.mxu2 %v3666_v28  ;;  %3940 = vst [vmem:[#allocation11_spill] sm:$0xff] %v3728_v46  ;;  %vm1760_vm4 = vweird.f32 %v3710_v59 }
 0x4fc   :  { %v1748_v57 = vsel %vm3612_vm11, %v3527_v5, %v1744_v25  ;;  %v3645_v5 = vld [vmem:[#allocation7 + $0xc0] sm:$0xff]  ;;  %1938 = vmatpush.msrb.mxu3 %v3708_v1 }
 0x4fd   :  { %v1753_v0 = vsel %vm1750_vm12, %v1752_v37, %v1748_v57  ;;  %1874 = vmatpush.msrb.mxu0 %v3645_v5  ;;  %v3685_v37 = vld [vmem:[#allocation7 + $0x60] sm:$0xff]  ;;  %1916 = vmatpush.msrb.mxu2 %v3679_v34 }
 0x4fe   :  { %v1770_v39 = vmul.f32 2.0, %v1753_v0  ;;  %v3701_v0 = vld [vmem:[#allocation7 + $0x48] sm:$0xff] }
 0x4ff   :  { %1875 = vmatpush.msrb.mxu0 %v3660_v15  ;;  %3938 = vst [vmem:[#allocation24_spill] sm:$0xff] %v3701_v0  ;;  %1917 = vmatpush.msrb.mxu2 %v3693_v62 }
 0x500   :  { %v2406_v54 = vadd.f32 -1.0, %v1770_v39  ;;  %v3706_v39 = vld [vmem:[#allocation7 + $0x50] sm:$0xff]  ;;  %1898 = vmatpush.msrb.mxu1 %v3701_v0  ;;  %v3734_v0 = vld [vmem:[#allocation7 + $0x18] sm:$0xff] }
 0x501   :  { %1876 = vmatpush.msrb.mxu0 %v3672_v44  ;;  %1918 = vmatpush.msrb.mxu2 %v3706_v39 }
 0x502   :  { %v1773_v25 = vmul.f32 %v2406_v54, %v1723_v30  ;;  %v3714_v54 = vld [vmem:[#allocation7 + $0x20] sm:$0xff]  ;;  %v3716_v30 = vld [vmem:[#allocation7 + $0x28] sm:$0xff] }
 0x503   :  { %1877 = vmatpush.msrb.mxu0 %v3685_v37  ;;  %1899 = vmatpush.msrb.mxu1 %v3716_v30 }
 0x504   :  { %v3689_v57 = vadd.f32 %v1773_v25, %v1772_v22  ;;  %v3720_v25 = vld [vmem:[#allocation7 + $0x30] sm:$0xff] }
 0x505   :  { %1878 = vmatpush.msrb.mxu0 %v3699_v49  ;;  %1919 = vmatpush.msrb.mxu2 %v3720_v25 }
 0x506   :  { %3936 = vst [vmem:[#allocation22_spill] sm:$0xff] %v3689_v57  ;;  %v2407_v24 = vmul.f32 -2.0, %v3689_v57  ;;  %v3722_v57 = vld [vmem:[#allocation7 + $0x38] sm:$0xff]  ;;  %1900 = vmatpush.msrb.mxu1 %v3728_v46 }
 0x507   :  { %1879 = vmatpush.msrb.mxu0 %v3714_v54  ;;  %1939 = vmatpush.msrb.mxu3 %v3722_v57 }
 0x508   :  { %v1777_v22 = vmul.f32 1.442695, %v2407_v24  ;;  %v3732_v24 = vld [vmem:[#allocation7 + $0x10] sm:$0xff]  ;;  %2149 = vmatpush.msra.mxu1 %v3491_v55 }
 0x509   :  { %1880 = vmatpush.msrb.mxu0 %v3726_v29  ;;  %1920 = vmatpush.msrb.mxu2 %v3732_v24 }
 0x50a   :  { %2545 = vpow2.f32 %v1777_v22  ;;  %1940 = vmatpush.msrb.mxu3 %v3734_v0  ;;  %2150 = vmatpush.msra.mxu1 %v3507_v8 }
 0x50b   :  { %2547 = vrcp.f32 %v3710_v59  ;;  %2129 = vmatpush.msra.mxu0 %v3489_v53  ;;  %2169 = vmatpush.msra.mxu2 %v3493_v61 }
 0x50c   :  { %2189 = vmatpush.msra.mxu3 %v3501_v3  ;;  %2151 = vmatpush.msra.mxu1 %v3519_v18 }
 0x50d   :  { %2130 = vmatpush.msra.mxu0 %v3505_v4  ;;  %2170 = vmatpush.msra.mxu2 %v3511_v40 }
 0x50e   :  { %2190 = vmatpush.msra.mxu3 %v3513_v41  ;;  %2152 = vmatpush.msra.mxu1 %v3533_v13  ;;  %v1764_v13 = vand.u32 2147483647, %v3710_v59 }
 0x50f   :  { %2131 = vmatpush.msra.mxu0 %v3517_v51  ;;  %2171 = vmatpush.msra.mxu2 %v3521_v63 }
 0x510   :  { %v2546_v22 = vpop.eup %2545  ;;  %2191 = vmatpush.msra.mxu3 %v3525_v2  ;;  %2153 = vmatpush.msra.mxu1 %v3546_v38  ;;  %v1766_v2 = vand.u32 2147483648, %v3710_v59  ;;  %vm1765_vm7 = vcmp.eq.f32.partialorder %v1764_v13, 8.507059e+37 }
 0x511   :  { %v3749_v29 = vpop.eup %2547  ;;  %v1779_v46 = vadd.f32 1.0, %v2546_v22  ;;  %2132 = vmatpush.msra.mxu0 %v3531_v12  ;;  %2172 = vmatpush.msra.mxu2 %v3535_v17 }
 0x512   :  { %v1756_v53 = vmul.f32 %v3749_v29, %v3710_v59  ;;  %2192 = vmatpush.msra.mxu3 %v3542_v31  ;;  %2154 = vmatpush.msra.mxu1 %v3559_v45  ;;  %vm1761_vm1 = vweird.f32 %v3749_v29 }
 0x513   :  { %2549 = vrcp.f32 %v1779_v46  ;;  %2133 = vmatpush.msra.mxu0 %v3544_v19  ;;  %2173 = vmatpush.msra.mxu2 %v3550_v14  ;;  %v1791_v40 = vand.u32 2147483648, %v1779_v46  ;;  %v1789_v51 = vand.u32 2147483647, %v1779_v46  ;;  %vm1785_vm2 = vweird.f32 %v1779_v46  ;;  %vm3797_vm6 = vmor %vm1760_vm4, %vm1761_vm1 }
 0x514   :  { %2193 = vmatpush.msra.mxu3 %v3552_v52  ;;  %v1757_v55 = vsub.f32 1.0, %v1756_v53  ;;  %2155 = vmatpush.msra.mxu1 %v3571_v33  ;;  %v1767_v52 = vor.u32 1.1754944e-38, %v1766_v2  ;;  %v3945_v33 = vld [vmem:[#allocation25_spill] sm:$0xff] }
 0x515   :  { %2134 = vmatpush.msra.mxu0 %v3557_v7  ;;  %2174 = vmatpush.msra.mxu2 %v3561_v50  ;;  %v1792_v12 = vor.u32 1.1754944e-38, %v1791_v40  ;;  %vm1790_vm5 = vcmp.eq.f32.partialorder %v1789_v51, 8.507059e+37  ;;  %v3943_v50 = vld [vmem:[#allocation23_spill] sm:$0xff] }
 0x516   :  { %2194 = vmatpush.msra.mxu3 %v3567_v42  ;;  %v1758_v4 = vmul.f32 %v3749_v29, %v1757_v55  ;;  %2156 = vmatpush.msra.mxu1 %v3590_v20 }
 0x517   :  { %2135 = vmatpush.msra.mxu0 %v3569_v60  ;;  %2175 = vmatpush.msra.mxu2 %v3579_v23  ;;  %v3944_v60 = vld [vmem:[#allocation24_spill] sm:$0xff]  ;;  %v3946_v23 = vld [vmem:[#allocation11_spill] sm:$0xff] }
 0x518   :  { %2195 = vmatpush.msra.mxu3 %v3581_v26  ;;  %2157 = vmatpush.msra.mxu1 %v3620_v9  ;;  %v1759_v18 = vadd.f32 %v3749_v29, %v1758_v4  ;;  %v1800_v26 = vld [vmem:[#allocation2 + $0x6] ss:$8 sm:$0xf] }
 0x519   :  { %v2550_v61 = vpop.eup %2549  ;;  %2136 = vmatpush.msra.mxu0 %v3588_v6  ;;  %2176 = vmatpush.msra.mxu2 %v3604_v27  ;;  %v1946_v6 = vperm.slane %v1800_v26, 0  ;;  %v1947_v20 = vperm.slane %v1800_v26, 1 }
 0x51a   :  { %v1781_v3 = vmul.f32 %v2550_v61, %v1779_v46  ;;  %2196 = vmatpush.msra.mxu3 %v3606_v32  ;;  %vm1786_vm0 = vweird.f32 %v2550_v61  ;;  %2158 = vmatpush.msra.mxu1 %v3647_v11  ;;  %v1763_v38 = vsel %vm3797_vm6, %v3749_v29, %v1759_v18 }
 0x51b   :  { %2137 = vmatpush.msra.mxu0 %v3618_v43  ;;  %2177 = vmatpush.msra.mxu2 %v3631_v10  ;;  %vm1787_vm3 = vmor %vm1785_vm2, %vm1786_vm0  ;;  %v1768_v45 = vsel %vm1765_vm7, %v1767_v52, %v1763_v38  ;;  %v3949_v52 = vld [vmem:[#allocation22_spill] sm:$0xff] }
 0x51c   :  { %v1782_v8 = vsub.f32 1.0, %v1781_v3  ;;  %2197 = vmatpush.msra.mxu3 %v3633_v16  ;;  %2159 = vmatpush.msra.mxu1 %v3662_v48 }
 0x51d   :  { %2138 = vmatpush.msra.mxu0 %v3645_v5  ;;  %2178 = vmatpush.msra.mxu2 %v3654_v35  ;;  %v1948_v5 = vperm.slane %v1800_v26, 2 }
 0x51e   :  { %v1783_v41 = vmul.f32 %v2550_v61, %v1782_v8  ;;  %2198 = vmatpush.msra.mxu3 %v3656_v58  ;;  %2160 = vmatpush.msra.mxu1 %v3674_v21 }
 0x51f   :  { %2139 = vmatpush.msra.mxu0 %v3660_v15  ;;  %2179 = vmatpush.msra.mxu2 %v3666_v28 }
 0x520   :  { %v1784_v63 = vadd.f32 %v2550_v61, %v1783_v41  ;;  %2199 = vmatpush.msra.mxu3 %v3668_v56  ;;  %2161 = vmatpush.msra.mxu1 %v3687_v47 }
 0x521   :  { %2140 = vmatpush.msra.mxu0 %v3672_v44  ;;  %2180 = vmatpush.msra.mxu2 %v3679_v34 }
 0x522   :  { %v1788_v17 = vsel %vm1787_vm3, %v2550_v61, %v1784_v63  ;;  %2200 = vmatpush.msra.mxu3 %v3681_v36  ;;  %2162 = vmatpush.msra.mxu1 %v3944_v60 }
 0x523   :  { %v1793_v19 = vsel %vm1790_vm5, %v1792_v12, %v1788_v17  ;;  %2141 = vmatpush.msra.mxu0 %v3685_v37  ;;  %2181 = vmatpush.msra.mxu2 %v3693_v62 }
 0x524   :  { %v1795_v14 = vmul.f32 2.0, %v1793_v19  ;;  %2201 = vmatpush.msra.mxu3 %v3943_v50  ;;  %2163 = vmatpush.msra.mxu1 %v3716_v30 }
 0x525   :  { %2142 = vmatpush.msra.mxu0 %v3699_v49  ;;  %2182 = vmatpush.msra.mxu2 %v3706_v39 }
 0x526   :  { %v2408_v7 = vadd.f32 -1.0, %v1795_v14  ;;  %2202 = vmatpush.msra.mxu3 %v3708_v1  ;;  %2164 = vmatpush.msra.mxu1 %v3946_v23 }
 0x527   :  { %2143 = vmatpush.msra.mxu0 %v3714_v54  ;;  %2183 = vmatpush.msra.mxu2 %v3720_v25 }
 0x528   :  { %v1797_v42 = vmul.f32 %v2408_v7, %v1768_v45  ;;  %2203 = vmatpush.msra.mxu3 %v3722_v57 }
 0x529   :  { %2144 = vmatpush.msra.mxu0 %v3945_v33  ;;  %2184 = vmatpush.msra.mxu2 %v3732_v24 }
 0x52a   :  { %1798 = vst [vmem:[#allocation3 + $0x5] sm:$0x1] %v1797_v42  ;;  %1881 = vmatmul.f32.vlgmr.msrb.gmra.mxu0 %v1797_v42  ;;  %1901 = vmatmul.f32.vlgmr.msrb.gmra.mxu1 %v1797_v42 }
 0x52b   :  { %1921 = vmatmul.f32.vlgmr.msrb.gmra.mxu2 %v1797_v42  ;;  %1941 = vmatmul.f32.vlgmr.msrb.gmra.mxu3 %v1797_v42 }
 0x52c   :  { %2204 = vmatpush.msra.mxu3 %v3734_v0  ;;  %v1949_v0 = vperm.slane %v1800_v26, 3 }
 0x5a7   :  { %v1882_v27 = vpop.f32.mrf.mxu0  ;;  %v1902_v32 = vpop.f32.mrf.mxu1 }
 0x5a8   :  { %v1954_v43 = vadd.f32 %v1946_v6, %v1882_v27  ;;  %v1955_v9 = vadd.f32 %v1947_v20, %v1902_v32 }
 0x5aa   :  { %v2409_v10 = vmul.f32 -1.442695, %v1954_v43  ;;  %v2410_v16 = vmul.f32 -1.442695, %v1955_v9 }
 0x5ac   :  { %2551 = vpow2.f32 %v2409_v10 }
 0x5ad   :  { %2553 = vpow2.f32 %v2410_v16 }
 0x5ae   :  { %v1922_v11 = vpop.f32.mrf.mxu2  ;;  %v1942_v46 = vpop.f32.mrf.mxu3 }
 0x5af   :  { %v1956_v35 = vadd.f32 %v1948_v5, %v1922_v11  ;;  %v1957_v59 = vadd.f32 %v1949_v0, %v1942_v46  ;;  %v2064_v46 = vld [vmem:[#allocation2 + $0x7] ss:$8 sm:$0xf] }
 0x5b0   :  { %v2211_v0 = vperm.slane %v2064_v46, 1 }
 0x5b1   :  { %v2411_v58 = vmul.f32 -1.442695, %v1956_v35  ;;  %v2412_v61 = vmul.f32 -1.442695, %v1957_v59 }
 0x5b2   :  { %v2552_v15 = vpop.eup %2551 }
 0x5b3   :  { %v2554_v48 = vpop.eup %2553  ;;  %v1970_v28 = vadd.f32 1.0, %v2552_v15  ;;  %2555 = vpow2.f32 %v2411_v58 }
 0x5b4   :  { %v1971_v56 = vadd.f32 1.0, %v2554_v48 }
 0x5b5   :  { %2557 = vrcp.f32 %v1970_v28  ;;  %vm1979_vm14 = vweird.f32 %v1970_v28  ;;  %v1985_v40 = vand.u32 2147483648, %v1970_v28  ;;  %v1983_v51 = vand.u32 2147483647, %v1970_v28 }
 0x5b6   :  { %2559 = vrcp.f32 %v1971_v56  ;;  %vm1994_vm10 = vweird.f32 %v1971_v56  ;;  %v1998_v53 = vand.u32 2147483647, %v1971_v56  ;;  %v2000_v55 = vand.u32 2147483648, %v1971_v56 }
 0x5b7   :  { %v1986_v31 = vor.u32 1.1754944e-38, %v1985_v40  ;;  %vm1984_vm3 = vcmp.eq.f32.partialorder %v1983_v51, 8.507059e+37 }
 0x5b8   :  { %v2001_v2 = vor.u32 1.1754944e-38, %v2000_v55  ;;  %vm1999_vm2 = vcmp.eq.f32.partialorder %v1998_v53, 8.507059e+37 }
 0x5b9   :  { %v2556_v44 = vpop.eup %2555 }
 0x5ba   :  { %v1972_v21 = vadd.f32 1.0, %v2556_v44 }
 0x5bb   :  { %v2558_v34 = vpop.eup %2557 }
 0x5bc   :  { %v2560_v36 = vpop.eup %2559  ;;  %2561 = vrcp.f32 %v1972_v21  ;;  %v1975_v37 = vmul.f32 %v2558_v34, %v1970_v28  ;;  %v2015_v25 = vand.u32 2147483648, %v1972_v21  ;;  %v2013_v22 = vand.u32 2147483647, %v1972_v21 }
 0x5bd   :  { %v1990_v47 = vmul.f32 %v2560_v36, %v1971_v56  ;;  %vm1995_vm8 = vweird.f32 %v2560_v36  ;;  %vm1980_vm11 = vweird.f32 %v2558_v34  ;;  %vm2009_vm13 = vweird.f32 %v1972_v21 }
 0x5be   :  { %v1976_v62 = vsub.f32 1.0, %v1975_v37  ;;  %vm3826_vm12 = vmor %vm1994_vm10, %vm1995_vm8  ;;  %v2016_v41 = vor.u32 1.1754944e-38, %v2015_v25  ;;  %vm2014_vm0 = vcmp.eq.f32.partialorder %v2013_v22, 8.507059e+37  ;;  %2563 = vpow2.f32 %v2412_v61 }
 0x5bf   :  { %v1991_v57 = vsub.f32 1.0, %v1990_v47  ;;  %vm1981_vm1 = vmor %vm1979_vm14, %vm1980_vm11 }
 0x5c0   :  { %v1977_v54 = vmul.f32 %v2558_v34, %v1976_v62 }
 0x5c1   :  { %v1992_v39 = vmul.f32 %v2560_v36, %v1991_v57 }
 0x5c2   :  { %v2562_v49 = vpop.eup %2561  ;;  %v1978_v3 = vadd.f32 %v2558_v34, %v1977_v54 }
 0x5c3   :  { %v2005_v1 = vmul.f32 %v2562_v49, %v1972_v21  ;;  %v1993_v29 = vadd.f32 %v2560_v36, %v1992_v39  ;;  %vm2010_vm9 = vweird.f32 %v2562_v49 }
 0x5c4   :  { %vm2011_vm15 = vmor %vm2009_vm13, %vm2010_vm9  ;;  %v1982_v13 = vsel %vm1981_vm1, %v2558_v34, %v1978_v3  ;;  %v2564_v50 = vpop.eup %2563 }
 0x5c5   :  { %v2006_v30 = vsub.f32 1.0, %v2005_v1  ;;  %v1997_v18 = vsel %vm3826_vm12, %v2560_v36, %v1993_v29  ;;  %v1987_v14 = vsel %vm1984_vm3, %v1986_v31, %v1982_v13  ;;  %v1973_v33 = vadd.f32 1.0, %v2564_v50 }
 0x5c6   :  { %v2002_v19 = vsel %vm1999_vm2, %v2001_v2, %v1997_v18  ;;  %v2212_v29 = vperm.slane %v2064_v46, 2  ;;  %v2213_v31 = vperm.slane %v2064_v46, 3 }
 0x5c7   :  { %v2007_v24 = vmul.f32 %v2562_v49, %v2006_v30  ;;  %v2036_v7 = vmul.f32 %v2002_v19, %v3949_v52  ;;  %v2030_v48 = vand.u32 2147483648, %v1973_v33  ;;  %vm2024_vm8 = vweird.f32 %v1973_v33 }
 0x5c8   :  { %v2028_v56 = vand.u32 2147483647, %v1973_v33 }
 0x5c9   :  { %v2008_v8 = vadd.f32 %v2562_v49, %v2007_v24  ;;  %v2031_v37 = vor.u32 1.1754944e-38, %v2030_v48 }
 0x5ca   :  { %vm2029_vm11 = vcmp.eq.f32.partialorder %v2028_v56, 8.507059e+37 }
 0x5cb   :  { %v2012_v63 = vsel %vm2011_vm15, %v2562_v49, %v2008_v8  ;;  %v2210_v49 = vperm.slane %v2064_v46, 0 }
 0x5cc   :  { %v2017_v12 = vsel %vm2014_vm0, %v2016_v41, %v2012_v63 }
 0x5cd   :  { %v2034_v17 = vmul.f32 2.0, %v2017_v12 }
 0x5cf   :  { %v2413_v38 = vadd.f32 -1.0, %v2034_v17 }
 0x5d1   :  { %v2037_v45 = vmul.f32 %v2413_v38, %v1987_v14 }
 0x5d3   :  { %v3833_v42 = vadd.f32 %v2037_v45, %v2036_v7 }
 0x5d5   :  { %v2414_v60 = vmul.f32 -2.0, %v3833_v42 }
 0x5d7   :  { %v2041_v23 = vmul.f32 1.442695, %v2414_v60 }
 0x5d9   :  { %2565 = vpow2.f32 %v2041_v23 }
 0x5da   :  { %2567 = vrcp.f32 %v1973_v33 }
 0x5df   :  { %v2566_v26 = vpop.eup %2565 }
 0x5e0   :  { %v2568_v6 = vpop.eup %2567  ;;  %v2043_v20 = vadd.f32 1.0, %v2566_v26 }
 0x5e1   :  { %v2020_v27 = vmul.f32 %v2568_v6, %v1973_v33  ;;  %vm2025_vm5 = vweird.f32 %v2568_v6 }
 0x5e2   :  { %2569 = vrcp.f32 %v2043_v20  ;;  %v2055_v5 = vand.u32 2147483648, %v2043_v20  ;;  %v2053_v35 = vand.u32 2147483647, %v2043_v20  ;;  %vm2049_vm6 = vweird.f32 %v2043_v20  ;;  %vm2026_vm10 = vmor %vm2024_vm8, %vm2025_vm5 }
 0x5e3   :  { %v2021_v32 = vsub.f32 1.0, %v2020_v27 }
 0x5e4   :  { %v2056_v28 = vor.u32 1.1754944e-38, %v2055_v5  ;;  %vm2054_vm9 = vcmp.eq.f32.partialorder %v2053_v35, 8.507059e+37 }
 0x5e5   :  { %v2022_v10 = vmul.f32 %v2568_v6, %v2021_v32 }
 0x5e7   :  { %v2023_v58 = vadd.f32 %v2568_v6, %v2022_v10 }
 0x5e8   :  { %v2570_v43 = vpop.eup %2569 }
 0x5e9   :  { %v2045_v9 = vmul.f32 %v2570_v43, %v2043_v20  ;;  %vm2050_vm4 = vweird.f32 %v2570_v43  ;;  %v2027_v34 = vsel %vm2026_vm10, %v2568_v6, %v2023_v58 }
 0x5ea   :  { %vm2051_vm7 = vmor %vm2049_vm6, %vm2050_vm4  ;;  %v2032_v57 = vsel %vm2029_vm11, %v2031_v37, %v2027_v34 }
 0x5eb   :  { %v2046_v16 = vsub.f32 1.0, %v2045_v9 }
 0x5ed   :  { %v2047_v11 = vmul.f32 %v2570_v43, %v2046_v16 }
 0x5ef   :  { %v2048_v15 = vadd.f32 %v2570_v43, %v2047_v11 }
 0x5f1   :  { %v2052_v44 = vsel %vm2051_vm7, %v2570_v43, %v2048_v15 }
 0x5f2   :  { %v2057_v21 = vsel %vm2054_vm9, %v2056_v28, %v2052_v44 }
 0x5f3   :  { %v2059_v36 = vmul.f32 2.0, %v2057_v21 }
 0x5f5   :  { %v2415_v47 = vadd.f32 -1.0, %v2059_v36 }
 0x5f7   :  { %v2061_v62 = vmul.f32 %v2415_v47, %v2032_v57 }
 0x5f9   :  { %2062 = vst [vmem:[#allocation3 + $0x6] sm:$0x1] %v2061_v62  ;;  %2145 = vmatmul.f32.vlgmr.msra.gmra.mxu0 %v2061_v62  ;;  %2165 = vmatmul.f32.vlgmr.msra.gmra.mxu1 %v2061_v62 }
 0x5fa   :  { %2185 = vmatmul.f32.vlgmr.msra.gmra.mxu2 %v2061_v62  ;;  %2205 = vmatmul.f32.vlgmr.msra.gmra.mxu3 %v2061_v62 }
 0x676   :  { %v2146_v39 = vpop.f32.mrf.mxu0  ;;  %v2166_v1 = vpop.f32.mrf.mxu1 }
 0x677   :  { %v2218_v59 = vadd.f32 %v2210_v49, %v2146_v39  ;;  %v2219_v54 = vadd.f32 %v2211_v0, %v2166_v1 }
 0x679   :  { %v2416_v30 = vmul.f32 -1.442695, %v2218_v59  ;;  %v2417_v25 = vmul.f32 -1.442695, %v2219_v54 }
 0x67b   :  { %2571 = vpow2.f32 %v2416_v30 }
 0x67c   :  { %2573 = vpow2.f32 %v2417_v25 }
 0x67d   :  { %v2186_v24 = vpop.f32.mrf.mxu2  ;;  %v2206_v13 = vpop.f32.mrf.mxu3 }
 0x67e   :  { %v2220_v22 = vadd.f32 %v2212_v29, %v2186_v24  ;;  %v2221_v14 = vadd.f32 %v2213_v31, %v2206_v13  ;;  %v2430_v31 = vld [vmem:[#allocation4] ss:$0 sm:$0xff] }
 0x680   :  { %v2418_v53 = vmul.f32 -1.442695, %v2220_v22  ;;  %v2419_v6 = vmul.f32 -1.442695, %v2221_v14 }
 0x681   :  { %v2572_v55 = vpop.eup %2571 }
 0x682   :  { %v2574_v61 = vpop.eup %2573  ;;  %v2234_v3 = vadd.f32 1.0, %v2572_v55  ;;  %2575 = vpow2.f32 %v2418_v53 }
 0x683   :  { %v2235_v4 = vadd.f32 1.0, %v2574_v61 }
 0x684   :  { %2577 = vrcp.f32 %v2234_v3  ;;  %vm2243_vm2 = vweird.f32 %v2234_v3  ;;  %v2249_v43 = vand.u32 2147483648, %v2234_v3  ;;  %v2247_v10 = vand.u32 2147483647, %v2234_v3 }
 0x685   :  { %2579 = vrcp.f32 %v2235_v4  ;;  %vm2258_vm14 = vweird.f32 %v2235_v4  ;;  %v2262_v23 = vand.u32 2147483647, %v2235_v4  ;;  %v2264_v26 = vand.u32 2147483648, %v2235_v4 }
 0x686   :  { %v2250_v48 = vor.u32 1.1754944e-38, %v2249_v43  ;;  %vm2248_vm7 = vcmp.eq.f32.partialorder %v2247_v10, 8.507059e+37 }
 0x687   :  { %v2265_v11 = vor.u32 1.1754944e-38, %v2264_v26  ;;  %vm2263_vm6 = vcmp.eq.f32.partialorder %v2262_v23, 8.507059e+37 }
 0x688   :  { %v2576_v8 = vpop.eup %2575 }
 0x689   :  { %v2236_v40 = vadd.f32 1.0, %v2576_v8 }
 0x68a   :  { %v2578_v41 = vpop.eup %2577 }
 0x68b   :  { %v2580_v51 = vpop.eup %2579  ;;  %2581 = vrcp.f32 %v2236_v40  ;;  %v2239_v18 = vmul.f32 %v2578_v41, %v2234_v3  ;;  %v2279_v45 = vand.u32 2147483648, %v2236_v40  ;;  %v2277_v33 = vand.u32 2147483647, %v2236_v40 }
 0x68c   :  { %v2254_v63 = vmul.f32 %v2580_v51, %v2235_v4  ;;  %vm2259_vm12 = vweird.f32 %v2580_v51  ;;  %vm2244_vm15 = vweird.f32 %v2578_v41  ;;  %vm2273_vm1 = vweird.f32 %v2236_v40 }
 0x68d   :  { %v2240_v12 = vsub.f32 1.0, %v2239_v18  ;;  %vm3836_vm0 = vmor %vm2258_vm14, %vm2259_vm12  ;;  %v2280_v9 = vor.u32 1.1754944e-38, %v2279_v45  ;;  %vm2278_vm4 = vcmp.eq.f32.partialorder %v2277_v33, 8.507059e+37  ;;  %2583 = vpow2.f32 %v2419_v6 }
 0x68e   :  { %v2255_v2 = vsub.f32 1.0, %v2254_v63  ;;  %vm2245_vm5 = vmor %vm2243_vm2, %vm2244_vm15 }
 0x68f   :  { %v2241_v52 = vmul.f32 %v2578_v41, %v2240_v12  ;;  %v2429_v12 = vld [vmem:[%s3853_s4] ss:$0 sm:$0xff] }
 0x690   :  { %v2256_v19 = vmul.f32 %v2580_v51, %v2255_v2 }
 0x691   :  { %v2582_v17 = vpop.eup %2581  ;;  %v2242_v20 = vadd.f32 %v2578_v41, %v2241_v52 }
 0x692   :  { %v2269_v38 = vmul.f32 %v2582_v17, %v2236_v40  ;;  %v2257_v50 = vadd.f32 %v2580_v51, %v2256_v19  ;;  %vm2274_vm13 = vweird.f32 %v2582_v17 }
 0x693   :  { %vm2275_vm3 = vmor %vm2273_vm1, %vm2274_vm13  ;;  %v2246_v58 = vsel %vm2245_vm5, %v2578_v41, %v2242_v20  ;;  %v2584_v36 = vpop.eup %2583 }
 0x694   :  { %v2270_v7 = vsub.f32 1.0, %v2269_v38  ;;  %v2261_v16 = vsel %vm3836_vm0, %v2580_v51, %v2257_v50  ;;  %v2251_v44 = vsel %vm2248_vm7, %v2250_v48, %v2246_v58  ;;  %v2237_v57 = vadd.f32 1.0, %v2584_v36 }
 0x695   :  { %v2266_v28 = vsel %vm2263_vm6, %v2265_v11, %v2261_v16 }
 0x696   :  { %v2271_v60 = vmul.f32 %v2582_v17, %v2270_v7  ;;  %v2300_v21 = vmul.f32 %v2266_v28, %v3833_v42  ;;  %v2294_v55 = vand.u32 2147483648, %v2237_v57  ;;  %vm2288_vm12 = vweird.f32 %v2237_v57 }
 0x697   :  { %v2292_v3 = vand.u32 2147483647, %v2237_v57 }
 0x698   :  { %v2272_v32 = vadd.f32 %v2582_v17, %v2271_v60  ;;  %v2295_v51 = vor.u32 1.1754944e-38, %v2294_v55 }
 0x699   :  { %vm2293_vm15 = vcmp.eq.f32.partialorder %v2292_v3, 8.507059e+37 }
 0x69a   :  { %v2276_v5 = vsel %vm2275_vm3, %v2582_v17, %v2272_v32  ;;  %vm2359_vm3 = vcmask 7168  }
 0x69b   :  { %v2281_v35 = vsel %vm2278_vm4, %v2280_v9, %v2276_v5 }
 0x69c   :  { %v2298_v15 = vmul.f32 2.0, %v2281_v35 }
 0x69e   :  { %v2420_v56 = vadd.f32 -1.0, %v2298_v15 }
 0x6a0   :  { %v2301_v34 = vmul.f32 %v2420_v56, %v2251_v44 }
 0x6a2   :  { %v2302_v37 = vadd.f32 %v2301_v34, %v2300_v21 }
 0x6a4   :  { %v2421_v47 = vmul.f32 -2.0, %v2302_v37 }
 0x6a6   :  { %v2305_v62 = vmul.f32 1.442695, %v2421_v47 }
 0x6a8   :  { %2585 = vpow2.f32 %v2305_v62 }
 0x6a9   :  { %2587 = vrcp.f32 %v2237_v57 }
 0x6ae   :  { %v2586_v46 = vpop.eup %2585 }
 0x6af   :  { %v2588_v49 = vpop.eup %2587  ;;  %v2307_v0 = vadd.f32 1.0, %v2586_v46 }
 0x6b0   :  { %v2284_v39 = vmul.f32 %v2588_v49, %v2237_v57  ;;  %vm2289_vm9 = vweird.f32 %v2588_v49 }
 0x6b1   :  { %2589 = vrcp.f32 %v2307_v0  ;;  %v2319_v29 = vand.u32 2147483648, %v2307_v0  ;;  %v2317_v24 = vand.u32 2147483647, %v2307_v0  ;;  %vm2313_vm10 = vweird.f32 %v2307_v0  ;;  %vm2290_vm14 = vmor %vm2288_vm12, %vm2289_vm9 }
 0x6b2   :  { %v2285_v1 = vsub.f32 1.0, %v2284_v39 }
 0x6b3   :  { %v2320_v61 = vor.u32 1.1754944e-38, %v2319_v29  ;;  %vm2318_vm13 = vcmp.eq.f32.partialorder %v2317_v24, 8.507059e+37 }
 0x6b4   :  { %v2286_v30 = vmul.f32 %v2588_v49, %v2285_v1 }
 0x6b6   :  { %v2287_v22 = vadd.f32 %v2588_v49, %v2286_v30 }
 0x6b7   :  { %v2590_v59 = vpop.eup %2589 }
 0x6b8   :  { %v2309_v54 = vmul.f32 %v2590_v59, %v2307_v0  ;;  %vm2314_vm8 = vweird.f32 %v2590_v59  ;;  %v2291_v40 = vsel %vm2290_vm14, %v2588_v49, %v2287_v22 }
 0x6b9   :  { %vm2315_vm11 = vmor %vm2313_vm10, %vm2314_vm8  ;;  %v2296_v63 = vsel %vm2293_vm15, %v2295_v51, %v2291_v40 }
 0x6ba   :  { %v2310_v25 = vsub.f32 1.0, %v2309_v54 }
 0x6bc   :  { %v2311_v42 = vmul.f32 %v2590_v59, %v2310_v25 }
 0x6be   :  { %v2312_v53 = vadd.f32 %v2590_v59, %v2311_v42 }
 0x6c0   :  { %v2316_v4 = vsel %vm2315_vm11, %v2590_v59, %v2312_v53 }
 0x6c1   :  { %v2321_v8 = vsel %vm2318_vm13, %v2320_v61, %v2316_v4 }
 0x6c2   :  { %v2323_v41 = vmul.f32 2.0, %v2321_v8 }
 0x6c4   :  { %v2422_v18 = vadd.f32 -1.0, %v2323_v41 }
 0x6c6   :  { %v2325_v2 = vmul.f32 %v2422_v18, %v2296_v63 }
 0x6c8   :  { %2326 = vst [vmem:[#allocation3 + $0x7] sm:$0x1] %v2325_v2 }
 0x6cf   :  { %v2327_v13 = vld [vmem:[#allocation3] sm:$0xff] }
 0x6d0   :  { %v2332_v17 = vmul.f32 %v2429_v12, %v2327_v13 }
 0x6d2   :  { %2333 = vadd.xlane.f32.xlu0 %v2332_v17 }
 0x745   :  { %v2334_v19 = vpop.xlane.xlu0 %2333 }
 0x746   :  { %v2339_v38 = vadd.f32 %v2430_v31, %v2334_v19 }
 0x748   :  { %v2423_v14 = vmul.f32 -1.442695, %v2339_v38 }
 0x74a   :  { %2591 = vpow2.f32 %v2423_v14 }
 0x750   :  { %v2592_v52 = vpop.eup %2591 }
 0x751   :  { %v2343_v7 = vadd.f32 1.0, %v2592_v52 }
 0x753   :  { %2593 = vrcp.f32 %v2343_v7  ;;  %v2355_v33 = vand.u32 2147483648, %v2343_v7  ;;  %v2353_v26 = vand.u32 2147483647, %v2343_v7  ;;  %vm2349_vm1 = vweird.f32 %v2343_v7 }
 0x755   :  { %v2356_v20 = vor.u32 1.1754944e-38, %v2355_v33  ;;  %vm2354_vm4 = vcmp.eq.f32.partialorder %v2353_v26, 8.507059e+37 }
 0x759   :  { %v2594_v45 = vpop.eup %2593 }
 0x75a   :  { %v2345_v50 = vmul.f32 %v2594_v45, %v2343_v7  ;;  %vm2350_vm0 = vweird.f32 %v2594_v45 }
 0x75b   :  { %vm2351_vm2 = vmor %vm2349_vm1, %vm2350_vm0 }
 0x75c   :  { %v2346_v60 = vsub.f32 1.0, %v2345_v50 }
 0x75e   :  { %v2347_v23 = vmul.f32 %v2594_v45, %v2346_v60 }
 0x760   :  { %v2348_v6 = vadd.f32 %v2594_v45, %v2347_v23 }
 0x762   :  { %v2352_v27 = vsel %vm2351_vm2, %v2594_v45, %v2348_v6 }
 0x763   :  { %v2357_v32 = vsel %vm2354_vm4, %v2356_v20, %v2352_v27 }
 0x764   :  { %2360 = vst.msk [vmem:[%s3855_s6] sm:$0xff] %vm2359_vm3, %v2357_v32 }
 0x765   :  { %2365 = vsyncpa [#allocation6], 1 }
 0x766   :  { %2366 = vsyncpa [#allocation8], 1 }

</bundles_post_ra>
